<compile_context>
chip_gen: v6e
topology: v6e:2x2x1
jax: 0.10.0
libtpu: 0.0.40
codegen_flags: <defaults>
</compile_context>

<pallas_src>
import functools
import math

import jax
import jax.numpy as jnp
from jax.experimental import pallas as pl
from jax.experimental.pallas import tpu as pltpu

LANE = 128      # all HBM-visible channel dims are padded to this (lane-dense)
_SUBLANE = 8


def _cdiv(a, b):
    return -(-a // b)


def _round_up(x, m):
    return _cdiv(x, m) * m


def _pad_last(a, to):
    pad = to - a.shape[-1]
    if pad == 0:
        return a
    return jnp.pad(a, [(0, 0)] * (a.ndim - 1) + [(0, pad)])


def _pick_group(n, cap):
    """Largest divisor of n that is <= cap, preferring >= 2 grid steps (v7x)."""
    divs = [d for d in range(1, n + 1) if n % d == 0 and d <= cap]
    if not divs:
        return 1
    multi = [d for d in divs if n // d >= 2]
    return max(multi) if multi else max(divs)


def _shift_plus1(a, axis):
    """out[..., i, ...] = a[..., i-1, ...], zero-filled at i == 0."""
    lead = jnp.zeros_like(jax.lax.slice_in_dim(a, 0, 1, axis=axis))
    body = jax.lax.slice_in_dim(a, 0, a.shape[axis] - 1, axis=axis)
    return jnp.concatenate([lead, body], axis=axis)


# ----------------------------- Pallas kernels ------------------------------

def _matmul_bias_kernel(x_ref, w_ref, b_ref, o_ref, *, relu):
    """o = [relu]((x @ w) + b) -- conv-as-matmul; BN scale pre-folded into w."""
    acc = jnp.dot(x_ref[...], w_ref[...], preferred_element_type=jnp.float32)
    acc = acc + b_ref[...]
    if relu:
        acc = jnp.maximum(acc, 0.0)
    o_ref[...] = acc.astype(o_ref.dtype)


def _pool_conv5_mean_kernel(x_ref, w_ref, b_ref, o_ref):
    """Fused MaxPool2d(3,2,1) + 1x1 conv (+folded BN) + ReLU + spatial mean.

    x_ref block: (B, Ho, 2, Wo, 2*LANE) = conv1 output with H/W parity split
    (hi = 2*ho + hp on dim 2, wi = 2*wo + wp packed into the lane dim), so the
    stride-2 pooling needs no strided slicing.  Zero-fill at the pooling pad
    positions is exact because the inputs are post-ReLU (>= 0).
    """
    x = x_ref[...]                                  # (B, Ho, 2, Wo, 256)
    rows_even = x[:, :, 0]                          # conv1 rows 2*ho
    rows_odd = x[:, :, 1]                           # conv1 rows 2*ho + 1

    def col_max(t):                                 # max over cols {2wo-1, 2wo, 2wo+1}
        even_w = t[..., :LANE]                      # col 2*wo
        odd_w = t[..., LANE:]                       # col 2*wo + 1
        odd_w_m1 = _shift_plus1(odd_w, axis=2)      # col 2*wo - 1
        return jnp.maximum(jnp.maximum(even_w, odd_w), odd_w_m1)

    we = col_max(rows_even)                         # row 2*ho
    wo_ = col_max(rows_odd)                         # row 2*ho + 1
    wo_m1 = _shift_plus1(wo_, axis=1)               # row 2*ho - 1
    pooled = jnp.maximum(jnp.maximum(we, wo_), wo_m1)   # (B, Ho, Wo, 128)

    B, Ho, Wo, C = pooled.shape
    y = jnp.dot(pooled.reshape(B * Ho * Wo, C), w_ref[...],
                preferred_element_type=jnp.float32)
    y = jnp.maximum(y + b_ref[...], 0.0)            # (B*HW, C5pad) f32
    y = y.reshape(B, Ho * Wo, y.shape[-1])
    o_ref[0] = jnp.mean(y, axis=1).astype(o_ref.dtype)


def _temporal_tail_kernel(x_ref, pp_ref, pn_ref, mm_ref,
                          w0, b0, w1, b1, w2, b2, w3, b3, fw, fb, o_ref):
    """4x (Conv1d k=3 p=1 + folded BN + ReLU) -> temporal mean -> Linear.

    Processes S samples per grid step: sequences are flattened to (S*T, C);
    the +/-1 conv1d taps use constant block-diagonal shift matrices (pp/pn)
    on the MXU, and the per-sample temporal mean is a constant (S, S*T) matmul.
    """
    S, T, C = x_ref.shape
    h = x_ref[...].reshape(S * T, C)                # bf16
    pp = pp_ref[...]                                # selects h[t-1], bf16 0/1
    pn = pn_ref[...]                                # selects h[t+1], bf16 0/1

    def conv1d(h, w_ref, b_ref):
        h_prev = jnp.dot(pp, h, preferred_element_type=jnp.float32
                         ).astype(jnp.bfloat16)
        h_next = jnp.dot(pn, h, preferred_element_type=jnp.float32
                         ).astype(jnp.bfloat16)
        y = (jnp.dot(h_prev, w_ref[0], preferred_element_type=jnp.float32)
             + jnp.dot(h, w_ref[1], preferred_element_type=jnp.float32)
             + jnp.dot(h_next, w_ref[2], preferred_element_type=jnp.float32))
        return jnp.maximum(y + b_ref[...], 0.0)     # (S*T, 128) f32

    h = conv1d(h, w0, b0).astype(jnp.bfloat16)
    h = conv1d(h, w1, b1).astype(jnp.bfloat16)
    h = conv1d(h, w2, b2).astype(jnp.bfloat16)
    h = conv1d(h, w3, b3)                           # keep f32 for the mean
    feat = jnp.dot(mm_ref[...], h, preferred_element_type=jnp.float32)  # (S,128)
    logits = jnp.dot(feat.astype(jnp.bfloat16), fw[...],
                     preferred_element_type=jnp.float32) + fb[...]
    o_ref[0] = logits.astype(o_ref.dtype)


# ---------------------------- Pallas wrappers -------------------------------

def matmul_bias_relu(x, w, bias, *, relu=True, out_dtype=jnp.float32,
                     row_tile=1024):
    """[relu]((x @ w) + bias).  x:(M,K), w:(K,Npad) Npad%128==0, bias:(1,Npad).

    Grid/tile are sized so at most a handful of rows (< one sublane tile per
    grid step) are padding -- no full padded copy of x, no wasted MXU tiles --
    while keeping >= 2 parallel steps for v7x megacore when M allows it.
    """
    M, K = x.shape
    Kw, Npad = w.shape
    assert K == Kw and Npad % LANE == 0
    Mpad = _round_up(M, _SUBLANE)
    g = _cdiv(Mpad, row_tile)
    if g < 2 and Mpad >= 2 * _SUBLANE:
        g = 2                                   # keep both v7x TensorCores busy
    tile = _round_up(_cdiv(Mpad, g), _SUBLANE)
    g = _cdiv(Mpad, tile)
    Mfull = g * tile
    if Mfull != M:
        x = jnp.pad(x, ((0, Mfull - M), (0, 0)))

    flops = 2 * Mfull * K * Npad
    bytes_accessed = (Mfull * K * x.dtype.itemsize
                      + K * Npad * w.dtype.itemsize
                      + Npad * bias.dtype.itemsize
                      + Mfull * Npad * jnp.dtype(out_dtype).itemsize)

    out = pl.pallas_call(
        functools.partial(_matmul_bias_kernel, relu=relu),
        out_shape=jax.ShapeDtypeStruct((Mfull, Npad), out_dtype),
        grid=(g,),
        in_specs=[pl.BlockSpec((tile, K), lambda i: (i, 0)),
                  pl.BlockSpec((K, Npad), lambda i: (0, 0)),
                  pl.BlockSpec((1, Npad), lambda i: (0, 0))],
        out_specs=pl.BlockSpec((tile, Npad), lambda i: (i, 0)),
        compiler_params=pltpu.CompilerParams(
            dimension_semantics=("parallel",)),
        cost_estimate=pl.CostEstimate(flops=flops, transcendentals=0,
                                      bytes_accessed=bytes_accessed),
    )(x, w, bias)
    return out[:M] if Mfull != M else out


def pool_conv5_mean(y_parity, w, bias, *, max_block_bytes=8 * 1024 * 1024):
    """Fused maxpool(3,2,1) + conv5(1x1)+BN+ReLU + mean over (H,W).

    y_parity: (N, Ho, 2, Wo, 2*LANE) parity-split view (free reshape) of the
    conv1 output.  Several images per grid step so the MXU sees B_tile*Ho*Wo
    rows per matmul; >= 2 parallel steps kept when the batch allows.
    """
    N, Ho, two, Wo, C2 = y_parity.shape
    assert two == 2 and C2 == 2 * LANE
    per_img = Ho * two * Wo * C2 * y_parity.dtype.itemsize
    b_tile = _pick_group(N, max(1, max_block_bytes // per_img))
    G = N // b_tile
    C5 = w.shape[1]
    out = pl.pallas_call(
        _pool_conv5_mean_kernel,
        out_shape=jax.ShapeDtypeStruct((G, b_tile, C5), jnp.bfloat16),
        grid=(G,),
        in_specs=[pl.BlockSpec((b_tile, Ho, 2, Wo, C2),
                               lambda i: (i, 0, 0, 0, 0)),
                  pl.BlockSpec(w.shape, lambda i: (0, 0)),
                  pl.BlockSpec(bias.shape, lambda i: (0, 0))],
        out_specs=pl.BlockSpec((1, b_tile, C5), lambda i: (i, 0, 0)),
        compiler_params=pltpu.CompilerParams(
            dimension_semantics=("parallel",)),
    )(y_parity, w, bias)
    return out.reshape(N, C5)


def _const_spec(arr):
    nd = arr.ndim
    return pl.BlockSpec(arr.shape, lambda i: (0,) * nd)


def temporal_tail(seq, p, *, max_rows=512):
    """Fused forward_stage1 + forward_stage2 + forward_classifier."""
    Ns, T, C = seq.shape
    s_tile = _pick_group(Ns, max(1, max_rows // T))
    G = Ns // s_tile
    ST = s_tile * T

    # Hoisted constants: block-diagonal shift matrices (per-sample t-1 / t+1
    # selection) and the per-sample temporal-mean averaging matrix.
    i_idx = jnp.arange(ST)[:, None]
    j_idx = jnp.arange(ST)[None, :]
    same = (i_idx // T) == (j_idx // T)
    pprev = ((i_idx == j_idx + 1) & same).astype(jnp.bfloat16)
    pnext = ((i_idx + 1 == j_idx) & same).astype(jnp.bfloat16)
    mmat = jnp.where(jnp.arange(s_tile)[:, None] == (j_idx // T),
                     1.0 / T, 0.0).astype(jnp.float32)

    consts = (pprev, pnext, mmat,
              p["t_w0"], p["t_b0"], p["t_w1"], p["t_b1"],
              p["t_w2"], p["t_b2"], p["t_w3"], p["t_b3"],
              p["fc_w"], p["fc_b"])
    NCpad = p["fc_w"].shape[1]
    out = pl.pallas_call(
        _temporal_tail_kernel,
        out_shape=jax.ShapeDtypeStruct((G, s_tile, NCpad), jnp.float32),
        grid=(G,),
        in_specs=[pl.BlockSpec((s_tile, T, C), lambda s: (s, 0, 0))]
                 + [_const_spec(a) for a in consts],
        out_specs=pl.BlockSpec((1, s_tile, NCpad), lambda s: (s, 0, 0)),
        compiler_params=pltpu.CompilerParams(
            dimension_semantics=("parallel",)),
    )(seq, *consts)
    return out.reshape(Ns, NCpad)


# ------------------------------ glue (plain JAX) ----------------------------

def _im2col_2d(x, k, stride, pad):
    """x: (N,H,W,C) -> (N*Ho*Wo, k*k*C), (kh, kw, C) flattening order."""
    # TODO(synk): fuse the patch construction into the conv1 kernel via
    # per-row-tile halo DMA to remove the patch-matrix HBM round trip.
    N, H, W, C = x.shape
    Ho = (H + 2 * pad - k) // stride + 1
    Wo = (W + 2 * pad - k) // stride + 1
    xp = jnp.pad(x, ((0, 0), (pad, pad), (pad, pad), (0, 0)))
    cols = []
    for dh in range(k):
        for dw in range(k):
            v = jax.lax.slice(
                xp, (0, dh, dw, 0),
                (N, dh + stride * (Ho - 1) + 1, dw + stride * (Wo - 1) + 1, C),
                (1, stride, stride, 1))
            cols.append(v)
    patches = jnp.concatenate(cols, axis=-1)
    return patches.reshape(N * Ho * Wo, k * k * C), (N, Ho, Wo)


# ------------------------------ forward pass --------------------------------

def forward(params, x_nchw, *, im_per_sample, num_classes):
    # NCHW (PyTorch) -> NHWC, bf16 MXU operands (accumulation stays f32).
    x = jnp.transpose(x_nchw, (0, 2, 3, 1)).astype(jnp.bfloat16)

    # conv1: Conv2d(3, C0, 3, stride=2, pad=1, bias=False) + BN + ReLU
    patches, (N, Hi, Wi) = _im2col_2d(x, k=3, stride=2, pad=1)
    patches = _pad_last(patches, params["conv1_w"].shape[0])     # K 27 -> 32
    y = matmul_bias_relu(patches, params["conv1_w"], params["conv1_b"],
                         relu=True, out_dtype=jnp.bfloat16)      # (N*Hi*Wi, 128)

    # TODO(synk): stage2/stage3/stage4 (InvertedResidual), Modulator and
    # LocalFeatureExtractor definitions are not provided in the reference
    # source; treated as identity (toy channel config keeps shapes consistent).

    # View the conv1 output with H/W parity split (free reshape) so the fused
    # maxpool + conv5 + spatial-mean kernel needs no strided slicing.
    assert Hi % 2 == 0 and Wi % 2 == 0  # TODO(synk): odd post-conv1 spatial dims
    y = y.reshape(N, Hi // 2, 2, Wi // 2, 2 * LANE)
    feat = pool_conv5_mean(y, params["conv5_w"], params["conv5_b"])  # (N, 128)

    # forward_stage1 + forward_stage2 + forward_classifier, fused in one launch
    assert N % im_per_sample == 0
    seq = feat.reshape(N // im_per_sample, im_per_sample, feat.shape[-1])
    logits = temporal_tail(seq, params)                   # (n_samples, 128)
    return logits[:, :num_classes]


# ------------------------------ parameters ----------------------------------

def init_params(key, stages_out_channels=(8, 8, 8, 8, 16), num_classes=8):
    C0, C5 = stages_out_channels[0], stages_out_channels[-1]
    Cin5 = stages_out_channels[3]
    assert max(C0, C5, Cin5, num_classes) <= LANE
    it = iter(jax.random.split(key, 64))

    def nrm(shape, scale):
        return scale * jax.random.normal(next(it), shape, jnp.float32)

    def bn_fold(c, eps=1e-5):
        gamma = 1.0 + 0.1 * jax.random.normal(next(it), (c,), jnp.float32)
        beta = 0.1 * jax.random.normal(next(it), (c,), jnp.float32)
        mean = 0.1 * jax.random.normal(next(it), (c,), jnp.float32)
        var = 0.5 + jax.random.uniform(next(it), (c,), jnp.float32)
        scale = gamma * jax.lax.rsqrt(var + eps)
        return scale, beta - mean * scale

    p = {}

    # conv1: weight (C0, 3, 3, 3) stored as (27, C0); BN scale folded, padded.
    w = nrm((3 * 3 * 3, C0), 1.0 / math.sqrt(27))
    s, sh = bn_fold(C0)
    w = w * s[None, :]
    p["conv1_w"] = jnp.pad(w, ((0, 32 - 27), (0, LANE - C0))).astype(jnp.bfloat16)
    p["conv1_b"] = jnp.pad(sh[None, :], ((0, 0), (0, LANE - C0)))

    # conv5: weight (C5, Cin5, 1, 1) stored as (Cin5, C5); padded both ways
    # (extra rows are zero -> they multiply the zero-padded channels).
    w = nrm((Cin5, C5), 1.0 / math.sqrt(Cin5))
    s, sh = bn_fold(C5)
    w = w * s[None, :]
    p["conv5_w"] = jnp.pad(w, ((0, LANE - Cin5), (0, LANE - C5))).astype(jnp.bfloat16)
    p["conv5_b"] = jnp.pad(sh[None, :], ((0, 0), (0, LANE - C5)))

    # conv1d blocks: Conv1d(k=3, pad=1, bias=True) + BN + ReLU, BN folded.
    # All cin/cout are zero-padded to 128 lanes (exact: zero rows/cols, ReLU(0)=0).
    def c1d(cin, cout):
        w = nrm((3, cin, cout), 1.0 / math.sqrt(3 * cin))
        b_conv = nrm((cout,), 1.0 / math.sqrt(3 * cin))
        s, sh = bn_fold(cout)
        w = w * s[None, None, :]
        b = b_conv * s + sh
        w = jnp.pad(w, ((0, 0), (0, LANE - cin), (0, LANE - cout)))
        b = jnp.pad(b[None, :], ((0, 0), (0, LANE - cout)))
        return w.astype(jnp.bfloat16), b

    p["t_w0"], p["t_b0"] = c1d(C5, 64)     # conv1d_0
    p["t_w1"], p["t_b1"] = c1d(64, 64)     # conv1d_1
    p["t_w2"], p["t_b2"] = c1d(64, 128)    # conv1d_2
    p["t_w3"], p["t_b3"] = c1d(128, 128)   # conv1d_3

    # classifier: Linear(128, num_classes), output padded to 128 lanes.
    w = nrm((128, num_classes), 1.0 / math.sqrt(128))
    b = nrm((num_classes,), 1.0 / math.sqrt(128))
    p["fc_w"] = jnp.pad(w, ((0, 0), (0, LANE - num_classes))).astype(jnp.bfloat16)
    p["fc_b"] = jnp.pad(b[None, :], ((0, 0), (0, LANE - num_classes)))
    return p


# ---------------------------------- main -------------------------------------

if __name__ == "__main__":
    IM_PER_SAMPLE = 5        # small stand-in for the default 15
    N_SAMPLES = 2
    NUM_CLASSES = 8

    key = jax.random.PRNGKey(0)
    kx, kp = jax.random.split(key)

    # PyTorch-style NCHW input: batch must be a multiple of im_per_sample.
    x = jax.random.normal(kx, (N_SAMPLES * IM_PER_SAMPLE, 3, 16, 16), jnp.float32)
    params = init_params(kp, stages_out_channels=(8, 8, 8, 8, 16),
                         num_classes=NUM_CLASSES)

    fwd = jax.jit(functools.partial(forward, im_per_sample=IM_PER_SAMPLE,
                                    num_classes=NUM_CLASSES))
    out = jax.block_until_ready(fwd(params, x))

    assert out.shape == (N_SAMPLES, NUM_CLASSES), out.shape
    assert out.dtype == jnp.float32
    assert bool(jnp.all(jnp.isfinite(out)))
    print("KERNEL_OK")
</pallas_src>

<mosaic_0001>
module attributes {stable_mosaic.version = 11 : i64} {
  func.func @_matmul_bias_kernel(%arg0: i32, %arg1: memref<320x32xbf16, #tpu.memory_space<vmem>>, %arg2: memref<32x128xbf16, #tpu.memory_space<vmem>>, %arg3: memref<1x128xf32, #tpu.memory_space<vmem>>, %arg4: memref<320x128xbf16, #tpu.memory_space<vmem>>) attributes {dimension_semantics = [#tpu.dimension_semantics<parallel>], iteration_bounds = array<i64: 2>, scalar_prefetch = 0 : i64, scratch_operands = 0 : i64, tpu.core_type = #tpu.core_type<tc>, window_params = [{transform_indices = @transform_0, window_bounds = array<i64: 320, 32>}, {pipeline_mode = #tpu.pipeline_mode<synchronous>, transform_indices = @transform_1, window_bounds = array<i64: 32, 128>}, {pipeline_mode = #tpu.pipeline_mode<synchronous>, transform_indices = @transform_2, window_bounds = array<i64: 1, 128>}, {transform_indices = @transform_3, window_bounds = array<i64: 320, 128>}]} {
    %c0 = arith.constant 0 : index
    %c0_0 = arith.constant 0 : index
    %0 = vector.load %arg1[%c0, %c0_0] : memref<320x32xbf16, #tpu.memory_space<vmem>>, vector<320x32xbf16>
    %c0_1 = arith.constant 0 : index
    %c0_2 = arith.constant 0 : index
    %1 = vector.load %arg2[%c0_1, %c0_2] : memref<32x128xbf16, #tpu.memory_space<vmem>>, vector<32x128xbf16>
    %cst = arith.constant dense<0.000000e+00> : vector<320x128xf32>
    %2 = tpu.matmul %0, %1, %cst {dimension_numbers = #tpu.dot_dimension_numbers<[1], [0], [0], [1], [0, 0, 1, 1], [], []>} : vector<320x32xbf16>, vector<32x128xbf16>, vector<320x128xf32> -> vector<320x128xf32>
    %c0_3 = arith.constant 0 : index
    %c0_4 = arith.constant 0 : index
    %3 = vector.load %arg3[%c0_3, %c0_4] : memref<1x128xf32, #tpu.memory_space<vmem>>, vector<1x128xf32>
    %4 = vector.broadcast %3 : vector<1x128xf32> to vector<320x128xf32>
    %5 = arith.addf %2, %4 : vector<320x128xf32>
    %cst_5 = arith.constant 0.000000e+00 : f32
    %6 = vector.broadcast %cst_5 : f32 to vector<320x128xf32>
    %7 = arith.maximumf %5, %6 : vector<320x128xf32>
    %8 = arith.truncf %7 : vector<320x128xf32> to vector<320x128xbf16>
    %c0_6 = arith.constant 0 : index
    %c0_7 = arith.constant 0 : index
    %9 = vector.load %arg4[%c0_6, %c0_7] : memref<320x128xbf16, #tpu.memory_space<vmem>>, vector<320x128xbf16>
    tpu.vector_store %arg4[%c0_6, %c0_7], %8 {strides = array<i32>} : memref<320x128xbf16, #tpu.memory_space<vmem>>, vector<320x128xbf16>,
    return
  }
  func.func @transform_0(%arg0: i32) -> (i32, i32) {
    %c0_i32 = arith.constant 0 : i32
    %c0_i32_0 = arith.constant 0 : i32
    return %arg0, %c0_i32 : i32, i32
  }
  func.func @transform_1(%arg0: i32) -> (i32, i32) {
    %c0_i32 = arith.constant 0 : i32
    %c0_i32_0 = arith.constant 0 : i32
    %c0_i32_1 = arith.constant 0 : i32
    return %c0_i32, %c0_i32_0 : i32, i32
  }
  func.func @transform_2(%arg0: i32) -> (i32, i32) {
    %c0_i32 = arith.constant 0 : i32
    %c0_i32_0 = arith.constant 0 : i32
    %c0_i32_1 = arith.constant 0 : i32
    return %c0_i32, %c0_i32_0 : i32, i32
  }
  func.func @transform_3(%arg0: i32) -> (i32, i32) {
    %c0_i32 = arith.constant 0 : i32
    %c0_i32_0 = arith.constant 0 : i32
    return %arg0, %c0_i32 : i32, i32
  }
}

module attributes {stable_mosaic.version = 11 : i64} {
  func.func @_pool_conv5_mean_kernel(%arg0: i32, %arg1: memref<5x4x2x4x256xbf16, #tpu.memory_space<vmem>>, %arg2: memref<128x128xbf16, #tpu.memory_space<vmem>>, %arg3: memref<1x128xf32, #tpu.memory_space<vmem>>, %arg4: memref<1x5x128xbf16, #tpu.memory_space<vmem>>) attributes {dimension_semantics = [#tpu.dimension_semantics<parallel>], iteration_bounds = array<i64: 2>, scalar_prefetch = 0 : i64, scratch_operands = 0 : i64, tpu.core_type = #tpu.core_type<tc>, window_params = [{transform_indices = @transform_0, window_bounds = array<i64: 5, 4, 2, 4, 256>}, {pipeline_mode = #tpu.pipeline_mode<synchronous>, transform_indices = @transform_1, window_bounds = array<i64: 128, 128>}, {pipeline_mode = #tpu.pipeline_mode<synchronous>, transform_indices = @transform_2, window_bounds = array<i64: 1, 128>}, {transform_indices = @transform_3, window_bounds = array<i64: 1, 5, 128>}]} {
    %c0 = arith.constant 0 : index
    %c0_0 = arith.constant 0 : index
    %c0_1 = arith.constant 0 : index
    %c0_2 = arith.constant 0 : index
    %c0_3 = arith.constant 0 : index
    %0 = vector.load %arg1[%c0, %c0_0, %c0_1, %c0_2, %c0_3] : memref<5x4x2x4x256xbf16, #tpu.memory_space<vmem>>, vector<5x4x2x4x256xbf16>
    %1 = vector.extract_strided_slice %0 {offsets = [0, 0, 0, 0, 0], sizes = [5, 4, 1, 4, 256], strides = [1, 1, 1, 1, 1]} : vector<5x4x2x4x256xbf16> to vector<5x4x1x4x256xbf16>
    %2 = vector.shape_cast %1 : vector<5x4x1x4x256xbf16> to vector<5x4x4x256xbf16>
    %3 = vector.extract_strided_slice %0 {offsets = [0, 0, 1, 0, 0], sizes = [5, 4, 1, 4, 256], strides = [1, 1, 1, 1, 1]} : vector<5x4x2x4x256xbf16> to vector<5x4x1x4x256xbf16>
    %4 = vector.shape_cast %3 : vector<5x4x1x4x256xbf16> to vector<5x4x4x256xbf16>
    %5 = vector.extract_strided_slice %2 {offsets = [0, 0, 0, 0], sizes = [5, 4, 4, 128], strides = [1, 1, 1, 1]} : vector<5x4x4x256xbf16> to vector<5x4x4x128xbf16>
    %6 = vector.extract_strided_slice %2 {offsets = [0, 0, 0, 128], sizes = [5, 4, 4, 128], strides = [1, 1, 1, 1]} : vector<5x4x4x256xbf16> to vector<5x4x4x128xbf16>
    %cst = arith.constant 0.000000e+00 : bf16
    %7 = vector.broadcast %cst : bf16 to vector<5x4x1x128xbf16>
    %8 = vector.extract_strided_slice %6 {offsets = [0, 0, 0, 0], sizes = [5, 4, 3, 128], strides = [1, 1, 1, 1]} : vector<5x4x4x128xbf16> to vector<5x4x3x128xbf16>
    %9 = tpu.concatenate %7, %8 in 2 : vector<5x4x1x128xbf16>, vector<5x4x3x128xbf16> -> vector<5x4x4x128xbf16>
    %10 = arith.maximumf %5, %6 : vector<5x4x4x128xbf16>
    %11 = arith.maximumf %10, %9 : vector<5x4x4x128xbf16>
    %12 = vector.extract_strided_slice %4 {offsets = [0, 0, 0, 0], sizes = [5, 4, 4, 128], strides = [1, 1, 1, 1]} : vector<5x4x4x256xbf16> to vector<5x4x4x128xbf16>
    %13 = vector.extract_strided_slice %4 {offsets = [0, 0, 0, 128], sizes = [5, 4, 4, 128], strides = [1, 1, 1, 1]} : vector<5x4x4x256xbf16> to vector<5x4x4x128xbf16>
    %cst_4 = arith.constant 0.000000e+00 : bf16
    %14 = vector.broadcast %cst_4 : bf16 to vector<5x4x1x128xbf16>
    %15 = vector.extract_strided_slice %13 {offsets = [0, 0, 0, 0], sizes = [5, 4, 3, 128], strides = [1, 1, 1, 1]} : vector<5x4x4x128xbf16> to vector<5x4x3x128xbf16>
    %16 = tpu.concatenate %14, %15 in 2 : vector<5x4x1x128xbf16>, vector<5x4x3x128xbf16> -> vector<5x4x4x128xbf16>
    %17 = arith.maximumf %12, %13 : vector<5x4x4x128xbf16>
    %18 = arith.maximumf %17, %16 : vector<5x4x4x128xbf16>
    %cst_5 = arith.constant 0.000000e+00 : bf16
    %19 = vector.broadcast %cst_5 : bf16 to vector<5x1x4x128xbf16>
    %20 = vector.extract_strided_slice %18 {offsets = [0, 0, 0, 0], sizes = [5, 3, 4, 128], strides = [1, 1, 1, 1]} : vector<5x4x4x128xbf16> to vector<5x3x4x128xbf16>
    %21 = tpu.concatenate %19, %20 in 1 : vector<5x1x4x128xbf16>, vector<5x3x4x128xbf16> -> vector<5x4x4x128xbf16>
    %22 = arith.maximumf %11, %18 : vector<5x4x4x128xbf16>
    %23 = arith.maximumf %22, %21 : vector<5x4x4x128xbf16>
    %24 = vector.shape_cast %23 : vector<5x4x4x128xbf16> to vector<80x128xbf16>
    %c0_6 = arith.constant 0 : index
    %c0_7 = arith.constant 0 : index
    %25 = vector.load %arg2[%c0_6, %c0_7] : memref<128x128xbf16, #tpu.memory_space<vmem>>, vector<128x128xbf16>
    %cst_8 = arith.constant dense<0.000000e+00> : vector<80x128xf32>
    %26 = tpu.matmul %24, %25, %cst_8 {dimension_numbers = #tpu.dot_dimension_numbers<[1], [0], [0], [1], [0, 0, 1, 1], [], []>} : vector<80x128xbf16>, vector<128x128xbf16>, vector<80x128xf32> -> vector<80x128xf32>
    %c0_9 = arith.constant 0 : index
    %c0_10 = arith.constant 0 : index
    %27 = vector.load %arg3[%c0_9, %c0_10] : memref<1x128xf32, #tpu.memory_space<vmem>>, vector<1x128xf32>
    %28 = vector.broadcast %27 : vector<1x128xf32> to vector<80x128xf32>
    %29 = arith.addf %26, %28 : vector<80x128xf32>
    %cst_11 = arith.constant 0.000000e+00 : f32
    %30 = vector.broadcast %cst_11 : f32 to vector<80x128xf32>
    %31 = arith.maximumf %29, %30 : vector<80x128xf32>
    %32 = vector.shape_cast %31 : vector<80x128xf32> to vector<5x16x128xf32>
    %cst_12 = arith.constant dense<0.000000e+00> : vector<5x128xf32>
    %33 = vector.multi_reduction <add>, %32, %cst_12 [1] : vector<5x16x128xf32> to vector<5x128xf32>
    %cst_13 = arith.constant 1.600000e+01 : f32
    %34 = vector.broadcast %cst_13 : f32 to vector<5x128xf32>
    %35 = arith.divf %33, %34 : vector<5x128xf32>
    %36 = arith.truncf %35 : vector<5x128xf32> to vector<5x128xbf16>
    %c0_14 = arith.constant 0 : index
    %c0_15 = arith.constant 0 : index
    %c0_16 = arith.constant 0 : index
    %37 = vector.load %arg4[%c0_14, %c0_15, %c0_16] : memref<1x5x128xbf16, #tpu.memory_space<vmem>>, vector<1x5x128xbf16>
    %38 = vector.shape_cast %37 : vector<1x5x128xbf16> to vector<5x128xbf16>
    %39 = vector.shape_cast %36 : vector<5x128xbf16> to vector<1x5x128xbf16>
    tpu.vector_store %arg4[%c0_14, %c0_15, %c0_16], %39 {strides = array<i32>} : memref<1x5x128xbf16, #tpu.memory_space<vmem>>, vector<1x5x128xbf16>,
    return
  }
  func.func @transform_0(%arg0: i32) -> (i32, i32, i32, i32, i32) {
    %c0_i32 = arith.constant 0 : i32
    %c0_i32_0 = arith.constant 0 : i32
    %c0_i32_1 = arith.constant 0 : i32
    %c0_i32_2 = arith.constant 0 : i32
    %c0_i32_3 = arith.constant 0 : i32
    return %arg0, %c0_i32, %c0_i32_0, %c0_i32_1, %c0_i32_2 : i32, i32, i32, i32, i32
  }
  func.func @transform_1(%arg0: i32) -> (i32, i32) {
    %c0_i32 = arith.constant 0 : i32
    %c0_i32_0 = arith.constant 0 : i32
    %c0_i32_1 = arith.constant 0 : i32
    return %c0_i32, %c0_i32_0 : i32, i32
  }
  func.func @transform_2(%arg0: i32) -> (i32, i32) {
    %c0_i32 = arith.constant 0 : i32
    %c0_i32_0 = arith.constant 0 : i32
    %c0_i32_1 = arith.constant 0 : i32
    return %c0_i32, %c0_i32_0 : i32, i32
  }
  func.func @transform_3(%arg0: i32) -> (i32, i32, i32) {
    %c0_i32 = arith.constant 0 : i32
    %c0_i32_0 = arith.constant 0 : i32
    %c0_i32_1 = arith.constant 0 : i32
    return %arg0, %c0_i32, %c0_i32_0 : i32, i32, i32
  }
}

module attributes {stable_mosaic.version = 11 : i64} {
  func.func @_temporal_tail_kernel(%arg0: i32, %arg1: memref<1x5x128xbf16, #tpu.memory_space<vmem>>, %arg2: memref<5x5xbf16, #tpu.memory_space<vmem>>, %arg3: memref<5x5xbf16, #tpu.memory_space<vmem>>, %arg4: memref<1x5xf32, #tpu.memory_space<vmem>>, %arg5: memref<3x128x128xbf16, #tpu.memory_space<vmem>>, %arg6: memref<1x128xf32, #tpu.memory_space<vmem>>, %arg7: memref<3x128x128xbf16, #tpu.memory_space<vmem>>, %arg8: memref<1x128xf32, #tpu.memory_space<vmem>>, %arg9: memref<3x128x128xbf16, #tpu.memory_space<vmem>>, %arg10: memref<1x128xf32, #tpu.memory_space<vmem>>, %arg11: memref<3x128x128xbf16, #tpu.memory_space<vmem>>, %arg12: memref<1x128xf32, #tpu.memory_space<vmem>>, %arg13: memref<128x128xbf16, #tpu.memory_space<vmem>>, %arg14: memref<1x128xf32, #tpu.memory_space<vmem>>, %arg15: memref<1x1x128xf32, #tpu.memory_space<vmem>>) attributes {dimension_semantics = [#tpu.dimension_semantics<parallel>], iteration_bounds = array<i64: 2>, scalar_prefetch = 0 : i64, scratch_operands = 0 : i64, tpu.core_type = #tpu.core_type<tc>, window_params = [{transform_indices = @transform_0, window_bounds = array<i64: 1, 5, 128>}, {pipeline_mode = #tpu.pipeline_mode<synchronous>, transform_indices = @transform_1, window_bounds = array<i64: 5, 5>}, {pipeline_mode = #tpu.pipeline_mode<synchronous>, transform_indices = @transform_2, window_bounds = array<i64: 5, 5>}, {pipeline_mode = #tpu.pipeline_mode<synchronous>, transform_indices = @transform_3, window_bounds = array<i64: 1, 5>}, {pipeline_mode = #tpu.pipeline_mode<synchronous>, transform_indices = @transform_4, window_bounds = array<i64: 3, 128, 128>}, {pipeline_mode = #tpu.pipeline_mode<synchronous>, transform_indices = @transform_5, window_bounds = array<i64: 1, 128>}, {pipeline_mode = #tpu.pipeline_mode<synchronous>, transform_indices = @transform_6, window_bounds = array<i64: 3, 128, 128>}, {pipeline_mode = #tpu.pipeline_mode<synchronous>, transform_indices = @transform_7, window_bounds = array<i64: 1, 128>}, {pipeline_mode = #tpu.pipeline_mode<synchronous>, transform_indices = @transform_8, window_bounds = array<i64: 3, 128, 128>}, {pipeline_mode = #tpu.pipeline_mode<synchronous>, transform_indices = @transform_9, window_bounds = array<i64: 1, 128>}, {pipeline_mode = #tpu.pipeline_mode<synchronous>, transform_indices = @transform_10, window_bounds = array<i64: 3, 128, 128>}, {pipeline_mode = #tpu.pipeline_mode<synchronous>, transform_indices = @transform_11, window_bounds = array<i64: 1, 128>}, {pipeline_mode = #tpu.pipeline_mode<synchronous>, transform_indices = @transform_12, window_bounds = array<i64: 128, 128>}, {pipeline_mode = #tpu.pipeline_mode<synchronous>, transform_indices = @transform_13, window_bounds = array<i64: 1, 128>}, {transform_indices = @transform_14, window_bounds = array<i64: 1, 1, 128>}]} {
    %c0 = arith.constant 0 : index
    %c0_0 = arith.constant 0 : index
    %c0_1 = arith.constant 0 : index
    %0 = vector.load %arg1[%c0, %c0_0, %c0_1] : memref<1x5x128xbf16, #tpu.memory_space<vmem>>, vector<1x5x128xbf16>
    %1 = vector.shape_cast %0 : vector<1x5x128xbf16> to vector<5x128xbf16>
    %c0_2 = arith.constant 0 : index
    %c0_3 = arith.constant 0 : index
    %2 = vector.load %arg2[%c0_2, %c0_3] : memref<5x5xbf16, #tpu.memory_space<vmem>>, vector<5x5xbf16>
    %c0_4 = arith.constant 0 : index
    %c0_5 = arith.constant 0 : index
    %3 = vector.load %arg3[%c0_4, %c0_5] : memref<5x5xbf16, #tpu.memory_space<vmem>>, vector<5x5xbf16>
    %cst = arith.constant dense<0.000000e+00> : vector<5x128xf32>
    %4 = tpu.matmul %2, %1, %cst {dimension_numbers = #tpu.dot_dimension_numbers<[1], [0], [0], [1], [0, 0, 1, 1], [], []>} : vector<5x5xbf16>, vector<5x128xbf16>, vector<5x128xf32> -> vector<5x128xf32>
    %5 = arith.truncf %4 : vector<5x128xf32> to vector<5x128xbf16>
    %cst_6 = arith.constant dense<0.000000e+00> : vector<5x128xf32>
    %6 = tpu.matmul %3, %1, %cst_6 {dimension_numbers = #tpu.dot_dimension_numbers<[1], [0], [0], [1], [0, 0, 1, 1], [], []>} : vector<5x5xbf16>, vector<5x128xbf16>, vector<5x128xf32> -> vector<5x128xf32>
    %7 = arith.truncf %6 : vector<5x128xf32> to vector<5x128xbf16>
    %c0_7 = arith.constant 0 : index
    %c0_8 = arith.constant 0 : index
    %c0_9 = arith.constant 0 : index
    %8 = vector.load %arg5[%c0_7, %c0_8, %c0_9] : memref<3x128x128xbf16, #tpu.memory_space<vmem>>, vector<1x128x128xbf16>
    %9 = vector.shape_cast %8 : vector<1x128x128xbf16> to vector<128x128xbf16>
    %cst_10 = arith.constant dense<0.000000e+00> : vector<5x128xf32>
    %10 = tpu.matmul %5, %9, %cst_10 {dimension_numbers = #tpu.dot_dimension_numbers<[1], [0], [0], [1], [0, 0, 1, 1], [], []>} : vector<5x128xbf16>, vector<128x128xbf16>, vector<5x128xf32> -> vector<5x128xf32>
    %c1 = arith.constant 1 : index
    %c0_11 = arith.constant 0 : index
    %c0_12 = arith.constant 0 : index
    %11 = vector.load %arg5[%c1, %c0_11, %c0_12] : memref<3x128x128xbf16, #tpu.memory_space<vmem>>, vector<1x128x128xbf16>
    %12 = vector.shape_cast %11 : vector<1x128x128xbf16> to vector<128x128xbf16>
    %cst_13 = arith.constant dense<0.000000e+00> : vector<5x128xf32>
    %13 = tpu.matmul %1, %12, %cst_13 {dimension_numbers = #tpu.dot_dimension_numbers<[1], [0], [0], [1], [0, 0, 1, 1], [], []>} : vector<5x128xbf16>, vector<128x128xbf16>, vector<5x128xf32> -> vector<5x128xf32>
    %14 = arith.addf %10, %13 : vector<5x128xf32>
    %c2 = arith.constant 2 : index
    %c0_14 = arith.constant 0 : index
    %c0_15 = arith.constant 0 : index
    %15 = vector.load %arg5[%c2, %c0_14, %c0_15] : memref<3x128x128xbf16, #tpu.memory_space<vmem>>, vector<1x128x128xbf16>
    %16 = vector.shape_cast %15 : vector<1x128x128xbf16> to vector<128x128xbf16>
    %cst_16 = arith.constant dense<0.000000e+00> : vector<5x128xf32>
    %17 = tpu.matmul %7, %16, %cst_16 {dimension_numbers = #tpu.dot_dimension_numbers<[1], [0], [0], [1], [0, 0, 1, 1], [], []>} : vector<5x128xbf16>, vector<128x128xbf16>, vector<5x128xf32> -> vector<5x128xf32>
    %18 = arith.addf %14, %17 : vector<5x128xf32>
    %c0_17 = arith.constant 0 : index
    %c0_18 = arith.constant 0 : index
    %19 = vector.load %arg6[%c0_17, %c0_18] : memref<1x128xf32, #tpu.memory_space<vmem>>, vector<1x128xf32>
    %20 = vector.broadcast %19 : vector<1x128xf32> to vector<5x128xf32>
    %21 = arith.addf %18, %20 : vector<5x128xf32>
    %cst_19 = arith.constant 0.000000e+00 : f32
    %22 = vector.broadcast %cst_19 : f32 to vector<5x128xf32>
    %23 = arith.maximumf %21, %22 : vector<5x128xf32>
    %24 = arith.truncf %23 : vector<5x128xf32> to vector<5x128xbf16>
    %cst_20 = arith.constant dense<0.000000e+00> : vector<5x128xf32>
    %25 = tpu.matmul %2, %24, %cst_20 {dimension_numbers = #tpu.dot_dimension_numbers<[1], [0], [0], [1], [0, 0, 1, 1], [], []>} : vector<5x5xbf16>, vector<5x128xbf16>, vector<5x128xf32> -> vector<5x128xf32>
    %26 = arith.truncf %25 : vector<5x128xf32> to vector<5x128xbf16>
    %cst_21 = arith.constant dense<0.000000e+00> : vector<5x128xf32>
    %27 = tpu.matmul %3, %24, %cst_21 {dimension_numbers = #tpu.dot_dimension_numbers<[1], [0], [0], [1], [0, 0, 1, 1], [], []>} : vector<5x5xbf16>, vector<5x128xbf16>, vector<5x128xf32> -> vector<5x128xf32>
    %28 = arith.truncf %27 : vector<5x128xf32> to vector<5x128xbf16>
    %c0_22 = arith.constant 0 : index
    %c0_23 = arith.constant 0 : index
    %c0_24 = arith.constant 0 : index
    %29 = vector.load %arg7[%c0_22, %c0_23, %c0_24] : memref<3x128x128xbf16, #tpu.memory_space<vmem>>, vector<1x128x128xbf16>
    %30 = vector.shape_cast %29 : vector<1x128x128xbf16> to vector<128x128xbf16>
    %cst_25 = arith.constant dense<0.000000e+00> : vector<5x128xf32>
    %31 = tpu.matmul %26, %30, %cst_25 {dimension_numbers = #tpu.dot_dimension_numbers<[1], [0], [0], [1], [0, 0, 1, 1], [], []>} : vector<5x128xbf16>, vector<128x128xbf16>, vector<5x128xf32> -> vector<5x128xf32>
    %c1_26 = arith.constant 1 : index
    %c0_27 = arith.constant 0 : index
    %c0_28 = arith.constant 0 : index
    %32 = vector.load %arg7[%c1_26, %c0_27, %c0_28] : memref<3x128x128xbf16, #tpu.memory_space<vmem>>, vector<1x128x128xbf16>
    %33 = vector.shape_cast %32 : vector<1x128x128xbf16> to vector<128x128xbf16>
    %cst_29 = arith.constant dense<0.000000e+00> : vector<5x128xf32>
    %34 = tpu.matmul %24, %33, %cst_29 {dimension_numbers = #tpu.dot_dimension_numbers<[1], [0], [0], [1], [0, 0, 1, 1], [], []>} : vector<5x128xbf16>, vector<128x128xbf16>, vector<5x128xf32> -> vector<5x128xf32>
    %35 = arith.addf %31, %34 : vector<5x128xf32>
    %c2_30 = arith.constant 2 : index
    %c0_31 = arith.constant 0 : index
    %c0_32 = arith.constant 0 : index
    %36 = vector.load %arg7[%c2_30, %c0_31, %c0_32] : memref<3x128x128xbf16, #tpu.memory_space<vmem>>, vector<1x128x128xbf16>
    %37 = vector.shape_cast %36 : vector<1x128x128xbf16> to vector<128x128xbf16>
    %cst_33 = arith.constant dense<0.000000e+00> : vector<5x128xf32>
    %38 = tpu.matmul %28, %37, %cst_33 {dimension_numbers = #tpu.dot_dimension_numbers<[1], [0], [0], [1], [0, 0, 1, 1], [], []>} : vector<5x128xbf16>, vector<128x128xbf16>, vector<5x128xf32> -> vector<5x128xf32>
    %39 = arith.addf %35, %38 : vector<5x128xf32>
    %c0_34 = arith.constant 0 : index
    %c0_35 = arith.constant 0 : index
    %40 = vector.load %arg8[%c0_34, %c0_35] : memref<1x128xf32, #tpu.memory_space<vmem>>, vector<1x128xf32>
    %41 = vector.broadcast %40 : vector<1x128xf32> to vector<5x128xf32>
    %42 = arith.addf %39, %41 : vector<5x128xf32>
    %cst_36 = arith.constant 0.000000e+00 : f32
    %43 = vector.broadcast %cst_36 : f32 to vector<5x128xf32>
    %44 = arith.maximumf %42, %43 : vector<5x128xf32>
    %45 = arith.truncf %44 : vector<5x128xf32> to vector<5x128xbf16>
    %cst_37 = arith.constant dense<0.000000e+00> : vector<5x128xf32>
    %46 = tpu.matmul %2, %45, %cst_37 {dimension_numbers = #tpu.dot_dimension_numbers<[1], [0], [0], [1], [0, 0, 1, 1], [], []>} : vector<5x5xbf16>, vector<5x128xbf16>, vector<5x128xf32> -> vector<5x128xf32>
    %47 = arith.truncf %46 : vector<5x128xf32> to vector<5x128xbf16>
    %cst_38 = arith.constant dense<0.000000e+00> : vector<5x128xf32>
    %48 = tpu.matmul %3, %45, %cst_38 {dimension_numbers = #tpu.dot_dimension_numbers<[1], [0], [0], [1], [0, 0, 1, 1], [], []>} : vector<5x5xbf16>, vector<5x128xbf16>, vector<5x128xf32> -> vector<5x128xf32>
    %49 = arith.truncf %48 : vector<5x128xf32> to vector<5x128xbf16>
    %c0_39 = arith.constant 0 : index
    %c0_40 = arith.constant 0 : index
    %c0_41 = arith.constant 0 : index
    %50 = vector.load %arg9[%c0_39, %c0_40, %c0_41] : memref<3x128x128xbf16, #tpu.memory_space<vmem>>, vector<1x128x128xbf16>
    %51 = vector.shape_cast %50 : vector<1x128x128xbf16> to vector<128x128xbf16>
    %cst_42 = arith.constant dense<0.000000e+00> : vector<5x128xf32>
    %52 = tpu.matmul %47, %51, %cst_42 {dimension_numbers = #tpu.dot_dimension_numbers<[1], [0], [0], [1], [0, 0, 1, 1], [], []>} : vector<5x128xbf16>, vector<128x128xbf16>, vector<5x128xf32> -> vector<5x128xf32>
    %c1_43 = arith.constant 1 : index
    %c0_44 = arith.constant 0 : index
    %c0_45 = arith.constant 0 : index
    %53 = vector.load %arg9[%c1_43, %c0_44, %c0_45] : memref<3x128x128xbf16, #tpu.memory_space<vmem>>, vector<1x128x128xbf16>
    %54 = vector.shape_cast %53 : vector<1x128x128xbf16> to vector<128x128xbf16>
    %cst_46 = arith.constant dense<0.000000e+00> : vector<5x128xf32>
    %55 = tpu.matmul %45, %54, %cst_46 {dimension_numbers = #tpu.dot_dimension_numbers<[1], [0], [0], [1], [0, 0, 1, 1], [], []>} : vector<5x128xbf16>, vector<128x128xbf16>, vector<5x128xf32> -> vector<5x128xf32>
    %56 = arith.addf %52, %55 : vector<5x128xf32>
    %c2_47 = arith.constant 2 : index
    %c0_48 = arith.constant 0 : index
    %c0_49 = arith.constant 0 : index
    %57 = vector.load %arg9[%c2_47, %c0_48, %c0_49] : memref<3x128x128xbf16, #tpu.memory_space<vmem>>, vector<1x128x128xbf16>
    %58 = vector.shape_cast %57 : vector<1x128x128xbf16> to vector<128x128xbf16>
    %cst_50 = arith.constant dense<0.000000e+00> : vector<5x128xf32>
    %59 = tpu.matmul %49, %58, %cst_50 {dimension_numbers = #tpu.dot_dimension_numbers<[1], [0], [0], [1], [0, 0, 1, 1], [], []>} : vector<5x128xbf16>, vector<128x128xbf16>, vector<5x128xf32> -> vector<5x128xf32>
    %60 = arith.addf %56, %59 : vector<5x128xf32>
    %c0_51 = arith.constant 0 : index
    %c0_52 = arith.constant 0 : index
    %61 = vector.load %arg10[%c0_51, %c0_52] : memref<1x128xf32, #tpu.memory_space<vmem>>, vector<1x128xf32>
    %62 = vector.broadcast %61 : vector<1x128xf32> to vector<5x128xf32>
    %63 = arith.addf %60, %62 : vector<5x128xf32>
    %cst_53 = arith.constant 0.000000e+00 : f32
    %64 = vector.broadcast %cst_53 : f32 to vector<5x128xf32>
    %65 = arith.maximumf %63, %64 : vector<5x128xf32>
    %66 = arith.truncf %65 : vector<5x128xf32> to vector<5x128xbf16>
    %cst_54 = arith.constant dense<0.000000e+00> : vector<5x128xf32>
    %67 = tpu.matmul %2, %66, %cst_54 {dimension_numbers = #tpu.dot_dimension_numbers<[1], [0], [0], [1], [0, 0, 1, 1], [], []>} : vector<5x5xbf16>, vector<5x128xbf16>, vector<5x128xf32> -> vector<5x128xf32>
    %68 = arith.truncf %67 : vector<5x128xf32> to vector<5x128xbf16>
    %cst_55 = arith.constant dense<0.000000e+00> : vector<5x128xf32>
    %69 = tpu.matmul %3, %66, %cst_55 {dimension_numbers = #tpu.dot_dimension_numbers<[1], [0], [0], [1], [0, 0, 1, 1], [], []>} : vector<5x5xbf16>, vector<5x128xbf16>, vector<5x128xf32> -> vector<5x128xf32>
    %70 = arith.truncf %69 : vector<5x128xf32> to vector<5x128xbf16>
    %c0_56 = arith.constant 0 : index
    %c0_57 = arith.constant 0 : index
    %c0_58 = arith.constant 0 : index
    %71 = vector.load %arg11[%c0_56, %c0_57, %c0_58] : memref<3x128x128xbf16, #tpu.memory_space<vmem>>, vector<1x128x128xbf16>
    %72 = vector.shape_cast %71 : vector<1x128x128xbf16> to vector<128x128xbf16>
    %cst_59 = arith.constant dense<0.000000e+00> : vector<5x128xf32>
    %73 = tpu.matmul %68, %72, %cst_59 {dimension_numbers = #tpu.dot_dimension_numbers<[1], [0], [0], [1], [0, 0, 1, 1], [], []>} : vector<5x128xbf16>, vector<128x128xbf16>, vector<5x128xf32> -> vector<5x128xf32>
    %c1_60 = arith.constant 1 : index
    %c0_61 = arith.constant 0 : index
    %c0_62 = arith.constant 0 : index
    %74 = vector.load %arg11[%c1_60, %c0_61, %c0_62] : memref<3x128x128xbf16, #tpu.memory_space<vmem>>, vector<1x128x128xbf16>
    %75 = vector.shape_cast %74 : vector<1x128x128xbf16> to vector<128x128xbf16>
    %cst_63 = arith.constant dense<0.000000e+00> : vector<5x128xf32>
    %76 = tpu.matmul %66, %75, %cst_63 {dimension_numbers = #tpu.dot_dimension_numbers<[1], [0], [0], [1], [0, 0, 1, 1], [], []>} : vector<5x128xbf16>, vector<128x128xbf16>, vector<5x128xf32> -> vector<5x128xf32>
    %77 = arith.addf %73, %76 : vector<5x128xf32>
    %c2_64 = arith.constant 2 : index
    %c0_65 = arith.constant 0 : index
    %c0_66 = arith.constant 0 : index
    %78 = vector.load %arg11[%c2_64, %c0_65, %c0_66] : memref<3x128x128xbf16, #tpu.memory_space<vmem>>, vector<1x128x128xbf16>
    %79 = vector.shape_cast %78 : vector<1x128x128xbf16> to vector<128x128xbf16>
    %cst_67 = arith.constant dense<0.000000e+00> : vector<5x128xf32>
    %80 = tpu.matmul %70, %79, %cst_67 {dimension_numbers = #tpu.dot_dimension_numbers<[1], [0], [0], [1], [0, 0, 1, 1], [], []>} : vector<5x128xbf16>, vector<128x128xbf16>, vector<5x128xf32> -> vector<5x128xf32>
    %81 = arith.addf %77, %80 : vector<5x128xf32>
    %c0_68 = arith.constant 0 : index
    %c0_69 = arith.constant 0 : index
    %82 = vector.load %arg12[%c0_68, %c0_69] : memref<1x128xf32, #tpu.memory_space<vmem>>, vector<1x128xf32>
    %83 = vector.broadcast %82 : vector<1x128xf32> to vector<5x128xf32>
    %84 = arith.addf %81, %83 : vector<5x128xf32>
    %cst_70 = arith.constant 0.000000e+00 : f32
    %85 = vector.broadcast %cst_70 : f32 to vector<5x128xf32>
    %86 = arith.maximumf %84, %85 : vector<5x128xf32>
    %c0_71 = arith.constant 0 : index
    %c0_72 = arith.constant 0 : index
    %87 = vector.load %arg4[%c0_71, %c0_72] : memref<1x5xf32, #tpu.memory_space<vmem>>, vector<1x5xf32>
    %cst_73 = arith.constant dense<0.000000e+00> : vector<1x128xf32>
    %88 = tpu.matmul %87, %86, %cst_73 {dimension_numbers = #tpu.dot_dimension_numbers<[1], [0], [0], [1], [0, 0, 1, 1], [], []>} : vector<1x5xf32>, vector<5x128xf32>, vector<1x128xf32> -> vector<1x128xf32>
    %89 = arith.truncf %88 : vector<1x128xf32> to vector<1x128xbf16>
    %c0_74 = arith.constant 0 : index
    %c0_75 = arith.constant 0 : index
    %90 = vector.load %arg13[%c0_74, %c0_75] : memref<128x128xbf16, #tpu.memory_space<vmem>>, vector<128x128xbf16>
    %cst_76 = arith.constant dense<0.000000e+00> : vector<1x128xf32>
    %91 = tpu.matmul %89, %90, %cst_76 {dimension_numbers = #tpu.dot_dimension_numbers<[1], [0], [0], [1], [0, 0, 1, 1], [], []>} : vector<1x128xbf16>, vector<128x128xbf16>, vector<1x128xf32> -> vector<1x128xf32>
    %c0_77 = arith.constant 0 : index
    %c0_78 = arith.constant 0 : index
    %92 = vector.load %arg14[%c0_77, %c0_78] : memref<1x128xf32, #tpu.memory_space<vmem>>, vector<1x128xf32>
    %93 = arith.addf %91, %92 : vector<1x128xf32>
    %c0_79 = arith.constant 0 : index
    %c0_80 = arith.constant 0 : index
    %c0_81 = arith.constant 0 : index
    %94 = vector.load %arg15[%c0_79, %c0_80, %c0_81] : memref<1x1x128xf32, #tpu.memory_space<vmem>>, vector<1x1x128xf32>
    %95 = vector.shape_cast %94 : vector<1x1x128xf32> to vector<1x128xf32>
    %96 = vector.shape_cast %93 : vector<1x128xf32> to vector<1x1x128xf32>
    tpu.vector_store %arg15[%c0_79, %c0_80, %c0_81], %96 {strides = array<i32>} : memref<1x1x128xf32, #tpu.memory_space<vmem>>, vector<1x1x128xf32>,
    return
  }
  func.func @transform_0(%arg0: i32) -> (i32, i32, i32) {
    %c0_i32 = arith.constant 0 : i32
    %c0_i32_0 = arith.constant 0 : i32
    %c0_i32_1 = arith.constant 0 : i32
    return %arg0, %c0_i32, %c0_i32_0 : i32, i32, i32
  }
  func.func @transform_1(%arg0: i32) -> (i32, i32) {
    %c0_i32 = arith.constant 0 : i32
    %c0_i32_0 = arith.constant 0 : i32
    %c0_i32_1 = arith.constant 0 : i32
    return %c0_i32, %c0_i32_0 : i32, i32
  }
  func.func @transform_2(%arg0: i32) -> (i32, i32) {
    %c0_i32 = arith.constant 0 : i32
    %c0_i32_0 = arith.constant 0 : i32
    %c0_i32_1 = arith.constant 0 : i32
    return %c0_i32, %c0_i32_0 : i32, i32
  }
  func.func @transform_3(%arg0: i32) -> (i32, i32) {
    %c0_i32 = arith.constant 0 : i32
    %c0_i32_0 = arith.constant 0 : i32
    %c0_i32_1 = arith.constant 0 : i32
    return %c0_i32, %c0_i32_0 : i32, i32
  }
  func.func @transform_4(%arg0: i32) -> (i32, i32, i32) {
    %c0_i32 = arith.constant 0 : i32
    %c0_i32_0 = arith.constant 0 : i32
    %c0_i32_1 = arith.constant 0 : i32
    %c0_i32_2 = arith.constant 0 : i32
    return %c0_i32, %c0_i32_0, %c0_i32_1 : i32, i32, i32
  }
  func.func @transform_5(%arg0: i32) -> (i32, i32) {
    %c0_i32 = arith.constant 0 : i32
    %c0_i32_0 = arith.constant 0 : i32
    %c0_i32_1 = arith.constant 0 : i32
    return %c0_i32, %c0_i32_0 : i32, i32
  }
  func.func @transform_6(%arg0: i32) -> (i32, i32, i32) {
    %c0_i32 = arith.constant 0 : i32
    %c0_i32_0 = arith.constant 0 : i32
    %c0_i32_1 = arith.constant 0 : i32
    %c0_i32_2 = arith.constant 0 : i32
    return %c0_i32, %c0_i32_0, %c0_i32_1 : i32, i32, i32
  }
  func.func @transform_7(%arg0: i32) -> (i32, i32) {
    %c0_i32 = arith.constant 0 : i32
    %c0_i32_0 = arith.constant 0 : i32
    %c0_i32_1 = arith.constant 0 : i32
    return %c0_i32, %c0_i32_0 : i32, i32
  }
  func.func @transform_8(%arg0: i32) -> (i32, i32, i32) {
    %c0_i32 = arith.constant 0 : i32
    %c0_i32_0 = arith.constant 0 : i32
    %c0_i32_1 = arith.constant 0 : i32
    %c0_i32_2 = arith.constant 0 : i32
    return %c0_i32, %c0_i32_0, %c0_i32_1 : i32, i32, i32
  }
  func.func @transform_9(%arg0: i32) -> (i32, i32) {
    %c0_i32 = arith.constant 0 : i32
    %c0_i32_0 = arith.constant 0 : i32
    %c0_i32_1 = arith.constant 0 : i32
    return %c0_i32, %c0_i32_0 : i32, i32
  }
  func.func @transform_10(%arg0: i32) -> (i32, i32, i32) {
    %c0_i32 = arith.constant 0 : i32
    %c0_i32_0 = arith.constant 0 : i32
    %c0_i32_1 = arith.constant 0 : i32
    %c0_i32_2 = arith.constant 0 : i32
    return %c0_i32, %c0_i32_0, %c0_i32_1 : i32, i32, i32
  }
  func.func @transform_11(%arg0: i32) -> (i32, i32) {
    %c0_i32 = arith.constant 0 : i32
    %c0_i32_0 = arith.constant 0 : i32
    %c0_i32_1 = arith.constant 0 : i32
    return %c0_i32, %c0_i32_0 : i32, i32
  }
  func.func @transform_12(%arg0: i32) -> (i32, i32) {
    %c0_i32 = arith.constant 0 : i32
    %c0_i32_0 = arith.constant 0 : i32
    %c0_i32_1 = arith.constant 0 : i32
    return %c0_i32, %c0_i32_0 : i32, i32
  }
  func.func @transform_13(%arg0: i32) -> (i32, i32) {
    %c0_i32 = arith.constant 0 : i32
    %c0_i32_0 = arith.constant 0 : i32
    %c0_i32_1 = arith.constant 0 : i32
    return %c0_i32, %c0_i32_0 : i32, i32
  }
  func.func @transform_14(%arg0: i32) -> (i32, i32, i32) {
    %c0_i32 = arith.constant 0 : i32
    %c0_i32_0 = arith.constant 0 : i32
    %c0_i32_1 = arith.constant 0 : i32
    return %arg0, %c0_i32, %c0_i32_0 : i32, i32, i32
  }
}

</mosaic_0001>

<bundles_post_ra>
// kernel: forward.3
= control target key start
LH: loop header
LB: loop body
LE: loop exit
PB: predicated region body
PF: predicated region fallthrough
CT: control target
= control target key end

     0   :  { %s1267_s12 = smov 0   ;;  %s1406_s0 = inlined_call_operand.vmem [shape: bf16[640,32], index: 0, kind: input, shape index: {}]   ;;  %s1407_s1 = inlined_call_operand.vmem [shape: bf16[32,128], index: 1, kind: input, shape index: {}]   ;;  %s1408_s2 = inlined_call_operand.vmem [shape: f32[1,128], index: 2, kind: input, shape index: {}]   ;;  %s1409_s3 = inlined_call_operand.vmem [shape: bf16[640,128], index: 3, kind: output, shape index: {}]  }
   0x1 LB: > { %s888_s13 = sadd.s32 4294967295, %s1245_s12   ;;  %p892_p0 = scmp.ge.s32.totalorder %s1245_s12, 1  ;;  %s1245_s12 = sphi %s1267_s12, %s13_s12  }
   0x2   : > { %p138_p1 = scmp.lt.s32.totalorder %s1245_s12, 3 }
   0x4   : > { %p139_p2 = pnand %p892_p0, %p138_p1 }
   0x5   : > { %s162_s16 = smul.u32 (!%p139_p2), 40, %s888_s13 }
   0x6   : > { %142 = sbr.rel (%p139_p2) target bundleno = 258 (0x102), region = 32 }
   0x7   : > { %p163_p3 = scmp.lt.s32.totalorder (!%p139_p2), %s162_s16, 79 }
   0xb   : > { %v1217_v0 = vld [vmem:[%s1407_s1 + $0x8] sm:$0xff]   ;;  %v1218_v1 = vld [vmem:[%s1407_s1] sm:$0xff]   ;;  %s1411_s16 = smov (!%p163_p3, %s162_s16), 79  ;;  %vm338_vm0 = vcmask 261120  }
   0xc   : > { %1161 = vmatprep.subr.bf16.mxu0 %v1217_v0  ;;  %1205 = vmatprep.subr.bf16.mxu1 %v1217_v0  ;;  %s893_s19 = sshll.u32 %s1411_s16, 2  ;;  %v1334_v23 = vld [vmem:[%s1408_s2] ss:$0 sm:$0xff] }
   0xd   : > { %1162 = vmatpush3.bf16.msra.mxu0 %v1217_v0  ;;  %1207 = vmatpush3.bf16.msra.mxu1 %v1217_v0  ;;  %s1289_s22 = scalar_lea.vmem %s1406_s0, %s893_s19  ;;  %s1348_s27 = scalar_lea.vmem %s1409_s3, %s893_s19 }
   0xe   : > { %1163 = vmatprep.subr.bf16.mxu0 %v1218_v1  ;;  %1206 = vmatprep.subr.bf16.mxu1 %v1218_v1  ;;  %v1219_v2 = vld [vmem:[%s1289_s22] sm:$0xff]   ;;  %v1220_v3 = vld [vmem:[%s1289_s22 + $0x50] sm:$0xff]   ;;  %v1221_v4 = vld [vmem:[%s1289_s22 + $0x8] sm:$0xff]  }
   0xf   : > { %1165 = vmatprep.mubr.msk.bf16.mxu0 %vm338_vm0, %v1219_v2  ;;  %1185 = vmatprep.mubr.msk.bf16.mxu1 %vm338_vm0, %v1220_v3  ;;  %v1222_v5 = vld [vmem:[%s1289_s22 + $0x58] sm:$0xff]   ;;  %v1223_v6 = vld [vmem:[%s1289_s22 + $0x10] sm:$0xff]   ;;  %v1224_v7 = vld [vmem:[%s1289_s22 + $0x60] sm:$0xff]  }
  0x10   : > { %v1225_v8 = vld [vmem:[%s1289_s22 + $0x18] sm:$0xff]   ;;  %v1226_v9 = vld [vmem:[%s1289_s22 + $0x68] sm:$0xff]   ;;  %v1227_v10 = vld [vmem:[%s1289_s22 + $0x20] sm:$0xff]  }
  0x11   : > { %1164 = vmatpush3.bf16.msra.mxu0 %v1218_v1  ;;  %1208 = vmatpush3.bf16.msra.mxu1 %v1218_v1  ;;  %v1228_v11 = vld [vmem:[%s1289_s22 + $0x70] sm:$0xff]   ;;  %v1229_v12 = vld [vmem:[%s1289_s22 + $0x28] sm:$0xff]   ;;  %v1230_v13 = vld [vmem:[%s1289_s22 + $0x78] sm:$0xff]  }
  0x12   : > { %v1231_v14 = vld [vmem:[%s1289_s22 + $0x30] sm:$0xff]   ;;  %v1232_v15 = vld [vmem:[%s1289_s22 + $0x80] sm:$0xff]   ;;  %v1233_v16 = vld [vmem:[%s1289_s22 + $0x38] sm:$0xff]  }
  0x13   : > { %v1234_v17 = vld [vmem:[%s1289_s22 + $0x88] sm:$0xff]   ;;  %v1235_v18 = vld [vmem:[%s1289_s22 + $0x40] sm:$0xff]   ;;  %v1236_v19 = vld [vmem:[%s1289_s22 + $0x90] sm:$0xff]  }
  0x14   : > { %1166 = vmatmul.mubr.msk.bf16.vlgmr.msra.gmra.mxu0 %vm338_vm0, %v1221_v4  ;;  %1186 = vmatmul.mubr.msk.bf16.vlgmr.msra.gmra.mxu1 %vm338_vm0, %v1222_v5  ;;  %v1237_v20 = vld [vmem:[%s1289_s22 + $0x48] sm:$0xff]   ;;  %v1238_v21 = vld [vmem:[%s1289_s22 + $0x98] sm:$0xff]  }
  0x15   : > { %1169 = vmatprep.mubr.msk.bf16.mxu0 %vm338_vm0, %v1223_v6  ;;  %1189 = vmatprep.mubr.msk.bf16.mxu1 %vm338_vm0, %v1224_v7 }
  0x1c   : > { %1170 = vmatmul.mubr.msk.bf16.gmra.mxu0 %vm338_vm0, %v1225_v8  ;;  %1190 = vmatmul.mubr.msk.bf16.gmra.mxu1 %vm338_vm0, %v1226_v9 }
  0x1d   : > { %1173 = vmatprep.mubr.msk.bf16.mxu0 %vm338_vm0, %v1227_v10  ;;  %1193 = vmatprep.mubr.msk.bf16.mxu1 %vm338_vm0, %v1228_v11 }
  0x24   : > { %1174 = vmatmul.mubr.msk.bf16.gmra.mxu0 %vm338_vm0, %v1229_v12  ;;  %1194 = vmatmul.mubr.msk.bf16.gmra.mxu1 %vm338_vm0, %v1230_v13 }
  0x25   : > { %1177 = vmatprep.mubr.msk.bf16.mxu0 %vm338_vm0, %v1231_v14  ;;  %1197 = vmatprep.mubr.msk.bf16.mxu1 %vm338_vm0, %v1232_v15 }
  0x2c   : > { %1178 = vmatmul.mubr.msk.bf16.gmra.mxu0 %vm338_vm0, %v1233_v16  ;;  %1198 = vmatmul.mubr.msk.bf16.gmra.mxu1 %vm338_vm0, %v1234_v17 }
  0x2d   : > { %1181 = vmatprep.mubr.msk.bf16.mxu0 %vm338_vm0, %v1235_v18  ;;  %1201 = vmatprep.mubr.msk.bf16.mxu1 %vm338_vm0, %v1236_v19 }
  0x34   : > { %1182 = vmatmul.mubr.msk.bf16.gmra.mxu0 %vm338_vm0, %v1237_v20  ;;  %1202 = vmatmul.mubr.msk.bf16.gmra.mxu1 %vm338_vm0, %v1238_v21 }
  0xd4   : > { %v1167_v22 = vpop.f32.mrf.mxu0  ;;  %v1187_v24 = vpop.f32.mrf.mxu1 }
  0xd5   : > { %v442_v26 = vadd.f32 %v1167_v22, %v1334_v23  ;;  %v522_v28 = vadd.f32 %v1187_v24, %v1334_v23 }
  0xd6   : > { %v433_v25 = vpop.f32.mrf.mxu0  ;;  %v513_v27 = vpop.f32.mrf.mxu1 }
  0xd7   : > { %v434_v30 = vadd.f32 %v1334_v23, %v433_v25  ;;  %v514_v33 = vadd.f32 %v1334_v23, %v513_v27  ;;  %v594_v36 = vmax.f32 %v442_v26, 0.0  ;;  %v614_v40 = vmax.f32 %v522_v28, 0.0 }
  0xd8   : > { %v1168_v29 = vpop.f32.mrf.mxu0  ;;  %v1188_v32 = vpop.f32.mrf.mxu1 }
  0xd9   : > { %v445_v31 = vadd.f32 %v1168_v29, %v1334_v23  ;;  %v525_v34 = vadd.f32 %v1188_v32, %v1334_v23  ;;  %v592_v44 = vmax.f32 %v434_v30, 0.0  ;;  %v612_v48 = vmax.f32 %v514_v33, 0.0 }
  0xda   : > { %v436_v35 = vpop.f32.mrf.mxu0  ;;  %v516_v39 = vpop.f32.mrf.mxu1 }
  0xdb   : > { %v595_v37 = vmax.f32 %v445_v31, 0.0  ;;  %v437_v38 = vadd.f32 %v1334_v23, %v436_v35  ;;  %v615_v41 = vmax.f32 %v525_v34, 0.0  ;;  %v517_v42 = vadd.f32 %v1334_v23, %v516_v39 }
  0xdc   : > { %v1171_v43 = vpop.f32.mrf.mxu0  ;;  %v1191_v47 = vpop.f32.mrf.mxu1 }
  0xdd   : > { %v1028_v45 = vpack.c.bf16 %v595_v37, %v594_v36  ;;  %v593_v46 = vmax.f32 %v437_v38, 0.0  ;;  %v1078_v49 = vpack.c.bf16 %v615_v41, %v614_v40  ;;  %v613_v50 = vmax.f32 %v517_v42, 0.0 }
  0xde   : > { %v449_v51 = vpop.f32.mrf.mxu0  ;;  %v458_v53 = vadd.f32 %v1171_v43, %v1334_v23  ;;  %v529_v54 = vpop.f32.mrf.mxu1  ;;  %v538_v56 = vadd.f32 %v1191_v47, %v1334_v23 }
  0xdf   : > { %1120 = vst [vmem:[%s1348_s27 + $0x8] sm:$0xff] %v1028_v45   ;;  %v1023_v52 = vpack.c.bf16 %v593_v46, %v592_v44  ;;  %1130 = vst [vmem:[%s1348_s27 + $0x58] sm:$0xff] %v1078_v49   ;;  %v1073_v55 = vpack.c.bf16 %v613_v50, %v612_v48  ;;  %v450_v58 = vadd.f32 %v1334_v23, %v449_v51 }
  0xe0   : > { %v1172_v57 = vpop.f32.mrf.mxu0  ;;  %v1192_v60 = vpop.f32.mrf.mxu1  ;;  %v530_v61 = vadd.f32 %v1334_v23, %v529_v54  ;;  %v598_v0 = vmax.f32 %v458_v53, 0.0  ;;  %v618_v4 = vmax.f32 %v538_v56, 0.0 }
  0xe1   : > { %1024 = vst [vmem:[%s1348_s27] sm:$0xff] %v1023_v52   ;;  %v461_v59 = vadd.f32 %v1172_v57, %v1334_v23  ;;  %1129 = vst [vmem:[%s1348_s27 + $0x50] sm:$0xff] %v1073_v55   ;;  %v541_v62 = vadd.f32 %v1192_v60, %v1334_v23  ;;  %v596_v8 = vmax.f32 %v450_v58, 0.0 }
  0xe2   : > { %v452_v63 = vpop.f32.mrf.mxu0  ;;  %v532_v3 = vpop.f32.mrf.mxu1  ;;  %v616_v12 = vmax.f32 %v530_v61, 0.0 }
  0xe3   : > { %v599_v1 = vmax.f32 %v461_v59, 0.0  ;;  %v453_v2 = vadd.f32 %v1334_v23, %v452_v63  ;;  %v619_v5 = vmax.f32 %v541_v62, 0.0  ;;  %v533_v6 = vadd.f32 %v1334_v23, %v532_v3 }
  0xe4   : > { %v1175_v7 = vpop.f32.mrf.mxu0  ;;  %v1195_v11 = vpop.f32.mrf.mxu1 }
  0xe5   : > { %v1038_v9 = vpack.c.bf16 %v599_v1, %v598_v0  ;;  %v597_v10 = vmax.f32 %v453_v2, 0.0  ;;  %v1088_v13 = vpack.c.bf16 %v619_v5, %v618_v4  ;;  %v617_v14 = vmax.f32 %v533_v6, 0.0 }
  0xe6   : > { %v465_v15 = vpop.f32.mrf.mxu0  ;;  %v474_v17 = vadd.f32 %v1175_v7, %v1334_v23  ;;  %v545_v18 = vpop.f32.mrf.mxu1  ;;  %v554_v20 = vadd.f32 %v1195_v11, %v1334_v23 }
  0xe7   : > { %1122 = vst [vmem:[%s1348_s27 + $0x18] sm:$0xff] %v1038_v9   ;;  %v1033_v16 = vpack.c.bf16 %v597_v10, %v596_v8  ;;  %1132 = vst [vmem:[%s1348_s27 + $0x68] sm:$0xff] %v1088_v13   ;;  %v1083_v19 = vpack.c.bf16 %v617_v14, %v616_v12  ;;  %v466_v22 = vadd.f32 %v1334_v23, %v465_v15 }
  0xe8   : > { %v1176_v21 = vpop.f32.mrf.mxu0  ;;  %v1196_v25 = vpop.f32.mrf.mxu1  ;;  %v546_v26 = vadd.f32 %v1334_v23, %v545_v18  ;;  %v602_v29 = vmax.f32 %v474_v17, 0.0  ;;  %v622_v33 = vmax.f32 %v554_v20, 0.0 }
  0xe9   : > { %1121 = vst [vmem:[%s1348_s27 + $0x10] sm:$0xff] %v1033_v16   ;;  %v477_v24 = vadd.f32 %v1176_v21, %v1334_v23  ;;  %1131 = vst [vmem:[%s1348_s27 + $0x60] sm:$0xff] %v1083_v19   ;;  %v557_v27 = vadd.f32 %v1196_v25, %v1334_v23  ;;  %v600_v37 = vmax.f32 %v466_v22, 0.0 }
  0xea   : > { %v468_v28 = vpop.f32.mrf.mxu0  ;;  %v548_v32 = vpop.f32.mrf.mxu1  ;;  %v620_v41 = vmax.f32 %v546_v26, 0.0 }
  0xeb   : > { %v603_v30 = vmax.f32 %v477_v24, 0.0  ;;  %v469_v31 = vadd.f32 %v1334_v23, %v468_v28  ;;  %v623_v34 = vmax.f32 %v557_v27, 0.0  ;;  %v549_v35 = vadd.f32 %v1334_v23, %v548_v32 }
  0xec   : > { %v1179_v36 = vpop.f32.mrf.mxu0  ;;  %v1199_v40 = vpop.f32.mrf.mxu1 }
  0xed   : > { %v1048_v38 = vpack.c.bf16 %v603_v30, %v602_v29  ;;  %v601_v39 = vmax.f32 %v469_v31, 0.0  ;;  %v1098_v42 = vpack.c.bf16 %v623_v34, %v622_v33  ;;  %v621_v43 = vmax.f32 %v549_v35, 0.0 }
  0xee   : > { %v481_v44 = vpop.f32.mrf.mxu0  ;;  %v490_v46 = vadd.f32 %v1179_v36, %v1334_v23  ;;  %v561_v47 = vpop.f32.mrf.mxu1  ;;  %v570_v49 = vadd.f32 %v1199_v40, %v1334_v23 }
  0xef   : > { %1124 = vst [vmem:[%s1348_s27 + $0x28] sm:$0xff] %v1048_v38   ;;  %v1043_v45 = vpack.c.bf16 %v601_v39, %v600_v37  ;;  %1134 = vst [vmem:[%s1348_s27 + $0x78] sm:$0xff] %v1098_v42   ;;  %v1093_v48 = vpack.c.bf16 %v621_v43, %v620_v41  ;;  %v482_v51 = vadd.f32 %v1334_v23, %v481_v44 }
  0xf0   : > { %v1180_v50 = vpop.f32.mrf.mxu0  ;;  %v1200_v53 = vpop.f32.mrf.mxu1  ;;  %v562_v54 = vadd.f32 %v1334_v23, %v561_v47  ;;  %v606_v57 = vmax.f32 %v490_v46, 0.0  ;;  %v626_v61 = vmax.f32 %v570_v49, 0.0 }
  0xf1   : > { %1123 = vst [vmem:[%s1348_s27 + $0x20] sm:$0xff] %v1043_v45   ;;  %v493_v52 = vadd.f32 %v1180_v50, %v1334_v23  ;;  %1133 = vst [vmem:[%s1348_s27 + $0x70] sm:$0xff] %v1093_v48   ;;  %v573_v55 = vadd.f32 %v1200_v53, %v1334_v23  ;;  %v604_v1 = vmax.f32 %v482_v51, 0.0 }
  0xf2   : > { %v484_v56 = vpop.f32.mrf.mxu0  ;;  %v564_v60 = vpop.f32.mrf.mxu1  ;;  %v624_v5 = vmax.f32 %v562_v54, 0.0 }
  0xf3   : > { %v607_v58 = vmax.f32 %v493_v52, 0.0  ;;  %v485_v59 = vadd.f32 %v1334_v23, %v484_v56  ;;  %v627_v62 = vmax.f32 %v573_v55, 0.0  ;;  %v565_v63 = vadd.f32 %v1334_v23, %v564_v60 }
  0xf4   : > { %v1183_v0 = vpop.f32.mrf.mxu0  ;;  %v1203_v4 = vpop.f32.mrf.mxu1 }
  0xf5   : > { %v1058_v2 = vpack.c.bf16 %v607_v58, %v606_v57  ;;  %v605_v3 = vmax.f32 %v485_v59, 0.0  ;;  %v1108_v6 = vpack.c.bf16 %v627_v62, %v626_v61  ;;  %v625_v7 = vmax.f32 %v565_v63, 0.0 }
  0xf6   : > { %v497_v8 = vpop.f32.mrf.mxu0  ;;  %v506_v10 = vadd.f32 %v1183_v0, %v1334_v23  ;;  %v577_v11 = vpop.f32.mrf.mxu1  ;;  %v586_v13 = vadd.f32 %v1203_v4, %v1334_v23 }
  0xf7   : > { %1126 = vst [vmem:[%s1348_s27 + $0x38] sm:$0xff] %v1058_v2   ;;  %v1053_v9 = vpack.c.bf16 %v605_v3, %v604_v1  ;;  %1136 = vst [vmem:[%s1348_s27 + $0x88] sm:$0xff] %v1108_v6   ;;  %v1103_v12 = vpack.c.bf16 %v625_v7, %v624_v5  ;;  %v498_v15 = vadd.f32 %v1334_v23, %v497_v8 }
  0xf8   : > { %v1184_v14 = vpop.f32.mrf.mxu0  ;;  %v1204_v17 = vpop.f32.mrf.mxu1  ;;  %v578_v18 = vadd.f32 %v1334_v23, %v577_v11  ;;  %v610_v21 = vmax.f32 %v506_v10, 0.0  ;;  %v630_v26 = vmax.f32 %v586_v13, 0.0 }
  0xf9   : > { %1125 = vst [vmem:[%s1348_s27 + $0x30] sm:$0xff] %v1053_v9   ;;  %v509_v16 = vadd.f32 %v1184_v14, %v1334_v23  ;;  %1135 = vst [vmem:[%s1348_s27 + $0x80] sm:$0xff] %v1103_v12   ;;  %v589_v19 = vadd.f32 %v1204_v17, %v1334_v23  ;;  %v608_v29 = vmax.f32 %v498_v15, 0.0 }
  0xfa   : > { %v500_v20 = vpop.f32.mrf.mxu0  ;;  %v580_v25 = vpop.f32.mrf.mxu1  ;;  %v628_v32 = vmax.f32 %v578_v18, 0.0 }
  0xfb   : > { %v611_v22 = vmax.f32 %v509_v16, 0.0  ;;  %v501_v24 = vadd.f32 %v1334_v23, %v500_v20  ;;  %v631_v27 = vmax.f32 %v589_v19, 0.0  ;;  %v581_v28 = vadd.f32 %v1334_v23, %v580_v25 }
  0xfd   : > { %v1068_v30 = vpack.c.bf16 %v611_v22, %v610_v21  ;;  %v609_v31 = vmax.f32 %v501_v24, 0.0  ;;  %v1118_v33 = vpack.c.bf16 %v631_v27, %v630_v26  ;;  %v629_v34 = vmax.f32 %v581_v28, 0.0 }
  0xff   : > { %1128 = vst [vmem:[%s1348_s27 + $0x48] sm:$0xff] %v1068_v30   ;;  %v1063_v35 = vpack.c.bf16 %v609_v31, %v608_v29  ;;  %1138 = vst [vmem:[%s1348_s27 + $0x98] sm:$0xff] %v1118_v33   ;;  %v1113_v36 = vpack.c.bf16 %v629_v34, %v628_v32 }
 0x101   : > { %1127 = vst [vmem:[%s1348_s27 + $0x40] sm:$0xff] %v1063_v35   ;;  %1137 = vst [vmem:[%s1348_s27 + $0x90] sm:$0xff] %v1113_v36  }
 0x102 PF: > { %s13_s12 = sadd.s32 1, %s1245_s12  }
 0x103   : > { %p10_p4 = scmp.ge.s32.totalorder %s13_s12, 4  }
 0x105   :  { %12 = sbr.rel (!%p10_p4) target bundleno = 1 (0x1), region = 62 }

// kernel: forward.4
= control target key start
LH: loop header
LB: loop body
LE: loop exit
PB: predicated region body
PF: predicated region fallthrough
CT: control target
= control target key end

     0   :  { %s1684_s12 = smov 0   ;;  %s2085_s0 = inlined_call_operand.vmem [shape: bf16[10,4,2,4,256], index: 0, kind: input, shape index: {}]   ;;  %s2086_s1 = inlined_call_operand.vmem [shape: bf16[128,128], index: 1, kind: input, shape index: {}]   ;;  %s2087_s2 = inlined_call_operand.vmem [shape: f32[1,128], index: 2, kind: input, shape index: {}]   ;;  %s2088_s3 = inlined_call_operand.vmem [shape: bf16[2,5,128], index: 3, kind: output, shape index: {}]  }
   0x1 LB: > { %s1690_s13 = sadd.s32 4294967295, %s1658_s12   ;;  %p1541_p0 = scmp.ge.s32.totalorder %s1658_s12, 1  ;;  %s1658_s12 = sphi %s1684_s12, %s13_s12  }
   0x2   : > { %p139_p1 = scmp.lt.s32.totalorder %s1658_s12, 3 }
   0x4   : > { %p140_p2 = pnand %p1541_p0, %p139_p1 }
   0x5   : > { %s163_s18 = smul.u32 (!%p140_p2), 5, %s1690_s13  ;;  %p170_p4 = scmp.lt.s32.totalorder (!%p140_p2), %s1690_s13, 1 }
   0x6   : > { %143 = sbr.rel (%p140_p2) target bundleno = 370 (0x172), region = 32 }
   0x7   : > { %p164_p3 = scmp.lt.s32.totalorder (!%p140_p2), %s163_s18, 9 }
   0xb   : > { %v1644_v0 = vld [vmem:[%s2086_s1 + $0x38] sm:$0xff]   ;;  %v1660_v1 = vmov 0.0   ;;  %v1645_v2 = vld [vmem:[%s2086_s1 + $0x30] sm:$0xff]   ;;  %vm1661_vm0 = vmmov 0   ;;  %v238_v3 = vlaneseq  ;;  %v1646_v4 = vld [vmem:[%s2086_s1 + $0x28] sm:$0xff]   ;;  %s2092_s18 = smov (!%p164_p3, %s163_s18), 9 }
   0xc   : > { %1580 = vmatprep.subr.bf16.mxu0 %v1660_v1  ;;  %1616 = vmatprep.subr.bf16.mxu1 %v1660_v1  ;;  %s1561_s21 = sshll.u32 %s2092_s18, 5  ;;  %v1662_v5 = vmov 1983009808   ;;  %v1647_v8 = vld [vmem:[%s2086_s1 + $0x20] sm:$0xff]   ;;  %vm555_vm1 = vcmask 1040384   ;;  %v1648_v23 = vld [vmem:[%s2086_s1 + $0x18] sm:$0xff]  }
   0xd   : > { %1581 = vmatpush3.bf16.msra.mxu0 %v1644_v0  ;;  %1624 = vmatpush3.bf16.msra.mxu1 %v1644_v0  ;;  %s1717_s24 = scalar_lea.vmem %s2085_s0, %s1561_s21  ;;  %v236_v6 = vunpack.c.l.s4 %v1662_v5  ;;  %v239_v7 = vshrl.u32 %v238_v3, 7  ;;  %vm556_vm2 = vsmask.f32 256  ;;  %v1649_v42 = vld [vmem:[%s2086_s1 + $0x10] sm:$0xff]   ;;  %v1650_v59 = vld [vmem:[%s2086_s1 + $0x8] sm:$0xff]   ;;  %s2094_s13 = smov (!%p170_p4, %s1690_s13), 1 }
   0xe   : > { %1582 = vmatprep.subr.bf16.mxu0 %v1660_v1  ;;  %1617 = vmatprep.subr.bf16.mxu1 %v1660_v1  ;;  %v175_v9 = vld [vmem:[%s1717_s24] sm:$0xf]  ;;  %v1726_v10 = vld [vmem:[%s1717_s24 + $0x4] sm:$0xf]  ;;  %v177_v11 = vld [vmem:[%s1717_s24 + $0x8] sm:$0xf] }
   0xf   : > { %1596 = vmatprep.mubr.msk.bf16.mxu0 %vm1661_vm0, %v1660_v1  ;;  %1608 = vmatprep.mubr.msk.bf16.mxu1 %vm1661_vm0, %v1660_v1  ;;  %v1730_v12 = vld [vmem:[%s1717_s24 + $0xc] sm:$0xf]  ;;  %v237_v13 = vunpack.c.0.s8 %v236_v6  ;;  %v179_v14 = vld [vmem:[%s1717_s24 + $0x10] sm:$0xf]  ;;  %v181_v15 = vld [vmem:[%s1717_s24 + $0x18] sm:$0xf] }
  0x10   : > { %v578_v16 = vrot.slane %v175_v9, 2  ;;  %v579_v17 = vrot.slane %v177_v11, 2  ;;  %v1735_v18 = vld [vmem:[%s1717_s24 + $0x14] sm:$0xf]  ;;  %v580_v20 = vrot.slane %v179_v14, 2  ;;  %v581_v21 = vrot.slane %v181_v15, 2  ;;  %vm1779_vm3 = vmand %vm555_vm1, %vm556_vm2 }
  0x11   : > { %1583 = vmatpush3.bf16.msra.mxu0 %v1645_v2  ;;  %1625 = vmatpush3.bf16.msra.mxu1 %v1645_v2  ;;  %v1737_v19 = vsub.s32 %v237_v13, %v239_v7  ;;  %v1018_v22 = vrot.slane %v1726_v10, 2  ;;  %v1744_v24 = vld [vmem:[%s1717_s24 + $0x1c] sm:$0xf]  ;;  %v1019_v27 = vrot.slane %v1730_v12, 2  ;;  %v1020_v28 = vrot.slane %v1735_v18, 2  ;;  %s1544_s10 = sshll.u32 %s2094_s13, 2 }
  0x12   : > { %1584 = vmatprep.subr.bf16.mxu0 %v1660_v1  ;;  %1618 = vmatprep.subr.bf16.mxu1 %v1660_v1  ;;  %v1746_v25 = vmax.bf16 %v578_v16, %v175_v9  ;;  %v1748_v26 = vmax.bf16 %v579_v17, %v177_v11  ;;  %v1021_v32 = vrot.slane %v1744_v24, 2  ;;  %v620_v34 = vmax.bf16 %v580_v20, %v179_v14  ;;  %v1764_v41 = vld [vmem:[%s1717_s24 + $0x60] sm:$0xf]  ;;  %s173_s15 = scalar_lea.vmem %s2088_s3, %s1544_s10 }
  0x13   : > { %v241_v29 = vrot.slane %v175_v9, %v1737_v19  ;;  %v249_v30 = vrot.slane %v177_v11, %v1737_v19  ;;  %v257_v31 = vrot.slane %v179_v14, %v1737_v19  ;;  %v265_v33 = vrot.slane %v181_v15, %v1737_v19  ;;  %v1651_v16 = vld [vmem:[%s2086_s1] sm:$0xff]  }
  0x14   : > { %v621_v35 = vmax.bf16 %v581_v21, %v181_v15  ;;  %v684_v36 = vrot.slane %v1726_v10, %v1737_v19  ;;  %v692_v40 = vrot.slane %v1730_v12, %v1737_v19  ;;  %v700_v45 = vrot.slane %v1735_v18, %v1737_v19 }
  0x15   : > { %1585 = vmatpush3.bf16.msra.mxu0 %v1646_v4  ;;  %1626 = vmatpush3.bf16.msra.mxu1 %v1646_v4  ;;  %v242_v37 = vcombine.high %v241_v29, %v241_v29  ;;  %v250_v38 = vcombine.high %v249_v30, %v249_v30  ;;  %v258_v39 = vcombine.high %v257_v31, %v257_v31  ;;  %v590_v46 = vrot.slane %v1764_v41, 2 }
  0x16   : > { %1586 = vmatprep.subr.bf16.mxu0 %v1660_v1  ;;  %1619 = vmatprep.subr.bf16.mxu1 %v1660_v1  ;;  %v266_v43 = vcombine.high %v265_v33, %v265_v33  ;;  %v685_v44 = vcombine.high %v684_v36, %v684_v36  ;;  %v693_v57 = vcombine.high %v692_v40, %v692_v40  ;;  %v1803_v40 = vld [vmem:[%s1717_s24 + $0x68] sm:$0xf]  ;;  %vm1468_vm4 = vcmask 1041409  }
  0x17   : > { %v396_v47 = vshrl.u32 %v242_v37, 16  ;;  %v399_v48 = vshll.u32 %v242_v37, 16  ;;  %v403_v49 = vshrl.u32 %v250_v38, 16  ;;  %v406_v50 = vshll.u32 %v250_v38, 16 }
  0x18   : > { %v410_v51 = vshrl.u32 %v258_v39, 16  ;;  %v413_v52 = vshll.u32 %v258_v39, 16  ;;  %v417_v53 = vshrl.u32 %v266_v43, 16  ;;  %v420_v54 = vshll.u32 %v266_v43, 16  ;;  %v1817_v43 = vld [vmem:[%s1717_s24 + $0x78] sm:$0xf] }
  0x19   : > { %1587 = vmatpush3.bf16.msra.mxu0 %v1647_v8  ;;  %1627 = vmatpush3.bf16.msra.mxu1 %v1647_v8  ;;  %v398_v55 = vrot.slane %v396_v47, 7  ;;  %v405_v56 = vrot.slane %v403_v49, 7  ;;  %v701_v58 = vcombine.high %v700_v45, %v700_v45  ;;  %v708_v63 = vrot.slane %v1744_v24, %v1737_v19 }
  0x1a   : > { %1588 = vmatprep.subr.bf16.mxu0 %v1660_v1  ;;  %1620 = vmatprep.subr.bf16.mxu1 %v1660_v1  ;;  %v412_v60 = vrot.slane %v410_v51, 7  ;;  %v419_v61 = vrot.slane %v417_v53, 7  ;;  %v839_v0 = vshrl.u32 %v685_v44, 16  ;;  %v842_v4 = vshll.u32 %v685_v44, 16 }
  0x1b   : > { %v401_v2 = vor.u32 %v399_v48, %v398_v55  ;;  %v408_v3 = vor.u32 %v406_v50, %v405_v56  ;;  %v846_v5 = vshrl.u32 %v693_v57, 16  ;;  %v709_v8 = vcombine.high %v708_v63, %v708_v63 }
  0x1c   : > { %v415_v6 = vor.u32 %v413_v52, %v412_v60  ;;  %v422_v7 = vor.u32 %v420_v54, %v419_v61  ;;  %v841_v9 = vrot.slane %v839_v0, 7  ;;  %v849_v15 = vshll.u32 %v693_v57, 16 }
  0x1d   : > { %1589 = vmatpush3.bf16.msra.mxu0 %v1648_v23  ;;  %1628 = vmatpush3.bf16.msra.mxu1 %v1648_v23  ;;  %v558_v11 = vsel %vm1779_vm3, 0, %v401_v2  ;;  %v559_v13 = vsel %vm1779_vm3, 0, %v408_v3  ;;  %v848_v14 = vrot.slane %v846_v5, 7  ;;  %v853_v33 = vshrl.u32 %v701_v58, 16 }
  0x1e   : > { %1590 = vmatprep.subr.bf16.mxu0 %v1660_v1  ;;  %1621 = vmatprep.subr.bf16.mxu1 %v1660_v1  ;;  %v560_v17 = vsel %vm1779_vm3, 0, %v415_v6  ;;  %v561_v20 = vsel %vm1779_vm3, 0, %v422_v7  ;;  %v638_v21 = vmax.bf16 %v1746_v25, %v558_v11  ;;  %v639_v23 = vmax.bf16 %v1748_v26, %v559_v13 }
  0x1f   : > { %v640_v29 = vmax.bf16 %v620_v34, %v560_v17  ;;  %v641_v30 = vmax.bf16 %v621_v35, %v561_v20  ;;  %v844_v31 = vor.u32 %v842_v4, %v841_v9  ;;  %v851_v36 = vor.u32 %v849_v15, %v848_v14  ;;  %v1814_v35 = vld [vmem:[%s1717_s24 + $0x70] sm:$0xf] }
  0x20   : > { %v856_v37 = vshll.u32 %v701_v58, 16  ;;  %v860_v38 = vshrl.u32 %v709_v8, 16  ;;  %v863_v39 = vshll.u32 %v709_v8, 16  ;;  %v1058_v26 = vmax.bf16 %v1018_v22, %v1726_v10 }
  0x21   : > { %1591 = vmatpush3.bf16.msra.mxu0 %v1649_v42  ;;  %1629 = vmatpush3.bf16.msra.mxu1 %v1649_v42  ;;  %v855_v42 = vrot.slane %v853_v33, 7  ;;  %v998_v25 = vsel %vm1779_vm3, 0, %v844_v31  ;;  %v1059_v34 = vmax.bf16 %v1019_v27, %v1730_v12  ;;  %v999_v45 = vsel %vm1779_vm3, 0, %v851_v36  ;;  %v200_v31 = vld [vmem:[%s1717_s24 + $0x64] sm:$0xf] }
  0x22   : > { %1592 = vmatprep.subr.bf16.mxu0 %v1660_v1  ;;  %1622 = vmatprep.subr.bf16.mxu1 %v1660_v1  ;;  %v862_v44 = vrot.slane %v860_v38, 7  ;;  %v1060_v47 = vmax.bf16 %v1020_v28, %v1735_v18  ;;  %v1061_v10 = vmax.bf16 %v1021_v32, %v1744_v24  ;;  %v1078_v12 = vmax.bf16 %v1058_v26, %v998_v25  ;;  %v202_v38 = vld [vmem:[%s1717_s24 + $0x6c] sm:$0xf] }
  0x23   : > { %v858_v22 = vor.u32 %v856_v37, %v855_v42  ;;  %v1079_v27 = vmax.bf16 %v1059_v34, %v999_v45  ;;  %v337_v48 = vrot.slane %v1764_v41, %v1737_v19  ;;  %v345_v50 = vrot.slane %v1803_v40, %v1737_v19 }
  0x24   : > { %v865_v49 = vor.u32 %v863_v39, %v862_v44  ;;  %v353_v51 = vrot.slane %v1814_v35, %v1737_v19  ;;  %v361_v18 = vrot.slane %v1817_v43, %v1737_v19  ;;  %v1098_v24 = vmax.bf16 %v1078_v12, %v638_v21  ;;  %v204_v44 = vld [vmem:[%s1717_s24 + $0x74] sm:$0xf] }
  0x25   : > { %1593 = vmatpush3.bf16.msra.mxu0 %v1650_v59  ;;  %1630 = vmatpush3.bf16.msra.mxu1 %v1650_v59  ;;  %v1000_v28 = vsel %vm1779_vm3, 0, %v858_v22  ;;  %v1099_v32 = vmax.bf16 %v1079_v27, %v639_v23  ;;  %v338_v52 = vcombine.high %v337_v48, %v337_v48  ;;  %v346_v55 = vcombine.high %v345_v50, %v345_v50  ;;  %v206_v22 = vld [vmem:[%s1717_s24 + $0x7c] sm:$0xf] }
  0x26   : > { %1594 = vmatprep.subr.bf16.mxu0 %v1660_v1  ;;  %1623 = vmatprep.subr.bf16.mxu1 %v1660_v1  ;;  %v1001_v53 = vsel %vm1779_vm3, 0, %v865_v49  ;;  %v1080_v54 = vmax.bf16 %v1060_v47, %v1000_v28  ;;  %v354_v56 = vcombine.high %v353_v51, %v353_v51  ;;  %v1663_v58 = vmov 0  }
  0x27   : > { %v1081_v57 = vmax.bf16 %v1061_v10, %v1001_v53  ;;  %v1118_v59 = vmax.bf16 %v1663_v58, %v1098_v24  ;;  %v1119_v60 = vmax.bf16 %v1099_v32, %v1078_v12  ;;  %v362_v61 = vcombine.high %v361_v18, %v361_v18 }
  0x28   : > { %v1100_v63 = vmax.bf16 %v1080_v54, %v640_v29  ;;  %v480_v0 = vshrl.u32 %v338_v52, 16  ;;  %v483_v2 = vshll.u32 %v338_v52, 16  ;;  %v487_v3 = vshrl.u32 %v346_v55, 16 }
  0x29   : > { %1595 = vmatpush3.bf16.msra.mxu0 %v1651_v16  ;;  %1631 = vmatpush3.bf16.msra.mxu1 %v1651_v16  ;;  %v1101_v4 = vmax.bf16 %v1081_v57, %v641_v30  ;;  %v1181_v5 = vcombine.low %v1118_v59, %v1119_v60  ;;  %v490_v6 = vshll.u32 %v346_v55, 16  ;;  %v494_v7 = vshrl.u32 %v354_v56, 16  ;;  %v1878_v57 = vld [vmem:[%s1717_s24 + $0x20] sm:$0xf] }
  0x2a   : > { %v1120_v8 = vmax.bf16 %v1100_v63, %v1079_v27  ;;  %v482_v9 = vrot.slane %v480_v0, 7  ;;  %v489_v11 = vrot.slane %v487_v3, 7  ;;  %v497_v13 = vshll.u32 %v354_v56, 16  ;;  %v1881_v0 = vld [vmem:[%s1717_s24 + $0x28] sm:$0xf] }
  0x2b   : > { %v1121_v14 = vmax.bf16 %v1101_v4, %v1080_v54  ;;  %v1189_v15 = vrot.slane %v1181_v5, %v1737_v19  ;;  %v496_v16 = vrot.slane %v494_v7, 7  ;;  %v501_v17 = vshrl.u32 %v362_v61, 16 }
  0x2c   : > { %v485_v20 = vor.u32 %v483_v2, %v482_v9  ;;  %v492_v21 = vor.u32 %v490_v6, %v489_v11  ;;  %v504_v23 = vshll.u32 %v362_v61, 16  ;;  %v591_v29 = vrot.slane %v1803_v40, 2  ;;  %v1884_v6 = vld [vmem:[%s1717_s24 + $0x30] sm:$0xf] }
  0x2d   : > { %v1182_v30 = vcombine.low %v1120_v8, %v1121_v14  ;;  %v499_v33 = vor.u32 %v497_v13, %v496_v16  ;;  %v503_v36 = vrot.slane %v501_v17, 7  ;;  %v592_v37 = vrot.slane %v1814_v35, 2  ;;  %v1887_v13 = vld [vmem:[%s1717_s24 + $0x38] sm:$0xf] }
  0x2e   : > { %v570_v39 = vsel %vm1779_vm3, 0, %v485_v20  ;;  %v571_v42 = vsel %vm1779_vm3, 0, %v492_v21  ;;  %v593_v25 = vrot.slane %v1817_v43, 2  ;;  %v630_v26 = vmax.bf16 %v590_v46, %v1764_v41 }
  0x2f   : > { %v1196_v34 = vrot.slane %v1182_v30, %v1737_v19  ;;  %v506_v45 = vor.u32 %v504_v23, %v503_v36  ;;  %v572_v47 = vsel %vm1779_vm3, 0, %v499_v33  ;;  %v631_v10 = vmax.bf16 %v591_v29, %v1803_v40 }
  0x30   : > { %v632_v12 = vmax.bf16 %v592_v37, %v1814_v35  ;;  %v633_v27 = vmax.bf16 %v593_v25, %v1817_v43  ;;  %v1861_v48 = vmax.bf16 %v630_v26, %v570_v39  ;;  %v780_v49 = vrot.slane %v200_v31, %v1737_v19 }
  0x31   : > { %v1197_v50 = vcombine.low %v1189_v15, %v1196_v34  ;;  %v573_v41 = vsel %vm1779_vm3, 0, %v506_v45  ;;  %v1866_v46 = vmax.bf16 %v631_v10, %v571_v42  ;;  %v788_v51 = vrot.slane %v202_v38, %v1737_v19 }
  0x32   : > { %v1869_v18 = vmax.bf16 %v632_v12, %v572_v47  ;;  %v1871_v40 = vmax.bf16 %v633_v27, %v573_v41  ;;  %v781_v35 = vcombine.high %v780_v49, %v780_v49  ;;  %v796_v43 = vrot.slane %v204_v44, %v1737_v19 }
  0x33   : > { %1597 = vmatmul.mubr.bf16.vlgmr.msra.gmra.mxu0 %v1197_v50  ;;  %v789_v28 = vcombine.high %v788_v51, %v788_v51  ;;  %v804_v24 = vrot.slane %v206_v22, %v1737_v19  ;;  %v1030_v32 = vrot.slane %v200_v31, 2  ;;  %v1031_v52 = vrot.slane %v202_v38, 2 }
  0x34   : > { %v797_v53 = vcombine.high %v796_v43, %v796_v43  ;;  %v923_v54 = vshrl.u32 %v781_v35, 16  ;;  %v926_v55 = vshll.u32 %v781_v35, 16  ;;  %v1032_v56 = vrot.slane %v204_v44, 2  ;;  %1600 = vmatprep.mubr.msk.bf16.mxu0 %vm1661_vm0, %v1660_v1 }
  0x35   : > { %v805_v59 = vcombine.high %v804_v24, %v804_v24  ;;  %v930_v60 = vshrl.u32 %v789_v28, 16  ;;  %v933_v61 = vshll.u32 %v789_v28, 16  ;;  %v1033_v63 = vrot.slane %v206_v22, 2 }
  0x36   : > { %v925_v2 = vrot.slane %v923_v54, 7  ;;  %v937_v3 = vshrl.u32 %v797_v53, 16  ;;  %v940_v4 = vshll.u32 %v797_v53, 16  ;;  %v1070_v5 = vmax.bf16 %v1030_v32, %v200_v31 }
  0x37   : > { %v932_v7 = vrot.slane %v930_v60, 7  ;;  %v944_v8 = vshrl.u32 %v805_v59, 16  ;;  %v947_v9 = vshll.u32 %v805_v59, 16  ;;  %v1071_v11 = vmax.bf16 %v1031_v52, %v202_v38 }
  0x38   : > { %v928_v14 = vor.u32 %v926_v55, %v925_v2  ;;  %v939_v15 = vrot.slane %v937_v3, 7  ;;  %v1072_v16 = vmax.bf16 %v1032_v56, %v204_v44  ;;  %v1073_v17 = vmax.bf16 %v1033_v63, %v206_v22 }
  0x39   : > { %v935_v20 = vor.u32 %v933_v61, %v932_v7  ;;  %v946_v21 = vrot.slane %v944_v8, 7  ;;  %v273_v23 = vrot.slane %v1878_v57, %v1737_v19  ;;  %v281_v29 = vrot.slane %v1881_v0, %v1737_v19  ;;  %v186_v8 = vld [vmem:[%s1717_s24 + $0x2c] sm:$0xf] }
  0x3a   : > { %v942_v30 = vor.u32 %v940_v4, %v939_v15  ;;  %v1010_v31 = vsel %vm1779_vm3, 0, %v928_v14  ;;  %v289_v33 = vrot.slane %v1884_v6, %v1737_v19  ;;  %v297_v36 = vrot.slane %v1887_v13, %v1737_v19  ;;  %v184_v4 = vld [vmem:[%s1717_s24 + $0x24] sm:$0xf] }
  0x3b   : > { %v949_v37 = vor.u32 %v947_v9, %v946_v21  ;;  %v1011_v38 = vsel %vm1779_vm3, 0, %v935_v20  ;;  %v1090_v39 = vmax.bf16 %v1070_v5, %v1010_v31  ;;  %v274_v42 = vcombine.high %v273_v23, %v273_v23 }
  0x3c   : > { %v1012_v25 = vsel %vm1779_vm3, 0, %v942_v30  ;;  %v1091_v26 = vmax.bf16 %v1071_v11, %v1011_v38  ;;  %v282_v34 = vcombine.high %v281_v29, %v281_v29  ;;  %v290_v44 = vcombine.high %v289_v33, %v289_v33  ;;  %v190_v29 = vld [vmem:[%s1717_s24 + $0x3c] sm:$0xf] }
  0x3d   : > { %v1013_v45 = vsel %vm1779_vm3, 0, %v949_v37  ;;  %v1092_v47 = vmax.bf16 %v1072_v16, %v1012_v25  ;;  %v1110_v10 = vmax.bf16 %v1090_v39, %v1861_v48  ;;  %v298_v22 = vcombine.high %v297_v36, %v297_v36 }
  0x3e   : > { %v1093_v12 = vmax.bf16 %v1073_v17, %v1013_v45  ;;  %v1111_v27 = vmax.bf16 %v1091_v26, %v1866_v46  ;;  %v424_v49 = vshrl.u32 %v274_v42, 16  ;;  %v427_v50 = vshll.u32 %v274_v42, 16  ;;  %v188_v17 = vld [vmem:[%s1717_s24 + $0x34] sm:$0xf] }
  0x3f   : > { %v1112_v41 = vmax.bf16 %v1092_v47, %v1869_v18  ;;  %v1130_v51 = vmax.bf16 %v1663_v58, %v1110_v10  ;;  %v431_v35 = vshrl.u32 %v282_v34, 16  ;;  %v434_v43 = vshll.u32 %v282_v34, 16 }
  0x40   : > { %v1113_v28 = vmax.bf16 %v1093_v12, %v1871_v40  ;;  %v1131_v24 = vmax.bf16 %v1111_v27, %v1090_v39  ;;  %v426_v32 = vrot.slane %v424_v49, 7  ;;  %v438_v52 = vshrl.u32 %v290_v44, 16 }
  0x41   : > { %v1132_v53 = vmax.bf16 %v1112_v41, %v1091_v26  ;;  %v433_v48 = vrot.slane %v431_v35, 7  ;;  %v441_v54 = vshll.u32 %v290_v44, 16  ;;  %v445_v55 = vshrl.u32 %v298_v22, 16  ;;  %v1945_v41 = vld [vmem:[%s1717_s24 + $0x80] sm:$0xf] }
  0x42   : > { %v1133_v46 = vmax.bf16 %v1113_v28, %v1092_v47  ;;  %v1232_v56 = vcombine.low %v1130_v51, %v1131_v24  ;;  %v429_v59 = vor.u32 %v427_v50, %v426_v32  ;;  %v440_v60 = vrot.slane %v438_v52, 7  ;;  %v1948_v24 = vld [vmem:[%s1717_s24 + $0x88] sm:$0xf] }
  0x43   : > { %v436_v18 = vor.u32 %v434_v43, %v433_v48  ;;  %v447_v61 = vrot.slane %v445_v55, 7  ;;  %v448_v63 = vshll.u32 %v298_v22, 16  ;;  %v582_v2 = vrot.slane %v1878_v57, 2 }
  0x44   : > { %v1233_v40 = vcombine.low %v1132_v53, %v1133_v46  ;;  %v1240_v3 = vrot.slane %v1232_v56, %v1737_v19  ;;  %v443_v5 = vor.u32 %v441_v54, %v440_v60  ;;  %v562_v7 = vsel %vm1779_vm3, 0, %v429_v59  ;;  %v1951_v54 = vld [vmem:[%s1717_s24 + $0x90] sm:$0xf] }
  0x45   : > { %v450_v9 = vor.u32 %v448_v63, %v447_v61  ;;  %v563_v11 = vsel %vm1779_vm3, 0, %v436_v18  ;;  %v583_v14 = vrot.slane %v1881_v0, 2  ;;  %v584_v15 = vrot.slane %v1884_v6, 2 }
  0x46   : > { %v1247_v16 = vrot.slane %v1233_v40, %v1737_v19  ;;  %v564_v20 = vsel %vm1779_vm3, 0, %v443_v5  ;;  %v585_v21 = vrot.slane %v1887_v13, 2  ;;  %v622_v23 = vmax.bf16 %v582_v2, %v1878_v57 }
  0x47   : > { %v565_v30 = vsel %vm1779_vm3, 0, %v450_v9  ;;  %v623_v31 = vmax.bf16 %v583_v14, %v1881_v0  ;;  %v624_v33 = vmax.bf16 %v584_v15, %v1884_v6  ;;  %v716_v36 = vrot.slane %v184_v4, %v1737_v19 }
  0x48   : > { %v1248_v37 = vcombine.low %v1240_v3, %v1247_v16  ;;  %v625_v38 = vmax.bf16 %v585_v21, %v1887_v13  ;;  %v642_v39 = vmax.bf16 %v622_v23, %v562_v7  ;;  %v724_v42 = vrot.slane %v186_v8, %v1737_v19  ;;  %v213_v3 = vld [vmem:[%s1717_s24 + $0x98] sm:$0xf] }
  0x49   : > { %v1934_v25 = vmax.bf16 %v623_v31, %v563_v11  ;;  %v1936_v26 = vmax.bf16 %v624_v33, %v564_v20  ;;  %v717_v57 = vcombine.high %v716_v36, %v716_v36  ;;  %v732_v34 = vrot.slane %v188_v17, %v1737_v19 }
  0x4a   : > { %1609 = vmatmul.mubr.bf16.vlgmr.msra.gmra.mxu1 %v1248_v37  ;;  %v1939_v0 = vmax.bf16 %v625_v38, %v565_v30  ;;  %v725_v6 = vcombine.high %v724_v42, %v724_v42  ;;  %v740_v44 = vrot.slane %v190_v29, %v1737_v19  ;;  %v1022_v45 = vrot.slane %v184_v4, 2 }
  0x4b   : > { %1612 = vmatprep.mubr.msk.bf16.mxu1 %vm1661_vm0, %v1660_v1  ;;  %v733_v13 = vcombine.high %v732_v34, %v732_v34  ;;  %v867_v47 = vshrl.u32 %v717_v57, 16  ;;  %v870_v10 = vshll.u32 %v717_v57, 16  ;;  %v1023_v22 = vrot.slane %v186_v8, 2 }
  0x4c   : > { %v741_v12 = vcombine.high %v740_v44, %v740_v44  ;;  %v874_v27 = vshrl.u32 %v725_v6, 16  ;;  %v877_v49 = vshll.u32 %v725_v6, 16  ;;  %v1024_v50 = vrot.slane %v188_v17, 2 }
  0x4d   : > { %v869_v51 = vrot.slane %v867_v47, 7  ;;  %v881_v35 = vshrl.u32 %v733_v13, 16  ;;  %v884_v43 = vshll.u32 %v733_v13, 16  ;;  %v1025_v28 = vrot.slane %v190_v29, 2 }
  0x4e   : > { %v876_v32 = vrot.slane %v874_v27, 7  ;;  %v888_v52 = vshrl.u32 %v741_v12, 16  ;;  %v891_v53 = vshll.u32 %v741_v12, 16  ;;  %v1062_v48 = vmax.bf16 %v1022_v45, %v184_v4 }
  0x4f   : > { %v872_v55 = vor.u32 %v870_v10, %v869_v51  ;;  %v883_v46 = vrot.slane %v881_v35, 7  ;;  %v1063_v56 = vmax.bf16 %v1023_v22, %v186_v8  ;;  %v1064_v59 = vmax.bf16 %v1024_v50, %v188_v17 }
  0x50   : > { %v879_v60 = vor.u32 %v877_v49, %v876_v32  ;;  %v890_v18 = vrot.slane %v888_v52, 7  ;;  %v1065_v61 = vmax.bf16 %v1025_v28, %v190_v29  ;;  %v369_v63 = vrot.slane %v1945_v41, %v1737_v19 }
  0x51   : > { %v886_v2 = vor.u32 %v884_v43, %v883_v46  ;;  %v1002_v40 = vsel %vm1779_vm3, 0, %v872_v55  ;;  %v377_v4 = vrot.slane %v1948_v24, %v1737_v19  ;;  %v385_v5 = vrot.slane %v1951_v54, %v1737_v19  ;;  %v208_v43 = vld [vmem:[%s1717_s24 + $0x84] sm:$0xf] }
  0x52   : > { %v893_v7 = vor.u32 %v891_v53, %v890_v18  ;;  %v1003_v8 = vsel %vm1779_vm3, 0, %v879_v60  ;;  %v1082_v9 = vmax.bf16 %v1062_v48, %v1002_v40  ;;  %v370_v11 = vcombine.high %v369_v63, %v369_v63  ;;  %v214_v63 = vld [vmem:[%s1717_s24 + $0x9c] sm:$0xf] }
  0x53   : > { %v1004_v14 = vsel %vm1779_vm3, 0, %v886_v2  ;;  %v1083_v15 = vmax.bf16 %v1063_v56, %v1003_v8  ;;  %v378_v16 = vcombine.high %v377_v4, %v377_v4  ;;  %v386_v17 = vcombine.high %v385_v5, %v385_v5  ;;  %v210_v56 = vld [vmem:[%s1717_s24 + $0x8c] sm:$0xf] }
  0x54   : > { %v1005_v20 = vsel %vm1779_vm3, 0, %v893_v7  ;;  %v1084_v21 = vmax.bf16 %v1064_v59, %v1004_v14  ;;  %v1102_v23 = vmax.bf16 %v1082_v9, %v642_v39  ;;  %v393_v29 = vrot.slane %v213_v3, %v1737_v19 }
  0x55   : > { %v1085_v30 = vmax.bf16 %v1065_v61, %v1005_v20  ;;  %v1103_v31 = vmax.bf16 %v1083_v15, %v1934_v25  ;;  %v508_v33 = vshrl.u32 %v370_v11, 16  ;;  %v511_v36 = vshll.u32 %v370_v11, 16  ;;  %v212_v61 = vld [vmem:[%s1717_s24 + $0x94] sm:$0xf] }
  0x56   : > { %v1104_v37 = vmax.bf16 %v1084_v21, %v1936_v26  ;;  %v1122_v38 = vmax.bf16 %v1663_v58, %v1102_v23  ;;  %v394_v42 = vcombine.high %v393_v29, %v393_v29  ;;  %v515_v57 = vshrl.u32 %v378_v16, 16 }
  0x57   : > { %v1105_v34 = vmax.bf16 %v1085_v30, %v1939_v0  ;;  %v1123_v6 = vmax.bf16 %v1103_v31, %v1082_v9  ;;  %v510_v44 = vrot.slane %v508_v33, 7  ;;  %v518_v45 = vshll.u32 %v378_v16, 16 }
  0x58   : > { %v1124_v39 = vmax.bf16 %v1104_v37, %v1083_v15  ;;  %v517_v13 = vrot.slane %v515_v57, 7  ;;  %v522_v47 = vshrl.u32 %v386_v17, 16  ;;  %v525_v10 = vshll.u32 %v386_v17, 16  ;;  %v2006_v37 = vld [vmem:[%s1717_s24 + $0x40] sm:$0xf] }
  0x59   : > { %v1125_v22 = vmax.bf16 %v1105_v34, %v1084_v21  ;;  %v1198_v25 = vcombine.low %v1122_v38, %v1123_v6  ;;  %v513_v12 = vor.u32 %v511_v36, %v510_v44  ;;  %v529_v27 = vshrl.u32 %v394_v42, 16  ;;  %v2009_v6 = vld [vmem:[%s1717_s24 + $0x48] sm:$0xf] }
  0x5a   : > { %v520_v26 = vor.u32 %v518_v45, %v517_v13  ;;  %v524_v49 = vrot.slane %v522_v47, 7  ;;  %v532_v50 = vshll.u32 %v394_v42, 16  ;;  %v594_v51 = vrot.slane %v1945_v41, 2  ;;  %v2012_v47 = vld [vmem:[%s1717_s24 + $0x50] sm:$0xf] }
  0x5b   : > { %v1199_v0 = vcombine.low %v1124_v39, %v1125_v22  ;;  %v1206_v35 = vrot.slane %v1198_v25, %v1737_v19  ;;  %v531_v28 = vrot.slane %v529_v27, 7  ;;  %v574_v32 = vsel %vm1779_vm3, 0, %v513_v12 }
  0x5c   : > { %v527_v52 = vor.u32 %v525_v10, %v524_v49  ;;  %v575_v53 = vsel %vm1779_vm3, 0, %v520_v26  ;;  %v595_v48 = vrot.slane %v1948_v24, 2  ;;  %v596_v55 = vrot.slane %v1951_v54, 2  ;;  %v2015_v49 = vld [vmem:[%s1717_s24 + $0x58] sm:$0xf] }
  0x5d   : > { %v1213_v46 = vrot.slane %v1199_v0, %v1737_v19  ;;  %v534_v59 = vor.u32 %v532_v50, %v531_v28  ;;  %v597_v60 = vrot.slane %v213_v3, 2  ;;  %v634_v18 = vmax.bf16 %v594_v51, %v1945_v41 }
  0x5e   : > { %v576_v2 = vsel %vm1779_vm3, 0, %v527_v52  ;;  %v635_v40 = vmax.bf16 %v595_v48, %v1948_v24  ;;  %v636_v4 = vmax.bf16 %v596_v55, %v1951_v54  ;;  %v812_v5 = vrot.slane %v208_v43, %v1737_v19 }
  0x5f   : > { %v1214_v7 = vcombine.low %v1206_v35, %v1213_v46  ;;  %v577_v8 = vsel %vm1779_vm3, 0, %v534_v59  ;;  %v637_v9 = vmax.bf16 %v597_v60, %v213_v3  ;;  %v654_v11 = vmax.bf16 %v634_v18, %v574_v32 }
  0x60   : > { %v1994_v14 = vmax.bf16 %v635_v40, %v575_v53  ;;  %v1996_v41 = vmax.bf16 %v636_v4, %v576_v2  ;;  %v813_v15 = vcombine.high %v812_v5, %v812_v5  ;;  %v820_v16 = vrot.slane %v210_v56, %v1737_v19 }
  0x61   : > { %1601 = vmatmul.mubr.bf16.gmra.mxu0 %v1214_v7  ;;  %v1999_v24 = vmax.bf16 %v637_v9, %v577_v8  ;;  %v828_v54 = vrot.slane %v212_v61, %v1737_v19  ;;  %v836_v17 = vrot.slane %v214_v63, %v1737_v19  ;;  %v1034_v20 = vrot.slane %v208_v43, 2 }
  0x62   : > { %v821_v21 = vcombine.high %v820_v16, %v820_v16  ;;  %v951_v3 = vshrl.u32 %v813_v15, 16  ;;  %v954_v23 = vshll.u32 %v813_v15, 16  ;;  %v1035_v29 = vrot.slane %v210_v56, 2  ;;  %1604 = vmatprep.mubr.msk.bf16.mxu0 %vm1661_vm0, %v1660_v1 }
  0x63   : > { %v829_v30 = vcombine.high %v828_v54, %v828_v54  ;;  %v837_v31 = vcombine.high %v836_v17, %v836_v17  ;;  %v1036_v33 = vrot.slane %v212_v61, 2  ;;  %v1037_v36 = vrot.slane %v214_v63, 2 }
  0x64   : > { %v953_v38 = vrot.slane %v951_v3, 7  ;;  %v958_v42 = vshrl.u32 %v821_v21, 16  ;;  %v961_v57 = vshll.u32 %v821_v21, 16  ;;  %v1074_v34 = vmax.bf16 %v1034_v20, %v208_v43 }
  0x65   : > { %v965_v44 = vshrl.u32 %v829_v30, 16  ;;  %v968_v45 = vshll.u32 %v829_v30, 16  ;;  %v972_v39 = vshrl.u32 %v837_v31, 16  ;;  %v975_v13 = vshll.u32 %v837_v31, 16 }
  0x66   : > { %v956_v1 = vor.u32 %v954_v23, %v953_v38  ;;  %v960_v10 = vrot.slane %v958_v42, 7  ;;  %v1075_v22 = vmax.bf16 %v1035_v29, %v210_v56  ;;  %v1076_v25 = vmax.bf16 %v1036_v33, %v212_v61  ;;  %v192_v38 = vld [vmem:[%s1717_s24 + $0x44] sm:$0xf] }
  0x67   : > { %v967_v12 = vrot.slane %v965_v44, 7  ;;  %v974_v27 = vrot.slane %v972_v39, 7  ;;  %v1077_v26 = vmax.bf16 %v1037_v36, %v214_v63  ;;  %v305_v50 = vrot.slane %v2006_v37, %v1737_v19 }
  0x68   : > { %v963_v51 = vor.u32 %v961_v57, %v960_v10  ;;  %v1014_v0 = vsel %vm1779_vm3, 0, %v956_v1  ;;  %v313_v35 = vrot.slane %v2009_v6, %v1737_v19  ;;  %v321_v43 = vrot.slane %v2012_v47, %v1737_v19 }
  0x69   : > { %v970_v28 = vor.u32 %v968_v45, %v967_v12  ;;  %v977_v32 = vor.u32 %v975_v13, %v974_v27  ;;  %v1094_v52 = vmax.bf16 %v1074_v34, %v1014_v0  ;;  %v306_v53 = vcombine.high %v305_v50, %v305_v50  ;;  %v194_v13 = vld [vmem:[%s1717_s24 + $0x4c] sm:$0xf] }
  0x6a   : > { %v1015_v48 = vsel %vm1779_vm3, 0, %v963_v51  ;;  %v314_v55 = vcombine.high %v313_v35, %v313_v35  ;;  %v322_v46 = vcombine.high %v321_v43, %v321_v43  ;;  %v329_v56 = vrot.slane %v2015_v49, %v1737_v19 }
  0x6b   : > { %v1016_v59 = vsel %vm1779_vm3, 0, %v970_v28  ;;  %v1017_v60 = vsel %vm1779_vm3, 0, %v977_v32  ;;  %v1095_v18 = vmax.bf16 %v1075_v22, %v1015_v48  ;;  %v1114_v61 = vmax.bf16 %v1094_v52, %v654_v11  ;;  %v196_v22 = vld [vmem:[%s1717_s24 + $0x54] sm:$0xf] }
  0x6c   : > { %v1096_v63 = vmax.bf16 %v1076_v25, %v1016_v59  ;;  %v1097_v2 = vmax.bf16 %v1077_v26, %v1017_v60  ;;  %v330_v40 = vcombine.high %v329_v56, %v329_v56  ;;  %v452_v4 = vshrl.u32 %v306_v53, 16  ;;  %v198_v25 = vld [vmem:[%s1717_s24 + $0x5c] sm:$0xf] }
  0x6d   : > { %v1115_v5 = vmax.bf16 %v1095_v18, %v1994_v14  ;;  %v1134_v7 = vmax.bf16 %v1663_v58, %v1114_v61  ;;  %v455_v8 = vshll.u32 %v306_v53, 16  ;;  %v459_v9 = vshrl.u32 %v314_v55, 16 }
  0x6e   : > { %v1116_v15 = vmax.bf16 %v1096_v63, %v1996_v41  ;;  %v1117_v16 = vmax.bf16 %v1097_v2, %v1999_v24  ;;  %v454_v54 = vrot.slane %v452_v4, 7  ;;  %v462_v17 = vshll.u32 %v314_v55, 16 }
  0x6f   : > { %v1135_v20 = vmax.bf16 %v1115_v5, %v1094_v52  ;;  %v461_v21 = vrot.slane %v459_v9, 7  ;;  %v466_v11 = vshrl.u32 %v322_v46, 16  ;;  %v469_v3 = vshll.u32 %v322_v46, 16 }
  0x70   : > { %v1136_v23 = vmax.bf16 %v1116_v15, %v1095_v18  ;;  %v1137_v29 = vmax.bf16 %v1117_v16, %v1096_v63  ;;  %v473_v30 = vshrl.u32 %v330_v40, 16  ;;  %v457_v31 = vor.u32 %v455_v8, %v454_v54 }
  0x71   : > { %v1249_v14 = vcombine.low %v1134_v7, %v1135_v20  ;;  %v468_v33 = vrot.slane %v466_v11, 7  ;;  %v476_v36 = vshll.u32 %v330_v40, 16  ;;  %v464_v42 = vor.u32 %v462_v17, %v461_v21 }
  0x72   : > { %v1250_v41 = vcombine.low %v1136_v23, %v1137_v29  ;;  %v475_v24 = vrot.slane %v473_v30, 7  ;;  %v586_v44 = vrot.slane %v2006_v37, 2  ;;  %v587_v45 = vrot.slane %v2009_v6, 2 }
  0x73   : > { %v1257_v57 = vrot.slane %v1249_v14, %v1737_v19  ;;  %v471_v34 = vor.u32 %v469_v3, %v468_v33  ;;  %v588_v10 = vrot.slane %v2012_v47, 2  ;;  %v566_v12 = vsel %vm1779_vm3, 0, %v457_v31 }
  0x74   : > { %v1264_v39 = vrot.slane %v1250_v41, %v1737_v19  ;;  %v478_v1 = vor.u32 %v476_v36, %v475_v24  ;;  %v748_v27 = vrot.slane %v192_v38, %v1737_v19  ;;  %v567_v50 = vsel %vm1779_vm3, 0, %v464_v42 }
  0x75   : > { %v568_v51 = vsel %vm1779_vm3, 0, %v471_v34  ;;  %v589_v0 = vrot.slane %v2015_v49, 2  ;;  %v626_v35 = vmax.bf16 %v586_v44, %v2006_v37  ;;  %v627_v43 = vmax.bf16 %v587_v45, %v2009_v6 }
  0x76   : > { %v1265_v26 = vcombine.low %v1257_v57, %v1264_v39  ;;  %v749_v28 = vcombine.high %v748_v27, %v748_v27  ;;  %v756_v32 = vrot.slane %v194_v13, %v1737_v19  ;;  %v569_v52 = vsel %vm1779_vm3, 0, %v478_v1 }
  0x77   : > { %v628_v53 = vmax.bf16 %v588_v10, %v2012_v47  ;;  %v764_v48 = vrot.slane %v196_v22, %v1737_v19  ;;  %v772_v55 = vrot.slane %v198_v25, %v1737_v19  ;;  %v1026_v60 = vrot.slane %v192_v38, 2 }
  0x78   : > { %1613 = vmatmul.mubr.bf16.gmra.mxu1 %v1265_v26  ;;  %v757_v46 = vcombine.high %v756_v32, %v756_v32  ;;  %v895_v56 = vshrl.u32 %v749_v28, 16  ;;  %v898_v59 = vshll.u32 %v749_v28, 16  ;;  %v1027_v6 = vrot.slane %v194_v13, 2 }
  0x79   : > { %v765_v37 = vcombine.high %v764_v48, %v764_v48  ;;  %v773_v18 = vcombine.high %v772_v55, %v772_v55  ;;  %v1028_v61 = vrot.slane %v196_v22, 2  ;;  %v1029_v4 = vrot.slane %v198_v25, 2 }
  0x7a   : > { %v897_v63 = vrot.slane %v895_v56, 7  ;;  %v902_v2 = vshrl.u32 %v757_v46, 16  ;;  %v905_v40 = vshll.u32 %v757_v46, 16  ;;  %v629_v9 = vmax.bf16 %v589_v0, %v2015_v49  ;;  %v1545_v0 = vld [vmem:[%s2087_s2] ss:$0 sm:$0xff] }
  0x7b   : > { %v909_v5 = vshrl.u32 %v765_v37, 16  ;;  %v912_v7 = vshll.u32 %v765_v37, 16  ;;  %v916_v8 = vshrl.u32 %v773_v18, 16  ;;  %v919_v47 = vshll.u32 %v773_v18, 16 }
  0x7c   : > { %v900_v15 = vor.u32 %v898_v59, %v897_v63  ;;  %v904_v16 = vrot.slane %v902_v2, 7  ;;  %v1066_v54 = vmax.bf16 %v1026_v60, %v192_v38  ;;  %v646_v17 = vmax.bf16 %v626_v35, %v566_v12 }
  0x7d   : > { %v911_v20 = vrot.slane %v909_v5, 7  ;;  %v918_v21 = vrot.slane %v916_v8, 7  ;;  %v1067_v11 = vmax.bf16 %v1027_v6, %v194_v13  ;;  %v1068_v29 = vmax.bf16 %v1028_v61, %v196_v22 }
  0x7e   : > { %v907_v3 = vor.u32 %v905_v40, %v904_v16  ;;  %v1006_v23 = vsel %vm1779_vm3, 0, %v900_v15  ;;  %v1069_v30 = vmax.bf16 %v1029_v4, %v198_v25  ;;  %v647_v14 = vmax.bf16 %v627_v43, %v567_v50 }
  0x7f   : > { %v914_v31 = vor.u32 %v912_v7, %v911_v20  ;;  %v921_v33 = vor.u32 %v919_v47, %v918_v21  ;;  %v1086_v36 = vmax.bf16 %v1066_v54, %v1006_v23  ;;  %v648_v41 = vmax.bf16 %v628_v53, %v568_v51 }
  0x80   : > { %v649_v42 = vmax.bf16 %v629_v9, %v569_v52  ;;  %v1007_v49 = vsel %vm1779_vm3, 0, %v907_v3  ;;  %vm1470_vm5 = vcmask 1042434   ;;  %vm1472_vm6 = vcmask 1043459  }
  0x81   : > { %v1008_v38 = vsel %vm1779_vm3, 0, %v914_v31  ;;  %v1009_v24 = vsel %vm1779_vm3, 0, %v921_v33  ;;  %v1087_v57 = vmax.bf16 %v1067_v11, %v1007_v49  ;;  %v1106_v34 = vmax.bf16 %v1086_v36, %v646_v17 }
  0x82   : > { %v1088_v44 = vmax.bf16 %v1068_v29, %v1008_v38  ;;  %v1089_v45 = vmax.bf16 %v1069_v30, %v1009_v24  ;;  %vm1474_vm7 = vcmask 1044484   ;;  %vm1478_vm8 = vcmask 1042432  }
  0x83   : > { %v1107_v39 = vmax.bf16 %v1087_v57, %v647_v14  ;;  %v1126_v13 = vmax.bf16 %v1663_v58, %v1106_v34  ;;  %vm1479_vm9 = vsmask.f32 2304 }
  0x84   : > { %v1108_v1 = vmax.bf16 %v1088_v44, %v648_v41  ;;  %v1109_v10 = vmax.bf16 %v1089_v45, %v649_v42  ;;  %vm1480_vm10 = vmand %vm1478_vm8, %vm1479_vm9 }
  0x85   : > { %v1127_v22 = vmax.bf16 %v1107_v39, %v1086_v36 }
  0x86   : > { %v1128_v25 = vmax.bf16 %v1108_v1, %v1087_v57  ;;  %v1129_v12 = vmax.bf16 %v1109_v10, %v1088_v44 }
  0x87   : > { %v1215_v27 = vcombine.low %v1126_v13, %v1127_v22 }
  0x88   : > { %v1216_v26 = vcombine.low %v1128_v25, %v1129_v12 }
  0x89   : > { %v1223_v50 = vrot.slane %v1215_v27, %v1737_v19 }
  0x8a   : > { %v1230_v51 = vrot.slane %v1216_v26, %v1737_v19 }
  0x8c   : > { %v1231_v62 = vcombine.low %v1223_v50, %v1230_v51 }
  0x8e   : > { %1605 = vmatmul.mubr.bf16.gmra.mxu0 %v1231_v62 }
  0xf3   : > { %v1353_v35 = vpop.f32.mrf.mxu0 }
  0xf4   : > { %v1354_v58 = vadd.f32 %v1545_v0, %v1353_v35 }
  0xf5   : > { %v1598_v43 = vpop.f32.mrf.mxu0 }
  0xf6   : > { %v1392_v53 = vmax.f32 %v1354_v58, 0.0 }
  0xf7   : > { %v1356_v28 = vpop.f32.mrf.mxu0 }
  0xf8   : > { %v1357_v32 = vadd.f32 %v1545_v0, %v1356_v28 }
  0xf9   : > { %v1599_v52 = vpop.f32.mrf.mxu0 }
  0xfa   : > { %v1393_v48 = vmax.f32 %v1357_v32, 0.0 }
  0xfc   : > { %v1402_v55 = vadd.f32 %v1393_v48, %v1392_v53 }
  0xfe   : > { %v1403_v30 = vrot.slane %v1402_v55, 4 }
 0x100   : > { %v1404_v36 = vadd.f32 %v1403_v30, %v1402_v55 }
 0x102   : > { %v1405_v24 = vrot.slane %v1404_v36, 2 }
 0x104   : > { %v1406_v10 = vadd.f32 %v1405_v24, %v1404_v36 }
 0x106   : > { %v1407_v62 = vrot.slane %v1406_v10, 1 }
 0x108   : > { %v1408_v52 = vadd.f32 %v1407_v62, %v1406_v10 }
 0x10a   : > { %v1377_v46 = vpop.f32.mrf.mxu1 }
 0x10b   : > { %v1378_v56 = vadd.f32 %v1545_v0, %v1377_v46 }
 0x10c   : > { %v1610_v59 = vpop.f32.mrf.mxu1 }
 0x10d   : > { %v1398_v19 = vmax.f32 %v1378_v56, 0.0  ;;  %v1438_v56 = vmul.f32 0.0625, %v1408_v52 }
 0x10e   : > { %v1380_v60 = vpop.f32.mrf.mxu1 }
 0x10f   : > { %v1381_v37 = vadd.f32 %v1545_v0, %v1380_v60 }
 0x110   : > { %v1611_v18 = vpop.f32.mrf.mxu1 }
 0x111   : > { %v1399_v6 = vmax.f32 %v1381_v37, 0.0 }
 0x113   : > { %v1423_v61 = vadd.f32 %v1399_v6, %v1398_v19  ;;  %v1562_v6 = vpack.c.bf16 %v1438_v56, %v1438_v56 }
 0x115   : > { %v1424_v14 = vrot.slane %v1423_v61, 4 }
 0x117   : > { %v1425_v41 = vadd.f32 %v1424_v14, %v1423_v61 }
 0x119   : > { %v1426_v44 = vrot.slane %v1425_v41, 2 }
 0x11b   : > { %v1427_v27 = vadd.f32 %v1426_v44, %v1425_v41 }
 0x11d   : > { %v1428_v43 = vrot.slane %v1427_v27, 1 }
 0x11f   : > { %v1429_v48 = vadd.f32 %v1428_v43, %v1427_v27 }
 0x121   : > { %v1361_v63 = vpop.f32.mrf.mxu0  ;;  %v1441_v60 = vmul.f32 0.0625, %v1429_v48 }
 0x122   : > { %v1362_v9 = vadd.f32 %v1545_v0, %v1361_v63 }
 0x123   : > { %v1602_v2 = vpop.f32.mrf.mxu0  ;;  %v1565_v63 = vpack.c.bf16 %v1441_v60, %v1441_v60 }
 0x124   : > { %v1394_v20 = vmax.f32 %v1362_v9, 0.0 }
 0x125   : > { %v1364_v40 = vpop.f32.mrf.mxu0 }
 0x126   : > { %v1365_v8 = vadd.f32 %v1545_v0, %v1364_v40 }
 0x127   : > { %v1603_v4 = vpop.f32.mrf.mxu0 }
 0x128   : > { %v1395_v16 = vmax.f32 %v1365_v8, 0.0  ;;  %v1466_v8 = vunpack.c.l.b16 %v1565_v63 }
 0x12a   : > { %v1409_v21 = vadd.f32 %v1395_v16, %v1394_v20 }
 0x12c   : > { %v1410_v23 = vrot.slane %v1409_v21, 4 }
 0x12e   : > { %v1411_v31 = vadd.f32 %v1410_v23, %v1409_v21 }
 0x130   : > { %v1412_v42 = vrot.slane %v1411_v31, 2 }
 0x132   : > { %v1413_v45 = vadd.f32 %v1412_v42, %v1411_v31 }
 0x134   : > { %v1414_v26 = vrot.slane %v1413_v45, 1 }
 0x136   : > { %v1415_v58 = vadd.f32 %v1414_v26, %v1413_v45 }
 0x138   : > { %v1385_v5 = vpop.f32.mrf.mxu1 }
 0x139   : > { %v1386_v54 = vadd.f32 %v1545_v0, %v1385_v5  ;;  %v1463_v5 = vunpack.c.l.b16 %v1562_v6 }
 0x13a   : > { %v1614_v7 = vpop.f32.mrf.mxu1 }
 0x13b   : > { %v1400_v11 = vmax.f32 %v1386_v54, 0.0 }
 0x13c   : > { %v1388_v47 = vpop.f32.mrf.mxu1 }
 0x13d   : > { %v1389_v17 = vadd.f32 %v1545_v0, %v1388_v47 }
 0x13e   : > { %v1615_v15 = vpop.f32.mrf.mxu1 }
 0x13f   : > { %v1401_v3 = vmax.f32 %v1389_v17, 0.0  ;;  %v1481_v17 = vld [vmem:[%s173_s15] sm:$0x7] }
 0x141   : > { %v1430_v29 = vadd.f32 %v1401_v3, %v1400_v11 }
 0x143   : > { %v1431_v33 = vrot.slane %v1430_v29, 4 }
 0x145   : > { %v1432_v38 = vadd.f32 %v1431_v33, %v1430_v29 }
 0x147   : > { %v1433_v13 = vrot.slane %v1432_v38, 2 }
 0x149   : > { %v1434_v50 = vadd.f32 %v1433_v13, %v1432_v38 }
 0x14b   : > { %v1435_v28 = vrot.slane %v1434_v50, 1 }
 0x14d   : > { %v1436_v55 = vadd.f32 %v1435_v28, %v1434_v50 }
 0x14e   : > { %v1369_v49 = vpop.f32.mrf.mxu0 }
 0x14f   : > { %v1370_v34 = vadd.f32 %v1545_v0, %v1369_v49  ;;  %v1442_v37 = vmul.f32 0.0625, %v1436_v55 }
 0x150   : > { %v1606_v57 = vpop.f32.mrf.mxu0 }
 0x151   : > { %v1396_v25 = vmax.f32 %v1370_v34, 0.0  ;;  %v1566_v40 = vpack.c.bf16 %v1442_v37, %v1442_v37 }
 0x152   : > { %v1372_v39 = vpop.f32.mrf.mxu0 }
 0x153   : > { %v1373_v1 = vadd.f32 %v1545_v0, %v1372_v39  ;;  %v1439_v0 = vmul.f32 0.0625, %v1415_v58  ;;  %v1467_v9 = vunpack.c.l.b16 %v1566_v40 }
 0x154   : > { %v1607_v22 = vpop.f32.mrf.mxu0 }
 0x155   : > { %v1397_v12 = vmax.f32 %v1373_v1, 0.0  ;;  %v1563_v19 = vpack.c.bf16 %v1439_v0, %v1439_v0 }
 0x157   : > { %v1416_v51 = vadd.f32 %v1397_v12, %v1396_v25  ;;  %v1464_v2 = vunpack.c.l.b16 %v1563_v19 }
 0x159   : > { %v1417_v35 = vrot.slane %v1416_v51, 4  ;;  %v1469_v47 = vsel %vm1468_vm4, %v1464_v2, %v1463_v5 }
 0x15b   : > { %v1418_v32 = vadd.f32 %v1417_v35, %v1416_v51 }
 0x15d   : > { %v1419_v53 = vrot.slane %v1418_v32, 2 }
 0x15f   : > { %v1420_v46 = vadd.f32 %v1419_v53, %v1418_v32 }
 0x161   : > { %v1421_v59 = vrot.slane %v1420_v46, 1 }
 0x163   : > { %v1422_v18 = vadd.f32 %v1421_v59, %v1420_v46 }
 0x165   : > { %v1440_v61 = vmul.f32 0.0625, %v1422_v18 }
 0x167   : > { %v1564_v4 = vpack.c.bf16 %v1440_v61, %v1440_v61 }
 0x169   : > { %v1465_v7 = vunpack.c.l.b16 %v1564_v4 }
 0x16b   : > { %v1471_v15 = vsel %vm1470_vm5, %v1465_v7, %v1469_v47 }
 0x16c   : > { %v1473_v16 = vsel %vm1472_vm6, %v1466_v8, %v1471_v15 }
 0x16d   : > { %v1475_v54 = vsel %vm1474_vm7, %v1467_v9, %v1473_v16 }
 0x16e   : > { %v1476_v20 = vpack.c.b16 %v1475_v54, %v1475_v54 }
 0x170   : > { %v1482_v21 = vsel %vm1480_vm10, %v1476_v20, %v1481_v17 }
 0x171   : > { %1483 = vst [vmem:[%s173_s15] sm:$0x7] %v1482_v21 }
 0x172 PF: > { %s13_s12 = sadd.s32 1, %s1658_s12  }
 0x173   : > { %p10_p5 = scmp.ge.s32.totalorder %s13_s12, 4  }
 0x175   :  { %12 = sbr.rel (!%p10_p5) target bundleno = 1 (0x1), region = 62 }

// kernel: forward.5
= control target key start
LH: loop header
LB: loop body
LE: loop exit
PB: predicated region body
PF: predicated region fallthrough
CT: control target
= control target key end

     0   :  { %s3983_s0 = inlined_call_operand.vmem [shape: bf16[2,5,128], index: 0, kind: input, shape index: {}]   ;;  %s3984_s1 = inlined_call_operand.vmem [shape: bf16[5,5], index: 1, kind: input, shape index: {}]   ;;  %s3985_s2 = inlined_call_operand.vmem [shape: bf16[5,5], index: 2, kind: input, shape index: {}]   ;;  %s3986_s3 = inlined_call_operand.vmem [shape: f32[1,5], index: 3, kind: input, shape index: {}]   ;;  %s3987_s4 = inlined_call_operand.vmem [shape: bf16[3,128,128], index: 4, kind: input, shape index: {}]   ;;  %s3988_s5 = inlined_call_operand.vmem [shape: f32[1,128], index: 5, kind: input, shape index: {}]   ;;  %s3989_s6 = inlined_call_operand.vmem [shape: bf16[3,128,128], index: 6, kind: input, shape index: {}]   ;;  %s3990_s7 = inlined_call_operand.vmem [shape: f32[1,128], index: 7, kind: input, shape index: {}]   ;;  %s3991_s8 = inlined_call_operand.vmem [shape: bf16[3,128,128], index: 8, kind: input, shape index: {}]   ;;  %s3992_s9 = inlined_call_operand.vmem [shape: f32[1,128], index: 9, kind: input, shape index: {}]   ;;  %s3993_s10 = inlined_call_operand.vmem [shape: bf16[3,128,128], index: 10, kind: input, shape index: {}]   ;;  %s3994_s11 = inlined_call_operand.vmem [shape: f32[1,128], index: 11, kind: input, shape index: {}]   ;;  %s3995_s12 = inlined_call_operand.vmem [shape: bf16[128,128], index: 12, kind: input, shape index: {}]   ;;  %s3996_s13 = inlined_call_operand.vmem [shape: f32[1,128], index: 13, kind: input, shape index: {}]   ;;  %s3997_s14 = inlined_call_operand.hbm [shape: f32[2,1,128], index: 14, kind: output, shape index: {}]  }
   0x1   :  { %4001 = sst [smem:[#allocation8_spill]] %s3983_s0 }
   0x2   :  { %19 = vsyncpa [#allocation3], 0 }
   0x3   :  { %21 = vsyncpa [#allocation3 + $0x1], 0  ;;  %s3360_s29 = smov 0   ;;  %s3362_s30 = smov 0  }
   0x4   :  { %s3364_s15 = smov 0   ;;  %s3366_s16 = smov 0  }
   0x5 LB: > { %4002 = sst [smem:[#allocation5_spill]] %s3275_s15  ;;  %s3381_s17 = sadd.s32 4294967295, %s3279_s16   ;;  %s3279_s16 = sphi %s3366_s16, %s4008_s16   ;;  %s3275_s15 = sphi %s3364_s15, %s4013_s15   ;;  %s3271_s30 = sphi %s3362_s30, %s4012_s30   ;;  %s3267_s29 = sphi %s3360_s29, %s4011_s29  }
   0x6   : > { %s2369_s18 = sadd.s32 4294967294, %s3279_s16   ;;  %s3385_s19 = sadd.s32 1, %s3279_s16  }
   0x7   : > { %4003 = sst [smem:[#allocation6_spill]] %s3385_s19  ;;  %s333_s20 = sadd.s32 1, %s3275_s15 }
   0x8   : > { %s330_s21 = ssub.s32 %s3279_s16, %s3385_s19  ;;  %p343_p0 = scmp.ne.s32.totalorder %s3275_s15, %s3271_s30 }
   0x9   : > { %p331_p1 = scmp.eq.s32.totalorder %s330_s21, 0  ;;  %p344_p2 = scmp.eq.s32.totalorder %s3381_s17, 1 }
   0xa   : > { %p349_p3 = scmp.ne.s32.totalorder %s3271_s30, %s3267_s29  ;;  %p350_p4 = scmp.eq.s32.totalorder %s2369_s18, 1 }
   0xb   : > { %s3396_s22 = scalar_select %p331_p1, %s3275_s15, %s333_s20  }
   0xc   : > { %p3398_p5 = por %p344_p2, %p343_p0  ;;  %p3402_p6 = por %p350_p4, %p349_p3 }
   0xd   : > { %4004 = sst [smem:[#allocation7_spill]] %s3396_s22  ;;  %p2372_p7 = scmp.ge.s32.totalorder %s3279_s16, 1 }
   0xe   : > { %p414_p8 = scmp.lt.s32.totalorder %s3279_s16, 3 }
  0x10   : > { %p415_p9 = pnand %p2372_p7, %p414_p8 }
  0x11   : > { %p458_p10 = scmp.lt.s32.totalorder (!%p415_p9), %s3381_s17, 1  ;;  %s4007_s0 = sld [smem:[#allocation8_spill]] (!%p415_p9) }
  0x12   : > { %418 = sbr.rel (%p415_p9) target bundleno = 2055 (0x807), region = 76  ;;  %s2620_s22 = sshll.u32 (!%p415_p9), %s3381_s17, 4 }
  0x13   : > { %s3942_s21 = scalar_lea.hbm (!%p415_p9), %s3997_s14, %s2620_s22 }
  0x17   : > { %vm470_vm0 = vcmask 1041408   ;;  %v3281_v0 = vmov 0.0   ;;  %vm471_vm1 = vcmask 1042432   ;;  %v3282_v1 = vmov 65535   ;;  %s459_s25 = scalar_select %p458_p10, %s3381_s17, 1  ;;  %v3113_v7 = vld [vmem:[%s3987_s4 + $0x78] sm:$0xff]  }
  0x18   : > { %2758 = vmatprep.subr.bf16.mxu0 %v3281_v0  ;;  %2764 = vmatprep.subr.bf16.mxu1 %v3281_v0  ;;  %v472_v2 = vsel %vm470_vm0, 4294967295, %v3282_v1  ;;  %vm3283_vm2 = vmmov 0   ;;  %v3425_v6 = vld [vmem:[%s3984_s1] sm:$0x7]  ;;  %vm466_vm3 = vcmask 39936   ;;  %v3121_v9 = vld [vmem:[%s3987_s4 + $0x38] sm:$0xff]  }
  0x19   : > { %2760 = vmatprep.mubr.msk.bf16.mxu0 %vm3283_vm2, %v3281_v0  ;;  %2766 = vmatprep.mubr.msk.bf16.mxu1 %vm3283_vm2, %v3281_v0  ;;  %s2373_s26 = sshll.u32 %s459_s25, 2  ;;  %v3416_v3 = vsel %vm471_vm1, %v472_v2, 0  ;;  %v3433_v8 = vld [vmem:[%s3985_s2] sm:$0x7]  ;;  %v3114_v10 = vld [vmem:[%s3987_s4 + $0x70] sm:$0xff]   ;;  %v3115_v12 = vld [vmem:[%s3987_s4 + $0x68] sm:$0xff]  }
  0x1a   : > { %s461_s18 = scalar_lea.vmem %s4007_s0, %s2373_s26  ;;  %v3123_v11 = vld [vmem:[%s3987_s4 + $0x30] sm:$0xff]   ;;  %v3125_v13 = vld [vmem:[%s3987_s4 + $0x28] sm:$0xff]   ;;  %v3116_v14 = vld [vmem:[%s3987_s4 + $0x60] sm:$0xff]   ;;  %vm2120_vm4 = vcmask 1044480   ;;  %s456_s26 = sand.u32 1, %s3271_s30  }
  0x1b   : > { %v463_v4 = vld [vmem:[%s461_s18] sm:$0x7]  ;;  %v3117_v16 = vld [vmem:[%s3987_s4 + $0x58] sm:$0xff]   ;;  %v3118_v18 = vld [vmem:[%s3987_s4 + $0x50] sm:$0xff]   ;;  %s457_s19 = scalar_lea.vmem [#allocation2], %s456_s26  ;;  %s2302_s25 = scalar_lea.sflag [#allocation3], %s456_s26 }
  0x1c   : > { %v475_v5 = vand.u32 %v3416_v3, %v463_v4  ;;  %v3127_v15 = vld [vmem:[%s3987_s4 + $0x20] sm:$0xff]   ;;  %v3129_v17 = vld [vmem:[%s3987_s4 + $0x18] sm:$0xff]   ;;  %v3131_v19 = vld [vmem:[%s3987_s4 + $0x10] sm:$0xff]   ;;  %s2314_s28 = sshll.u32 %s457_s19, 4  ;;  %s3284_s17 = smov [#allocation2]   ;;  %s3944_s28 = int_to_ptr.vmem [resolvable:$true] %s2314_s28 }
  0x1d   : > { %v3119_v20 = vld [vmem:[%s3987_s4 + $0x48] sm:$0xff]   ;;  %v3120_v22 = vld [vmem:[%s3987_s4 + $0x40] sm:$0xff]   ;;  %v3122_v23 = vld [vmem:[%s3987_s4 + $0xb8] sm:$0xff]   ;;  %s3219_s27 = scalar_lea.vmem %s3944_s28, 16  ;;  %s3223_s15 = sshll.u32 %s3284_s17, 4  ;;  %s3224_s15 = int_to_ptr.vmem [resolvable:$false] %s3223_s15 }
  0x1e   : > { %2759 = vmatpush3.bf16.msra.mxu0 %v475_v5  ;;  %2765 = vmatpush3.bf16.msra.mxu1 %v475_v5  ;;  %v3133_v21 = vld [vmem:[%s3987_s4 + $0x8] sm:$0xff]   ;;  %v3124_v24 = vld [vmem:[%s3987_s4 + $0xb0] sm:$0xff]   ;;  %v3128_v26 = vld [vmem:[%s3987_s4 + $0xa0] sm:$0xff]   ;;  %p3220_p11 = scmp.ne.s32.totalorder %s3944_s28, %s3219_s27  ;;  %s3225_s18 = scalar_lea.vmem %s3224_s15, 32 }
  0x1f   : > { %2770 = vmatprep.subr.bf16.mxu0 %v3281_v0  ;;  %2790 = vmatprep.subr.bf16.mxu1 %v3281_v0  ;;  %v3126_v25 = vld [vmem:[%s3987_s4 + $0xa8] sm:$0xff]   ;;  %v3130_v27 = vld [vmem:[%s3987_s4 + $0x98] sm:$0xff]   ;;  %v3132_v28 = vld [vmem:[%s3987_s4 + $0x90] sm:$0xff]   ;;  %p3226_p0 = scmp.lt.s32.totalorder %s3944_s28, %s3224_s15  ;;  %p3227_p1 = scmp.lt.s32.totalorder %s3225_s18, %s3219_s27 }
  0x20   : > { %v3134_v29 = vld [vmem:[%s3987_s4 + $0x88] sm:$0xff]   ;;  %v3135_v30 = vld [vmem:[%s3987_s4] sm:$0xff]   ;;  %v3145_v46 = vld [vmem:[%s3989_s6 + $0x38] sm:$0xff]   ;;  %p3221_p12 = pnand %p3220_p11, %p3398_p5 }
  0x21   : > { %2761 = vmatmul.mubr.msk.bf16.vlgmr.msra.gmra.mxu0 %vm466_vm3, %v3425_v6  ;;  %2767 = vmatmul.mubr.msk.bf16.vlgmr.msra.gmra.mxu1 %vm466_vm3, %v3433_v8  ;;  %v3136_v31 = vld [vmem:[%s3987_s4 + $0x80] sm:$0xff]   ;;  %v3146_v47 = vld [vmem:[%s3989_s6 + $0x30] sm:$0xff]   ;;  %v3147_v48 = vld [vmem:[%s3989_s6 + $0x28] sm:$0xff]   ;;  %p3228_p2 = por %p3227_p1, %p3226_p0 }
  0x22   : > { %2771 = vmatpush3.bf16.msra.mxu0 %v3113_v7  ;;  %2786 = vmatprep.mubr.msk.bf16.mxu0 %vm3283_vm2, %v3281_v0  ;;  %v3149_v49 = vld [vmem:[%s3989_s6 + $0x20] sm:$0xff]   ;;  %v3151_v50 = vld [vmem:[%s3989_s6 + $0x18] sm:$0xff]   ;;  %v3153_v51 = vld [vmem:[%s3989_s6 + $0x10] sm:$0xff]   ;;  %p3222_p13 = pneg %p3221_p12 }
  0x23   : > { %2772 = vmatprep.subr.bf16.mxu0 %v3281_v0  ;;  %2791 = vmatpush3.bf16.msra.mxu1 %v3121_v9  ;;  %v3155_v52 = vld [vmem:[%s3989_s6 + $0x8] sm:$0xff]   ;;  %v2432_v56 = vld [vmem:[%s3988_s5] ss:$0 sm:$0xff]  ;;  %v3137_v7 = vld [vmem:[%s3989_s6 + $0x78] sm:$0xff]  }
  0x24   : > { %2792 = vmatprep.subr.bf16.mxu1 %v3281_v0  ;;  %2806 = vmatprep.mubr.msk.bf16.mxu1 %vm3283_vm2, %v3281_v0  ;;  %v3138_v9 = vld [vmem:[%s3989_s6 + $0x70] sm:$0xff]   ;;  %p3229_p3 = pnand %p3228_p2, %p3222_p13 }
  0x26   : > { %2773 = vmatpush3.bf16.msra.mxu0 %v3114_v10  ;;  %v3139_v10 = vld [vmem:[%s3989_s6 + $0x68] sm:$0xff]  }
  0x27   : > { %2774 = vmatprep.subr.bf16.mxu0 %v3281_v0  ;;  %2793 = vmatpush3.bf16.msra.mxu1 %v3123_v11  ;;  %v3140_v11 = vld [vmem:[%s3989_s6 + $0x60] sm:$0xff]  }
  0x28   : > { %2794 = vmatprep.subr.bf16.mxu1 %v3281_v0 }
  0x2a   : > { %2775 = vmatpush3.bf16.msra.mxu0 %v3115_v12  ;;  %v3141_v12 = vld [vmem:[%s3989_s6 + $0x58] sm:$0xff]  }
  0x2b   : > { %2776 = vmatprep.subr.bf16.mxu0 %v3281_v0  ;;  %2795 = vmatpush3.bf16.msra.mxu1 %v3125_v13  ;;  %v3142_v13 = vld [vmem:[%s3989_s6 + $0x50] sm:$0xff]  }
  0x2c   : > { %2796 = vmatprep.subr.bf16.mxu1 %v3281_v0 }
  0x2e   : > { %2777 = vmatpush3.bf16.msra.mxu0 %v3116_v14  ;;  %v3143_v14 = vld [vmem:[%s3989_s6 + $0x48] sm:$0xff]  }
  0x2f   : > { %2778 = vmatprep.subr.bf16.mxu0 %v3281_v0  ;;  %2797 = vmatpush3.bf16.msra.mxu1 %v3127_v15  ;;  %v3144_v15 = vld [vmem:[%s3989_s6 + $0x40] sm:$0xff]  }
  0x30   : > { %2798 = vmatprep.subr.bf16.mxu1 %v3281_v0 }
  0x32   : > { %2779 = vmatpush3.bf16.msra.mxu0 %v3117_v16  ;;  %v3148_v16 = vld [vmem:[%s3989_s6 + $0xb8] sm:$0xff]  }
  0x33   : > { %2780 = vmatprep.subr.bf16.mxu0 %v3281_v0  ;;  %2799 = vmatpush3.bf16.msra.mxu1 %v3129_v17  ;;  %v3150_v17 = vld [vmem:[%s3989_s6 + $0xb0] sm:$0xff]  }
  0x34   : > { %2800 = vmatprep.subr.bf16.mxu1 %v3281_v0 }
  0x36   : > { %2781 = vmatpush3.bf16.msra.mxu0 %v3118_v18  ;;  %v3152_v18 = vld [vmem:[%s3989_s6 + $0xa8] sm:$0xff]  }
  0x37   : > { %2782 = vmatprep.subr.bf16.mxu0 %v3281_v0  ;;  %2801 = vmatpush3.bf16.msra.mxu1 %v3131_v19  ;;  %v3154_v19 = vld [vmem:[%s3989_s6 + $0xa0] sm:$0xff]  }
  0x38   : > { %2802 = vmatprep.subr.bf16.mxu1 %v3281_v0 }
  0x3a   : > { %2783 = vmatpush3.bf16.msra.mxu0 %v3119_v20  ;;  %v3156_v20 = vld [vmem:[%s3989_s6 + $0x98] sm:$0xff]  }
  0x3b   : > { %2784 = vmatprep.subr.bf16.mxu0 %v3281_v0  ;;  %2803 = vmatpush3.bf16.msra.mxu1 %v3133_v21  ;;  %v3157_v21 = vld [vmem:[%s3989_s6] sm:$0xff]  }
  0x3c   : > { %2804 = vmatprep.subr.bf16.mxu1 %v3281_v0 }
  0x3e   : > { %2785 = vmatpush3.bf16.msra.mxu0 %v3120_v22  ;;  %v3158_v22 = vld [vmem:[%s3989_s6 + $0x90] sm:$0xff]  }
  0x3f   : > { %2810 = vmatprep.subr.bf16.mxu0 %v3281_v0  ;;  %2805 = vmatpush3.bf16.msra.mxu1 %v3135_v30 }
  0x40   : > { %2830 = vmatprep.subr.bf16.mxu1 %v3281_v0 }
  0x41   : > { %2787 = vmatmul.mubr.bf16.vlgmr.msra.gmra.mxu0 %v463_v4 }
  0x42   : > { %2811 = vmatpush3.bf16.msra.mxu0 %v3122_v23  ;;  %2826 = vmatprep.mubr.msk.bf16.mxu0 %vm3283_vm2, %v3281_v0  ;;  %v3159_v23 = vld [vmem:[%s3989_s6 + $0x88] sm:$0xff]  }
  0x43   : > { %2812 = vmatprep.subr.bf16.mxu0 %v3281_v0 }
  0x46   : > { %2813 = vmatpush3.bf16.msra.mxu0 %v3124_v24  ;;  %v3160_v24 = vld [vmem:[%s3989_s6 + $0x80] sm:$0xff]  }
  0x47   : > { %2814 = vmatprep.subr.bf16.mxu0 %v3281_v0 }
  0x4a   : > { %2815 = vmatpush3.bf16.msra.mxu0 %v3126_v25 }
  0x4b   : > { %2816 = vmatprep.subr.bf16.mxu0 %v3281_v0 }
  0x4e   : > { %2817 = vmatpush3.bf16.msra.mxu0 %v3128_v26 }
  0x4f   : > { %2818 = vmatprep.subr.bf16.mxu0 %v3281_v0 }
  0x52   : > { %2819 = vmatpush3.bf16.msra.mxu0 %v3130_v27 }
  0x53   : > { %2820 = vmatprep.subr.bf16.mxu0 %v3281_v0 }
  0x56   : > { %2821 = vmatpush3.bf16.msra.mxu0 %v3132_v28 }
  0x57   : > { %2822 = vmatprep.subr.bf16.mxu0 %v3281_v0 }
  0x5a   : > { %2823 = vmatpush3.bf16.msra.mxu0 %v3134_v29 }
  0x5b   : > { %2824 = vmatprep.subr.bf16.mxu0 %v3281_v0 }
  0x5e   : > { %2825 = vmatpush3.bf16.msra.mxu0 %v3136_v31 }
  0x5f   : > { %2862 = vmatprep.subr.bf16.mxu0 %v3281_v0 }
  0xe1   : > { %v511_v32 = vpop.f32.mrf.mxu0  ;;  %v555_v33 = vpop.f32.mrf.mxu1 }
  0xe2   : > { %v517_v34 = vpack.c.bf16 %v511_v32, %v511_v32  ;;  %v561_v35 = vpack.c.bf16 %v555_v33, %v555_v33 }
  0xe3   : > { %v2762_v36 = vpop.f32.mrf.mxu0  ;;  %v2768_v37 = vpop.f32.mrf.mxu1 }
  0xe4   : > { %2807 = vmatmul.mubr.bf16.vlgmr.msra.gmra.mxu1 %v517_v34  ;;  %2827 = vmatmul.mubr.bf16.vlgmr.msra.gmra.mxu0 %v561_v35 }
  0xe5   : > { %v514_v38 = vpop.f32.mrf.mxu0  ;;  %v558_v39 = vpop.f32.mrf.mxu1  ;;  %2832 = vmatprep.mubr.msk.bf16.mxu1 %vm3283_vm2, %v3281_v0  ;;  %2878 = vmatprep.mubr.msk.bf16.mxu0 %vm3283_vm2, %v3281_v0 }
  0xe6   : > { %2863 = vmatpush3.bf16.msra.mxu0 %v3145_v46 }
  0xe7   : > { %v2763_v40 = vpop.f32.mrf.mxu0  ;;  %v2769_v41 = vpop.f32.mrf.mxu1  ;;  %2864 = vmatprep.subr.bf16.mxu0 %v3281_v0 }
  0xea   : > { %2865 = vmatpush3.bf16.msra.mxu0 %v3146_v47 }
  0xeb   : > { %2866 = vmatprep.subr.bf16.mxu0 %v3281_v0 }
  0xee   : > { %2867 = vmatpush3.bf16.msra.mxu0 %v3147_v48 }
  0xef   : > { %2868 = vmatprep.subr.bf16.mxu0 %v3281_v0 }
  0xf2   : > { %2869 = vmatpush3.bf16.msra.mxu0 %v3149_v49 }
  0xf3   : > { %2870 = vmatprep.subr.bf16.mxu0 %v3281_v0 }
  0xf6   : > { %2871 = vmatpush3.bf16.msra.mxu0 %v3151_v50 }
  0xf7   : > { %2872 = vmatprep.subr.bf16.mxu0 %v3281_v0 }
  0xfa   : > { %2873 = vmatpush3.bf16.msra.mxu0 %v3153_v51 }
  0xfb   : > { %2874 = vmatprep.subr.bf16.mxu0 %v3281_v0 }
  0xfe   : > { %2875 = vmatpush3.bf16.msra.mxu0 %v3155_v52 }
  0xff   : > { %2876 = vmatprep.subr.bf16.mxu0 %v3281_v0 }
 0x101   : > { %v677_v42 = vpop.f32.mrf.mxu0 }
 0x102   : > { %2877 = vmatpush3.bf16.msra.mxu0 %v3157_v21 }
 0x103   : > { %v2788_v43 = vpop.f32.mrf.mxu0  ;;  %2908 = vmatprep.subr.bf16.mxu0 %v3281_v0 }
 0x105   : > { %v680_v44 = vpop.f32.mrf.mxu0 }
 0x107   : > { %v2789_v45 = vpop.f32.mrf.mxu0 }
 0x108   : > { %v2491_v45 = vld [vmem:[%s3990_s7] ss:$0 sm:$0xff] }
 0x1a4   : > { %v765_v53 = vpop.f32.mrf.mxu1  ;;  %v870_v54 = vpop.f32.mrf.mxu0 }
 0x1a5   : > { %v766_v55 = vadd.f32 %v765_v53, %v677_v42 }
 0x1a6   : > { %v2808_v57 = vpop.f32.mrf.mxu1  ;;  %v2828_v58 = vpop.f32.mrf.mxu0 }
 0x1a7   : > { %v876_v59 = vadd.f32 %v870_v54, %v766_v55  ;;  %v3161_v54 = vld [vmem:[%s3991_s8 + $0x78] sm:$0xff]   ;;  %v3171_v57 = vld [vmem:[%s3991_s8 + $0x30] sm:$0xff]   ;;  %v3164_v58 = vld [vmem:[%s3991_s8 + $0x60] sm:$0xff]  }
 0x1a8   : > { %v768_v60 = vpop.f32.mrf.mxu1  ;;  %v873_v61 = vpop.f32.mrf.mxu0  ;;  %v3169_v55 = vld [vmem:[%s3991_s8 + $0x38] sm:$0xff]  }
 0x1a9   : > { %v884_v62 = vadd.f32 %v2432_v56, %v876_v59  ;;  %v3162_v56 = vld [vmem:[%s3991_s8 + $0x70] sm:$0xff]   ;;  %v3175_v59 = vld [vmem:[%s3991_s8 + $0x20] sm:$0xff]   ;;  %v3165_v60 = vld [vmem:[%s3991_s8 + $0x58] sm:$0xff]  }
 0x1aa   : > { %v2809_v63 = vpop.f32.mrf.mxu1  ;;  %v2829_v1 = vpop.f32.mrf.mxu0  ;;  %v3177_v61 = vld [vmem:[%s3991_s8 + $0x18] sm:$0xff]  }
 0x1ab   : > { %v885_v2 = vmax.f32 %v884_v62, 0.0  ;;  %v3166_v62 = vld [vmem:[%s3991_s8 + $0x50] sm:$0xff]   ;;  %v3167_v1 = vld [vmem:[%s3991_s8 + $0x48] sm:$0xff]  }
 0x1ac   : > { %v3179_v63 = vld [vmem:[%s3991_s8 + $0x10] sm:$0xff]  }
 0x1ad   : > { %v886_v4 = vpack.c.bf16 %v885_v2, %v885_v2  ;;  %v3181_v2 = vld [vmem:[%s3991_s8 + $0x8] sm:$0xff]  }
 0x1af   : > { %v888_v5 = vand.u32 %v886_v4, %v3416_v3 }
 0x1b1   : > { %2831 = vmatpush3.bf16.msra.mxu1 %v888_v5 }
 0x1b2   : > { %2836 = vmatprep.subr.bf16.mxu1 %v3281_v0 }
 0x1b4   : > { %2833 = vmatmul.mubr.msk.bf16.vlgmr.msra.gmra.mxu1 %vm466_vm3, %v3425_v6 }
 0x1b5   : > { %2837 = vmatpush3.bf16.msra.mxu1 %v888_v5  ;;  %2838 = vmatprep.mubr.msk.bf16.mxu1 %vm3283_vm2, %v3281_v0  ;;  %v3170_v5 = vld [vmem:[%s3991_s8 + $0xb8] sm:$0xff]  }
 0x1b6   : > { %2842 = vmatprep.subr.bf16.mxu1 %v3281_v0 }
 0x1bc   : > { %2839 = vmatmul.mubr.msk.bf16.vlgmr.msra.gmra.mxu1 %vm466_vm3, %v3433_v8 }
 0x1bd   : > { %2843 = vmatpush3.bf16.msra.mxu1 %v3137_v7  ;;  %2858 = vmatprep.mubr.msk.bf16.mxu1 %vm3283_vm2, %v3281_v0  ;;  %v3172_v7 = vld [vmem:[%s3991_s8 + $0xb0] sm:$0xff]  }
 0x1be   : > { %2844 = vmatprep.subr.bf16.mxu1 %v3281_v0 }
 0x1c1   : > { %2845 = vmatpush3.bf16.msra.mxu1 %v3138_v9  ;;  %v3174_v9 = vld [vmem:[%s3991_s8 + $0xa8] sm:$0xff]  }
 0x1c2   : > { %2846 = vmatprep.subr.bf16.mxu1 %v3281_v0 }
 0x1c5   : > { %2847 = vmatpush3.bf16.msra.mxu1 %v3139_v10  ;;  %v3176_v10 = vld [vmem:[%s3991_s8 + $0xa0] sm:$0xff]  }
 0x1c6   : > { %2848 = vmatprep.subr.bf16.mxu1 %v3281_v0 }
 0x1c9   : > { %2849 = vmatpush3.bf16.msra.mxu1 %v3140_v11  ;;  %v3178_v11 = vld [vmem:[%s3991_s8 + $0x98] sm:$0xff]  }
 0x1ca   : > { %2850 = vmatprep.subr.bf16.mxu1 %v3281_v0 }
 0x1cd   : > { %2851 = vmatpush3.bf16.msra.mxu1 %v3141_v12  ;;  %v3180_v12 = vld [vmem:[%s3991_s8 + $0x90] sm:$0xff]  }
 0x1ce   : > { %2852 = vmatprep.subr.bf16.mxu1 %v3281_v0 }
 0x1d1   : > { %2853 = vmatpush3.bf16.msra.mxu1 %v3142_v13  ;;  %v3182_v13 = vld [vmem:[%s3991_s8 + $0x88] sm:$0xff]  }
 0x1d2   : > { %2854 = vmatprep.subr.bf16.mxu1 %v3281_v0 }
 0x1d5   : > { %2855 = vmatpush3.bf16.msra.mxu1 %v3143_v14  ;;  %v3183_v14 = vld [vmem:[%s3991_s8] sm:$0xff]  }
 0x1d6   : > { %2856 = vmatprep.subr.bf16.mxu1 %v3281_v0 }
 0x1d9   : > { %2857 = vmatpush3.bf16.msra.mxu1 %v3144_v15  ;;  %v3184_v15 = vld [vmem:[%s3991_s8 + $0x80] sm:$0xff]  }
 0x1da   : > { %2882 = vmatprep.subr.bf16.mxu1 %v3281_v0 }
 0x1dc   : > { %2859 = vmatmul.mubr.bf16.vlgmr.msra.gmra.mxu1 %v886_v4  ;;  %v3168_v4 = vld [vmem:[%s3991_s8 + $0x40] sm:$0xff]  }
 0x1dd   : > { %2883 = vmatpush3.bf16.msra.mxu1 %v3148_v16  ;;  %2898 = vmatprep.mubr.msk.bf16.mxu1 %vm3283_vm2, %v3281_v0 }
 0x1de   : > { %2884 = vmatprep.subr.bf16.mxu1 %v3281_v0 }
 0x1e1   : > { %2885 = vmatpush3.bf16.msra.mxu1 %v3150_v17 }
 0x1e2   : > { %2886 = vmatprep.subr.bf16.mxu1 %v3281_v0 }
 0x1e5   : > { %2887 = vmatpush3.bf16.msra.mxu1 %v3152_v18 }
 0x1e6   : > { %2888 = vmatprep.subr.bf16.mxu1 %v3281_v0 }
 0x1e9   : > { %2889 = vmatpush3.bf16.msra.mxu1 %v3154_v19 }
 0x1ea   : > { %2890 = vmatprep.subr.bf16.mxu1 %v3281_v0 }
 0x1ed   : > { %2891 = vmatpush3.bf16.msra.mxu1 %v3156_v20 }
 0x1ee   : > { %2892 = vmatprep.subr.bf16.mxu1 %v3281_v0 }
 0x1f1   : > { %2893 = vmatpush3.bf16.msra.mxu1 %v3158_v22 }
 0x1f2   : > { %2894 = vmatprep.subr.bf16.mxu1 %v3281_v0 }
 0x1f5   : > { %2895 = vmatpush3.bf16.msra.mxu1 %v3159_v23 }
 0x1f6   : > { %2896 = vmatprep.subr.bf16.mxu1 %v3281_v0 }
 0x1f9   : > { %2897 = vmatpush3.bf16.msra.mxu1 %v3160_v24 }
 0x1fa   : > { %2902 = vmatprep.subr.bf16.mxu1 %v3281_v0 }
 0x274   : > { %v924_v25 = vpop.f32.mrf.mxu1 }
 0x275   : > { %v930_v26 = vpack.c.bf16 %v924_v25, %v924_v25 }
 0x276   : > { %v2834_v27 = vpop.f32.mrf.mxu1 }
 0x277   : > { %2879 = vmatmul.mubr.bf16.vlgmr.msra.gmra.mxu0 %v930_v26 }
 0x278   : > { %v927_v28 = vpop.f32.mrf.mxu1  ;;  %2910 = vmatprep.mubr.msk.bf16.mxu0 %vm3283_vm2, %v3281_v0 }
 0x27a   : > { %v2835_v29 = vpop.f32.mrf.mxu1 }
 0x27c   : > { %v965_v30 = vpop.f32.mrf.mxu1 }
 0x27d   : > { %v971_v31 = vpack.c.bf16 %v965_v30, %v965_v30  ;;  %v3193_v30 = vld [vmem:[%s3993_s10 + $0x38] sm:$0xff]  }
 0x27e   : > { %v2840_v32 = vpop.f32.mrf.mxu1 }
 0x27f   : > { %2899 = vmatmul.mubr.bf16.vlgmr.msra.gmra.mxu1 %v971_v31  ;;  %v3194_v31 = vld [vmem:[%s3993_s10 + $0x30] sm:$0xff]   ;;  %v3195_v32 = vld [vmem:[%s3993_s10 + $0x28] sm:$0xff]  }
 0x280   : > { %v968_v33 = vpop.f32.mrf.mxu1  ;;  %2904 = vmatprep.mubr.msk.bf16.mxu1 %vm3283_vm2, %v3281_v0 }
 0x281   : > { %v3197_v33 = vld [vmem:[%s3993_s10 + $0x20] sm:$0xff]  }
 0x282   : > { %v2841_v34 = vpop.f32.mrf.mxu1 }
 0x283   : > { %v3199_v34 = vld [vmem:[%s3993_s10 + $0x18] sm:$0xff]  }
 0x29c   : > { %v1087_v35 = vpop.f32.mrf.mxu1 }
 0x29e   : > { %v2860_v36 = vpop.f32.mrf.mxu1 }
 0x29f   : > { %v3203_v36 = vld [vmem:[%s3993_s10 + $0x8] sm:$0xff]  }
 0x2a0   : > { %v1090_v37 = vpop.f32.mrf.mxu1 }
 0x2a2   : > { %v2861_v38 = vpop.f32.mrf.mxu1 }
 0x337   : > { %v1175_v39 = vpop.f32.mrf.mxu0 }
 0x338   : > { %v1176_v43 = vadd.f32 %v1175_v39, %v1087_v35  ;;  %v3201_v35 = vld [vmem:[%s3993_s10 + $0x10] sm:$0xff]  }
 0x339   : > { %v2880_v40 = vpop.f32.mrf.mxu0 }
 0x33a   : > { %v2550_v40 = vld [vmem:[%s3992_s9] ss:$0 sm:$0xff] }
 0x33b   : > { %v1178_v41 = vpop.f32.mrf.mxu0 }
 0x33d   : > { %v2881_v42 = vpop.f32.mrf.mxu0 }
 0x33f   : > { %v1280_v44 = vpop.f32.mrf.mxu1 }
 0x340   : > { %v1286_v46 = vadd.f32 %v1280_v44, %v1176_v43 }
 0x341   : > { %v2900_v47 = vpop.f32.mrf.mxu1 }
 0x342   : > { %v1294_v48 = vadd.f32 %v2491_v45, %v1286_v46 }
 0x343   : > { %v1283_v49 = vpop.f32.mrf.mxu1 }
 0x344   : > { %v1295_v50 = vmax.f32 %v1294_v48, 0.0 }
 0x345   : > { %v2901_v51 = vpop.f32.mrf.mxu1 }
 0x346   : > { %v1296_v52 = vpack.c.bf16 %v1295_v50, %v1295_v50 }
 0x348   : > { %v1298_v53 = vand.u32 %v1296_v52, %v3416_v3 }
 0x34a   : > { %2903 = vmatpush3.bf16.msra.mxu1 %v1298_v53  ;;  %2909 = vmatpush3.bf16.msra.mxu0 %v1298_v53  ;;  %v3185_v53 = vld [vmem:[%s3993_s10 + $0x78] sm:$0xff]  }
 0x34b   : > { %2914 = vmatprep.subr.bf16.mxu0 %v3281_v0  ;;  %2934 = vmatprep.subr.bf16.mxu1 %v3281_v0 }
 0x34d   : > { %2905 = vmatmul.mubr.msk.bf16.vlgmr.msra.gmra.mxu1 %vm466_vm3, %v3425_v6  ;;  %2911 = vmatmul.mubr.msk.bf16.vlgmr.msra.gmra.mxu0 %vm466_vm3, %v3433_v8  ;;  %v3163_v6 = vld [vmem:[%s3991_s8 + $0x68] sm:$0xff]  }
 0x34e   : > { %2915 = vmatpush3.bf16.msra.mxu0 %v3161_v54  ;;  %2930 = vmatprep.mubr.msk.bf16.mxu0 %vm3283_vm2, %v3281_v0  ;;  %v3173_v8 = vld [vmem:[%s3991_s8 + $0x28] sm:$0xff]   ;;  %v3186_v54 = vld [vmem:[%s3993_s10 + $0x70] sm:$0xff]  }
 0x34f   : > { %2916 = vmatprep.subr.bf16.mxu0 %v3281_v0  ;;  %2935 = vmatpush3.bf16.msra.mxu1 %v3169_v55  ;;  %v3187_v55 = vld [vmem:[%s3993_s10 + $0x68] sm:$0xff]  }
 0x350   : > { %2936 = vmatprep.subr.bf16.mxu1 %v3281_v0  ;;  %2950 = vmatprep.mubr.msk.bf16.mxu1 %vm3283_vm2, %v3281_v0 }
 0x352   : > { %2917 = vmatpush3.bf16.msra.mxu0 %v3162_v56  ;;  %v3188_v56 = vld [vmem:[%s3993_s10 + $0x60] sm:$0xff]  }
 0x353   : > { %2918 = vmatprep.subr.bf16.mxu0 %v3281_v0  ;;  %2937 = vmatpush3.bf16.msra.mxu1 %v3171_v57  ;;  %v3189_v57 = vld [vmem:[%s3993_s10 + $0x58] sm:$0xff]  }
 0x354   : > { %2938 = vmatprep.subr.bf16.mxu1 %v3281_v0 }
 0x356   : > { %2919 = vmatpush3.bf16.msra.mxu0 %v3163_v6  ;;  %v3190_v6 = vld [vmem:[%s3993_s10 + $0x50] sm:$0xff]  }
 0x357   : > { %2920 = vmatprep.subr.bf16.mxu0 %v3281_v0  ;;  %2939 = vmatpush3.bf16.msra.mxu1 %v3173_v8  ;;  %v3191_v8 = vld [vmem:[%s3993_s10 + $0x48] sm:$0xff]  }
 0x358   : > { %2940 = vmatprep.subr.bf16.mxu1 %v3281_v0 }
 0x35a   : > { %2921 = vmatpush3.bf16.msra.mxu0 %v3164_v58  ;;  %v3192_v58 = vld [vmem:[%s3993_s10 + $0x40] sm:$0xff]  }
 0x35b   : > { %2922 = vmatprep.subr.bf16.mxu0 %v3281_v0  ;;  %2941 = vmatpush3.bf16.msra.mxu1 %v3175_v59  ;;  %v3196_v59 = vld [vmem:[%s3993_s10 + $0xb8] sm:$0xff]  }
 0x35c   : > { %2942 = vmatprep.subr.bf16.mxu1 %v3281_v0 }
 0x35e   : > { %2923 = vmatpush3.bf16.msra.mxu0 %v3165_v60  ;;  %v3198_v60 = vld [vmem:[%s3993_s10 + $0xb0] sm:$0xff]  }
 0x35f   : > { %2924 = vmatprep.subr.bf16.mxu0 %v3281_v0  ;;  %2943 = vmatpush3.bf16.msra.mxu1 %v3177_v61  ;;  %v3200_v61 = vld [vmem:[%s3993_s10 + $0xa8] sm:$0xff]  }
 0x360   : > { %2944 = vmatprep.subr.bf16.mxu1 %v3281_v0 }
 0x362   : > { %2925 = vmatpush3.bf16.msra.mxu0 %v3166_v62  ;;  %v3202_v62 = vld [vmem:[%s3993_s10 + $0xa0] sm:$0xff]  }
 0x363   : > { %2926 = vmatprep.subr.bf16.mxu0 %v3281_v0  ;;  %2945 = vmatpush3.bf16.msra.mxu1 %v3179_v63  ;;  %v3204_v63 = vld [vmem:[%s3993_s10 + $0x98] sm:$0xff]  }
 0x364   : > { %2946 = vmatprep.subr.bf16.mxu1 %v3281_v0 }
 0x366   : > { %2927 = vmatpush3.bf16.msra.mxu0 %v3167_v1  ;;  %v3205_v1 = vld [vmem:[%s3993_s10] sm:$0xff]  }
 0x367   : > { %2928 = vmatprep.subr.bf16.mxu0 %v3281_v0  ;;  %2947 = vmatpush3.bf16.msra.mxu1 %v3181_v2  ;;  %v3206_v2 = vld [vmem:[%s3993_s10 + $0x90] sm:$0xff]  }
 0x368   : > { %2948 = vmatprep.subr.bf16.mxu1 %v3281_v0 }
 0x36a   : > { %2929 = vmatpush3.bf16.msra.mxu0 %v3168_v4  ;;  %v3207_v4 = vld [vmem:[%s3993_s10 + $0x88] sm:$0xff]  }
 0x36b   : > { %2954 = vmatprep.subr.bf16.mxu0 %v3281_v0  ;;  %2949 = vmatpush3.bf16.msra.mxu1 %v3183_v14 }
 0x36c   : > { %2974 = vmatprep.subr.bf16.mxu1 %v3281_v0 }
 0x36d   : > { %2931 = vmatmul.mubr.bf16.vlgmr.msra.gmra.mxu0 %v1296_v52  ;;  %v3217_v52 = vld [vmem:[%s3984_s1] sm:$0x7] }
 0x36e   : > { %2955 = vmatpush3.bf16.msra.mxu0 %v3170_v5  ;;  %2970 = vmatprep.mubr.msk.bf16.mxu0 %vm3283_vm2, %v3281_v0  ;;  %v3208_v5 = vld [vmem:[%s3993_s10 + $0x80] sm:$0xff]  }
 0x36f   : > { %2956 = vmatprep.subr.bf16.mxu0 %v3281_v0 }
 0x372   : > { %2957 = vmatpush3.bf16.msra.mxu0 %v3172_v7 }
 0x373   : > { %2958 = vmatprep.subr.bf16.mxu0 %v3281_v0 }
 0x376   : > { %2959 = vmatpush3.bf16.msra.mxu0 %v3174_v9 }
 0x377   : > { %2960 = vmatprep.subr.bf16.mxu0 %v3281_v0 }
 0x37a   : > { %2961 = vmatpush3.bf16.msra.mxu0 %v3176_v10 }
 0x37b   : > { %2962 = vmatprep.subr.bf16.mxu0 %v3281_v0 }
 0x37e   : > { %2963 = vmatpush3.bf16.msra.mxu0 %v3178_v11 }
 0x37f   : > { %2964 = vmatprep.subr.bf16.mxu0 %v3281_v0 }
 0x382   : > { %2965 = vmatpush3.bf16.msra.mxu0 %v3180_v12 }
 0x383   : > { %2966 = vmatprep.subr.bf16.mxu0 %v3281_v0 }
 0x386   : > { %2967 = vmatpush3.bf16.msra.mxu0 %v3182_v13 }
 0x387   : > { %2968 = vmatprep.subr.bf16.mxu0 %v3281_v0 }
 0x38a   : > { %2969 = vmatpush3.bf16.msra.mxu0 %v3184_v15 }
 0x38b   : > { %3006 = vmatprep.subr.bf16.mxu0 %v3281_v0 }
 0x40d   : > { %v1334_v16 = vpop.f32.mrf.mxu1  ;;  %v1375_v17 = vpop.f32.mrf.mxu0 }
 0x40e   : > { %v1340_v18 = vpack.c.bf16 %v1334_v16, %v1334_v16  ;;  %v1381_v19 = vpack.c.bf16 %v1375_v17, %v1375_v17 }
 0x40f   : > { %v2906_v20 = vpop.f32.mrf.mxu1  ;;  %v2912_v21 = vpop.f32.mrf.mxu0 }
 0x410   : > { %2951 = vmatmul.mubr.bf16.vlgmr.msra.gmra.mxu1 %v1340_v18  ;;  %2971 = vmatmul.mubr.bf16.vlgmr.msra.gmra.mxu0 %v1381_v19 }
 0x411   : > { %v1337_v22 = vpop.f32.mrf.mxu1  ;;  %v1378_v23 = vpop.f32.mrf.mxu0  ;;  %2976 = vmatprep.mubr.msk.bf16.mxu1 %vm3283_vm2, %v3281_v0  ;;  %3022 = vmatprep.mubr.msk.bf16.mxu0 %vm3283_vm2, %v3281_v0 }
 0x412   : > { %3007 = vmatpush3.bf16.msra.mxu0 %v3193_v30  ;;  %v3209_v22 = vld [vmem:[%s3995_s12 + $0x38] sm:$0xff]   ;;  %v3210_v23 = vld [vmem:[%s3995_s12 + $0x30] sm:$0xff]  }
 0x413   : > { %v2907_v24 = vpop.f32.mrf.mxu1  ;;  %v2913_v25 = vpop.f32.mrf.mxu0  ;;  %3008 = vmatprep.subr.bf16.mxu0 %v3281_v0 }
 0x414   : > { %v3211_v24 = vld [vmem:[%s3995_s12 + $0x28] sm:$0xff]   ;;  %v3212_v25 = vld [vmem:[%s3995_s12 + $0x20] sm:$0xff]  }
 0x416   : > { %3009 = vmatpush3.bf16.msra.mxu0 %v3194_v31 }
 0x417   : > { %3010 = vmatprep.subr.bf16.mxu0 %v3281_v0 }
 0x41a   : > { %3011 = vmatpush3.bf16.msra.mxu0 %v3195_v32 }
 0x41b   : > { %3012 = vmatprep.subr.bf16.mxu0 %v3281_v0 }
 0x41e   : > { %3013 = vmatpush3.bf16.msra.mxu0 %v3197_v33 }
 0x41f   : > { %3014 = vmatprep.subr.bf16.mxu0 %v3281_v0 }
 0x422   : > { %3015 = vmatpush3.bf16.msra.mxu0 %v3199_v34 }
 0x423   : > { %3016 = vmatprep.subr.bf16.mxu0 %v3281_v0 }
 0x426   : > { %3017 = vmatpush3.bf16.msra.mxu0 %v3201_v35  ;;  %v2609_v35 = vld [vmem:[%s3994_s11] ss:$0 sm:$0xff] }
 0x427   : > { %3018 = vmatprep.subr.bf16.mxu0 %v3281_v0 }
 0x42a   : > { %3019 = vmatpush3.bf16.msra.mxu0 %v3203_v36 }
 0x42b   : > { %3020 = vmatprep.subr.bf16.mxu0 %v3281_v0 }
 0x42d   : > { %v1497_v26 = vpop.f32.mrf.mxu0 }
 0x42e   : > { %3021 = vmatpush3.bf16.msra.mxu0 %v3205_v1 }
 0x42f   : > { %v2932_v27 = vpop.f32.mrf.mxu0  ;;  %3051 = vmatprep.subr.bf16.mxu0 %v3281_v0 }
 0x430   : > { %v3214_v27 = vld [vmem:[%s3995_s12 + $0x10] sm:$0xff]  }
 0x431   : > { %v1500_v28 = vpop.f32.mrf.mxu0 }
 0x432   : > { %v3215_v28 = vld [vmem:[%s3995_s12 + $0x8] sm:$0xff]  }
 0x433   : > { %v2933_v29 = vpop.f32.mrf.mxu0 }
 0x4d0   : > { %v1585_v37 = vpop.f32.mrf.mxu1  ;;  %v1690_v38 = vpop.f32.mrf.mxu0 }
 0x4d1   : > { %v1586_v39 = vadd.f32 %v1585_v37, %v1497_v26  ;;  %v3213_v26 = vld [vmem:[%s3995_s12 + $0x18] sm:$0xff]  }
 0x4d2   : > { %v2952_v41 = vpop.f32.mrf.mxu1  ;;  %v2972_v42 = vpop.f32.mrf.mxu0 }
 0x4d3   : > { %v1696_v43 = vadd.f32 %v1690_v38, %v1586_v39  ;;  %v3216_v42 = vld [vmem:[%s3995_s12] sm:$0xff]  }
 0x4d4   : > { %v1588_v44 = vpop.f32.mrf.mxu1  ;;  %v1693_v45 = vpop.f32.mrf.mxu0 }
 0x4d5   : > { %v1704_v46 = vadd.f32 %v2550_v40, %v1696_v43 }
 0x4d6   : > { %v2953_v47 = vpop.f32.mrf.mxu1  ;;  %v2973_v48 = vpop.f32.mrf.mxu0 }
 0x4d7   : > { %v1705_v49 = vmax.f32 %v1704_v46, 0.0  ;;  %v2211_v46 = vld [vmem:[%s3996_s13] sm:$0x1] }
 0x4d9   : > { %v1706_v50 = vpack.c.bf16 %v1705_v49, %v1705_v49 }
 0x4db   : > { %v1708_v51 = vand.u32 %v1706_v50, %v3416_v3  ;;  %v3218_v3 = vld [vmem:[%s3985_s2] sm:$0x7] }
 0x4dd   : > { %2975 = vmatpush3.bf16.msra.mxu1 %v1708_v51 }
 0x4de   : > { %2980 = vmatprep.subr.bf16.mxu1 %v3281_v0 }
 0x4e0   : > { %2977 = vmatmul.mubr.msk.bf16.vlgmr.msra.gmra.mxu1 %vm466_vm3, %v3217_v52 }
 0x4e1   : > { %2981 = vmatpush3.bf16.msra.mxu1 %v1708_v51  ;;  %2982 = vmatprep.mubr.msk.bf16.mxu1 %vm3283_vm2, %v3281_v0 }
 0x4e2   : > { %2986 = vmatprep.subr.bf16.mxu1 %v3281_v0 }
 0x4e8   : > { %2983 = vmatmul.mubr.msk.bf16.vlgmr.msra.gmra.mxu1 %vm466_vm3, %v3218_v3 }
 0x4e9   : > { %2987 = vmatpush3.bf16.msra.mxu1 %v3185_v53  ;;  %3002 = vmatprep.mubr.msk.bf16.mxu1 %vm3283_vm2, %v3281_v0 }
 0x4ea   : > { %2988 = vmatprep.subr.bf16.mxu1 %v3281_v0 }
 0x4ed   : > { %2989 = vmatpush3.bf16.msra.mxu1 %v3186_v54 }
 0x4ee   : > { %2990 = vmatprep.subr.bf16.mxu1 %v3281_v0 }
 0x4f1   : > { %2991 = vmatpush3.bf16.msra.mxu1 %v3187_v55 }
 0x4f2   : > { %2992 = vmatprep.subr.bf16.mxu1 %v3281_v0 }
 0x4f5   : > { %2993 = vmatpush3.bf16.msra.mxu1 %v3188_v56 }
 0x4f6   : > { %2994 = vmatprep.subr.bf16.mxu1 %v3281_v0 }
 0x4f9   : > { %2995 = vmatpush3.bf16.msra.mxu1 %v3189_v57 }
 0x4fa   : > { %2996 = vmatprep.subr.bf16.mxu1 %v3281_v0 }
 0x4fd   : > { %2997 = vmatpush3.bf16.msra.mxu1 %v3190_v6 }
 0x4fe   : > { %2998 = vmatprep.subr.bf16.mxu1 %v3281_v0 }
 0x501   : > { %2999 = vmatpush3.bf16.msra.mxu1 %v3191_v8 }
 0x502   : > { %3000 = vmatprep.subr.bf16.mxu1 %v3281_v0 }
 0x505   : > { %3001 = vmatpush3.bf16.msra.mxu1 %v3192_v58 }
 0x506   : > { %3026 = vmatprep.subr.bf16.mxu1 %v3281_v0 }
 0x508   : > { %3003 = vmatmul.mubr.bf16.vlgmr.msra.gmra.mxu1 %v1706_v50 }
 0x509   : > { %3027 = vmatpush3.bf16.msra.mxu1 %v3196_v59  ;;  %3042 = vmatprep.mubr.msk.bf16.mxu1 %vm3283_vm2, %v3281_v0 }
 0x50a   : > { %3028 = vmatprep.subr.bf16.mxu1 %v3281_v0 }
 0x50d   : > { %3029 = vmatpush3.bf16.msra.mxu1 %v3198_v60 }
 0x50e   : > { %3030 = vmatprep.subr.bf16.mxu1 %v3281_v0 }
 0x511   : > { %3031 = vmatpush3.bf16.msra.mxu1 %v3200_v61 }
 0x512   : > { %3032 = vmatprep.subr.bf16.mxu1 %v3281_v0 }
 0x515   : > { %3033 = vmatpush3.bf16.msra.mxu1 %v3202_v62 }
 0x516   : > { %3034 = vmatprep.subr.bf16.mxu1 %v3281_v0 }
 0x519   : > { %3035 = vmatpush3.bf16.msra.mxu1 %v3204_v63 }
 0x51a   : > { %3036 = vmatprep.subr.bf16.mxu1 %v3281_v0 }
 0x51d   : > { %3037 = vmatpush3.bf16.msra.mxu1 %v3206_v2 }
 0x51e   : > { %3038 = vmatprep.subr.bf16.mxu1 %v3281_v0 }
 0x521   : > { %3039 = vmatpush3.bf16.msra.mxu1 %v3207_v4 }
 0x522   : > { %3040 = vmatprep.subr.bf16.mxu1 %v3281_v0 }
 0x525   : > { %3041 = vmatpush3.bf16.msra.mxu1 %v3208_v5 }
 0x526   : > { %3046 = vmatprep.subr.mxu1 %v3281_v0 }
 0x5a0   : > { %v1744_v7 = vpop.f32.mrf.mxu1 }
 0x5a1   : > { %v1750_v9 = vpack.c.bf16 %v1744_v7, %v1744_v7 }
 0x5a2   : > { %v2978_v10 = vpop.f32.mrf.mxu1 }
 0x5a3   : > { %3023 = vmatmul.mubr.bf16.vlgmr.msra.gmra.mxu0 %v1750_v9 }
 0x5a4   : > { %v1747_v11 = vpop.f32.mrf.mxu1  ;;  %3067 = vmatprep.mubr.msk.bf16.mxu0 %vm3283_vm2, %v3281_v0  ;;  %3052 = vmatpush3.bf16.msra.mxu0 %v3209_v22 }
 0x5a5   : > { %3053 = vmatprep.subr.bf16.mxu0 %v3281_v0 }
 0x5a6   : > { %v2979_v12 = vpop.f32.mrf.mxu1 }
 0x5a8   : > { %v1785_v13 = vpop.f32.mrf.mxu1  ;;  %3054 = vmatpush3.bf16.msra.mxu0 %v3210_v23 }
 0x5a9   : > { %v1791_v14 = vpack.c.bf16 %v1785_v13, %v1785_v13  ;;  %3055 = vmatprep.subr.bf16.mxu0 %v3281_v0 }
 0x5aa   : > { %v2984_v15 = vpop.f32.mrf.mxu1 }
 0x5ab   : > { %3043 = vmatmul.mubr.bf16.vlgmr.msra.gmra.mxu1 %v1791_v14 }
 0x5ac   : > { %v1788_v16 = vpop.f32.mrf.mxu1  ;;  %3048 = vmatprep.mubr.msk.f32.mxu1 %vm3283_vm2, %v3281_v0  ;;  %3056 = vmatpush3.bf16.msra.mxu0 %v3211_v24 }
 0x5ad   : > { %3057 = vmatprep.subr.bf16.mxu0 %v3281_v0 }
 0x5ae   : > { %v2985_v17 = vpop.f32.mrf.mxu1 }
 0x5b0   : > { %3058 = vmatpush3.bf16.msra.mxu0 %v3212_v25 }
 0x5b1   : > { %3059 = vmatprep.subr.bf16.mxu0 %v3281_v0 }
 0x5b4   : > { %3060 = vmatpush3.bf16.msra.mxu0 %v3213_v26 }
 0x5b5   : > { %3061 = vmatprep.subr.bf16.mxu0 %v3281_v0 }
 0x5b8   : > { %3062 = vmatpush3.bf16.msra.mxu0 %v3214_v27 }
 0x5b9   : > { %3063 = vmatprep.subr.bf16.mxu0 %v3281_v0 }
 0x5bc   : > { %3064 = vmatpush3.bf16.msra.mxu0 %v3215_v28 }
 0x5bd   : > { %3065 = vmatprep.subr.bf16.mxu0 %v3281_v0  ;;  %v2116_v0 = vld [vmem:[%s3986_s3] sm:$0x1] }
 0x5c0   : > { %3066 = vmatpush3.bf16.msra.mxu0 %v3216_v42 }
 0x5c8   : > { %v1907_v18 = vpop.f32.mrf.mxu1 }
 0x5ca   : > { %v3004_v19 = vpop.f32.mrf.mxu1 }
 0x5cc   : > { %v1910_v20 = vpop.f32.mrf.mxu1 }
 0x5ce   : > { %v3005_v21 = vpop.f32.mrf.mxu1 }
 0x663   : > { %v1995_v29 = vpop.f32.mrf.mxu0 }
 0x664   : > { %v1996_v33 = vadd.f32 %v1995_v29, %v1907_v18 }
 0x665   : > { %v3024_v30 = vpop.f32.mrf.mxu0 }
 0x667   : > { %v1998_v31 = vpop.f32.mrf.mxu0 }
 0x669   : > { %v3025_v32 = vpop.f32.mrf.mxu0 }
 0x66b   : > { %v2100_v34 = vpop.f32.mrf.mxu1 }
 0x66c   : > { %v2106_v36 = vadd.f32 %v2100_v34, %v1996_v33 }
 0x66d   : > { %v3044_v37 = vpop.f32.mrf.mxu1 }
 0x66e   : > { %v2114_v38 = vadd.f32 %v2609_v35, %v2106_v36 }
 0x66f   : > { %v2103_v39 = vpop.f32.mrf.mxu1 }
 0x670   : > { %v2115_v40 = vmax.f32 %v2114_v38, 0.0 }
 0x671   : > { %v3045_v41 = vpop.f32.mrf.mxu1 }
 0x672   : > { %3047 = vmatpush3.msk.msra.mxu1 %vm2120_vm4, %v2115_v40 }
 0x673   : > { %3049 = vmatmul.mubr.msk.f32.vlgmr.msra.gmra.mxu1 %vm466_vm3, %v2116_v0 }
 0x733   : > { %v2190_v43 = vpop.f32.mrf.mxu1 }
 0x734   : > { %v2194_v44 = vpack.c.bf16 %v2190_v43, %v2190_v43 }
 0x735   : > { %v3050_v45 = vpop.f32.mrf.mxu1 }
 0x736   : > { %3068 = vmatmul.mubr.bf16.vlgmr.msra.gmra.mxu0 %v2194_v44 }
 0x7f6   : > { %v2294_v47 = vpop.f32.mrf.mxu0 }
 0x7f7   : > { %v2295_v48 = vadd.f32 %v2294_v47, %v2211_v46 }
 0x7f8   : > { %v3069_v49 = vpop.f32.mrf.mxu0 }
 0x7f9   : > { %2300 = vst [vmem:[%s457_s19] sm:$0x1] %v2295_v48 }
 0x7fa   : > { %v2297_v50 = vpop.f32.mrf.mxu0 }
 0x7fb   : > { %3232 = shalt.err (!%p3229_p3)
}
 0x7fc   : > { %s3233_s22 = scalar_lea.hbm %s3942_s21, 16  ;;  %s3237_s20 = scalar_lea.hbm %s3997_s14, 32 }
 0x7fd   : > { %p3234_p4 = scmp.ne.s32.totalorder %s3942_s21, %s3233_s22  ;;  %p3238_p9 = scmp.lt.s32.totalorder %s3942_s21, %s3997_s14 }
 0x7fe   : > { %p3239_p10 = scmp.lt.s32.totalorder %s3237_s20, %s3233_s22 }
 0x7ff   : > { %p3235_p7 = pnand %p3234_p4, %p3398_p5 }
 0x800   : > { %p3240_p11 = por %p3239_p10, %p3238_p9 }
 0x801   : > { %p3236_p8 = pneg %p3235_p7 }
 0x803   : > { %p3241_p12 = pnand %p3240_p11, %p3236_p8 }
 0x805   : > { %3244 = shalt.err (!%p3241_p12)
}
 0x806   : > { %3071 = dma.vmem_to_hbm [thread:$0]  (%p3398_p5), %s3944_s28, 16, %s3942_s21, %s2302_s25   ;;  %v3070_v51 = vpop.f32.mrf.mxu0 }
 0x807 PF: > { %p3077_p13 = scmp.ge.s32.totalorder %s3279_s16, 2  ;;  %s2326_s27 = sand.u32 1, %s3267_s29  }
 0x808   : > { %s2327_s0 = scalar_lea.sflag [#allocation3], %s2326_s27 }
 0x809   : > { %p3074_p0 = pnand %p3077_p13, %p3402_p6 }
 0x80b   : > { %p3075_p1 = pneg %p3074_p0 }
 0x80d   : > { %3262 = dma.done.wait (%p3075_p1), %s2327_s0, 16  }
 0x80e   : > { %3264 = vsyncadd (%p3075_p1), %s2327_s0, 4294967280  ;;  %s4008_s16 = sld [smem:[#allocation6_spill]]  ;;  %s4011_s29 = smov %s3271_s30 }
 0x80f   : > { %s4009_s15 = sld [smem:[#allocation5_spill]] }
 0x810   : > { %s4010_s23 = sld [smem:[#allocation7_spill]] }
 0x814   : > { %p24_p2 = scmp.ge.s32.totalorder %s4008_s16, 4  }
 0x815   : > { %s4012_s30 = smov %s4009_s15 }
 0x816   : > { %s4013_s15 = smov %s4010_s23  ;;  %26 = sbr.rel (!%p24_p2) target bundleno = 5 (0x5), region = 119 }
 0x81b   :  { %2331 = vsyncpa [#allocation3], 1 }
 0x81c   :  { %2333 = vsyncpa [#allocation3 + $0x1], 1 }

</bundles_post_ra>
